<compile_context>
chip_gen: v6e
topology: v6e:2x2x1
jax: 0.10.0
libtpu: 0.0.40
codegen_flags: <defaults>
</compile_context>

<pallas_src>
import functools

import jax
import jax.numpy as jnp
from jax.experimental import pallas as pl
from jax.experimental.pallas import tpu as pltpu

EPS = 1e-5
LEAK = 0.01

_VMEM = pl.BlockSpec(memory_space=pltpu.MemorySpace.VMEM)


# ----------------------------------------------------------------------------
# Kernel A: fused conv stack  core1 -> core2_1 -> core3_1 -> core4
# (one batch element per grid step; BatchNorm already folded into weights)
# ----------------------------------------------------------------------------
def _conv_stack_kernel(p1_ref, w1_ref, b1_ref, w2_ref, b2_ref, w3_ref, b3_ref,
                       w4_ref, b4_ref, out_ref, pad2_ref, pad3_ref, *, leak):
    l1 = p1_ref.shape[0]            # 158 : length after core1
    l4 = l1 - 1                     # 157 : length after core4 (k=2, no pad)
    k23 = w2_ref.shape[0]           # 9
    pad = (k23 - 1) // 2            # 4  : 'same' padding for k=9
    off = 8                         # sublane-aligned data offset in scratch

    def lrelu(y):
        return jnp.where(y >= 0, y, leak * y)

    # Zero the padded scratch (tiny, a handful of vector stores); border rows
    # provide the 'same' zero padding.  Zeroing every step keeps the kernel
    # correct when the "parallel" grid axis is split across TensorCores.
    pad2_ref[...] = jnp.zeros_like(pad2_ref)
    pad3_ref[...] = jnp.zeros_like(pad3_ref)

    # ---- core1 (wrapper-side im2col) + BN + LeakyReLU -----------------------
    h1 = jnp.dot(p1_ref[...], w1_ref[...],
                 preferred_element_type=jnp.float32) + b1_ref[...]
    h1 = lrelu(h1)                                            # (158, 8)

    # ---- core2_1: k=9 'same' conv as 9 shifted-slice matmuls ----------------
    pad2_ref[pl.ds(off, l1), :] = h1
    acc = b2_ref[...]
    for t in range(k23):
        acc = acc + jnp.dot(pad2_ref[pl.ds(off - pad + t, l1), :],
                            w2_ref[t], preferred_element_type=jnp.float32)
    h2 = lrelu(jnp.tanh(acc))                                 # (158, 16)

    # ---- core3_1: k=9 'same' conv -------------------------------------------
    pad3_ref[pl.ds(off, l1), :] = h2
    acc = b3_ref[...]
    for t in range(k23):
        acc = acc + jnp.dot(pad3_ref[pl.ds(off - pad + t, l1), :],
                            w3_ref[t], preferred_element_type=jnp.float32)
    h3 = lrelu(jnp.tanh(acc))                                 # (158, 32)

    # ---- core4: k=2, no padding, BN folded, no activation -------------------
    h4 = (jnp.dot(h3[0:l4, :], w4_ref[0], preferred_element_type=jnp.float32)
          + jnp.dot(h3[1:l1, :], w4_ref[1], preferred_element_type=jnp.float32)
          + b4_ref[...])                                      # (157, 64)
    out_ref[...] = h4


# ----------------------------------------------------------------------------
# Kernel B: core5 -> core6 -> 4 fused heads -> TPL
# ----------------------------------------------------------------------------
def _dense_head_kernel(hf_ref, w5t_ref, b5_ref, w6_ref, b6_ref, wh_ref, bh_ref,
                       o_ref, *, leak):
    def lrelu(y):
        return jnp.where(y >= 0, y, leak * y)

    trans_b = (((1,), (1,)), ((), ()))      # A @ B^T  (w5t is lane-dense)
    # core5 + BN + tanh + LeakyReLU
    h = jax.lax.dot_general(hf_ref[...], w5t_ref[...], trans_b,
                            preferred_element_type=jnp.float32) + b5_ref[...]
    h = lrelu(jnp.tanh(h))                                    # (N, 32)
    # core6 + BN + tanh + LeakyReLU
    h = jnp.dot(h, w6_ref[...], preferred_element_type=jnp.float32) + b6_ref[...]
    h = lrelu(jnp.tanh(h))                                    # (N, 16)
    # four heads in one matmul: z = [a | b | c | x]
    z = jnp.dot(h, wh_ref[...], preferred_element_type=jnp.float32) + bh_ref[...]
    a, b, c, x = z[:, 0:4], z[:, 4:8], z[:, 8:12], z[:, 12:16]
    # TPL: Px = c + (1 - c) / (1 + exp(-a * (x - b)))
    t = jnp.clip(a * (x - b), -30.0, 30.0)                    # keep exp finite
    o_ref[...] = c + (1.0 - c) / (1.0 + jnp.exp(-t))


# ----------------------------------------------------------------------------
# Wrapper-side parameter preparation (BN folding, layouts, head concat)
# ----------------------------------------------------------------------------
def _fold_bn_conv(w, b, bn):
    """Fold eval-mode BatchNorm1d into a Conv1d weight (C_out, C_in, k) / bias."""
    gamma, beta, mu, var = (t.reshape(-1) for t in bn)
    s = gamma * jax.lax.rsqrt(var + EPS)
    return w * s[:, None, None], ((b.reshape(-1) - mu) * s + beta).reshape(1, -1)


def _fold_bn_linear(w, b, bn):
    """Fold eval-mode BatchNorm1d into a Linear weight (d_in, d_out) / bias."""
    gamma, beta, mu, var = (t.reshape(-1) for t in bn)
    s = gamma * jax.lax.rsqrt(var + EPS)
    return w * s[None, :], ((b.reshape(-1) - mu) * s + beta).reshape(1, -1)


@jax.jit
def forward(p, x):
    n_b, c_in, l_in = x.shape
    k1, s1 = 15, 7
    l1 = (l_in - k1) // s1 + 1                                   # 158
    l4 = l1 - 1                                                  # 157

    # ---- weight prep ---------------------------------------------------------
    w1, b1 = _fold_bn_conv(p["w1"], p["b1"], p["bn1"])
    w1m = jnp.transpose(w1, (2, 1, 0)).reshape(k1 * c_in, w1.shape[0])  # (60, 8)
    w2, b2 = _fold_bn_conv(p["w21"], p["b21"], p["bn21"])
    w2m = jnp.transpose(w2, (2, 1, 0))                                  # (9, 8, 16)
    w3, b3 = _fold_bn_conv(p["w31"], p["b31"], p["bn31"])
    w3m = jnp.transpose(w3, (2, 1, 0))                                  # (9, 16, 32)
    w4, b4 = _fold_bn_conv(p["w4"], p["b4"], p["bn4"])
    w4m = jnp.transpose(w4, (2, 1, 0))                                  # (2, 32, 64)
    c1 = w1m.shape[1]                                                   # 8
    c2 = w2m.shape[2]                                                   # 16
    c4 = w4m.shape[2]                                                   # 64

    w5, b5 = _fold_bn_linear(p["w5"], p["b5"], p["bn5"])                # (10048, 32)
    # Kernel A emits (N, L, C); PyTorch's view(N,-1) flattens (N, C, L).  Permute
    # w5's rows once so the kernel consumes the length-major flatten directly.
    w5 = w5.reshape(c4, l4, -1).transpose(1, 0, 2).reshape(l4 * c4, -1)
    w5t = w5.T                                                          # (32, 10048)
    w6, b6 = _fold_bn_linear(p["w6"], p["b6"], p["bn6"])

    wh = jnp.concatenate([p["wa"], p["wb"], p["wc"], p["wx"]], axis=1)  # (16, 16)
    bh = jnp.concatenate([p["ba"], p["bb"], p["bc"], p["bx"]], axis=1)  # (1, 16)

    # ---- core1 im2col (one tiny stride-7 gather on the raw input) ------------
    x_nlc = jnp.transpose(x, (0, 2, 1))                                 # (N, L, C)
    idx = jnp.arange(l1)[:, None] * s1 + jnp.arange(k1)[None, :]
    patches = x_nlc[:, idx, :].reshape(n_b, l1, k1 * c_in)              # (N, 158, 60)

    # ---- Kernel A: fused conv stack (grid over batch, pipelined) -------------
    h4 = pl.pallas_call(
        functools.partial(_conv_stack_kernel, leak=LEAK),
        out_shape=jax.ShapeDtypeStruct((n_b, l4, c4), jnp.float32),
        grid=(n_b,),
        in_specs=[pl.BlockSpec((None, l1, k1 * c_in), lambda n: (n, 0, 0)),
                  _VMEM, _VMEM, _VMEM, _VMEM, _VMEM, _VMEM, _VMEM, _VMEM],
        out_specs=pl.BlockSpec((None, l4, c4), lambda n: (n, 0, 0)),
        scratch_shapes=[pltpu.VMEM((l1 + 16, c1), jnp.float32),
                        pltpu.VMEM((l1 + 16, c2), jnp.float32)],
        compiler_params=pltpu.CompilerParams(
            dimension_semantics=("parallel",)),
    )(patches, w1m, b1, w2m, b2, w3m, b3, w4m, b4)

    # Row-major (N, L, C) -> (N, L*C) is a free reshape in HBM.
    hf = h4.reshape(n_b, l4 * c4)                                       # (N, 10048)

    # ---- Kernel B: dense layers + heads + TPL ---------------------------------
    return pl.pallas_call(
        functools.partial(_dense_head_kernel, leak=LEAK),
        out_shape=jax.ShapeDtypeStruct((n_b, 4), jnp.float32),
        in_specs=[_VMEM] * 7,
        out_specs=_VMEM,
    )(hf, w5t, b5, w6, b6, wh, bh)


# ----------------------------------------------------------------------------
# Deterministic synthetic parameters (same shapes as the PyTorch module)
# ----------------------------------------------------------------------------
def init_params(key, input_channels):
    keys = iter(jax.random.split(key, 64))

    def conv_w(c_out, c_in, ksz):
        fan = c_in * ksz
        return jax.random.normal(next(keys), (c_out, c_in, ksz), jnp.float32) / jnp.sqrt(fan)

    def lin_w(d_in, d_out):
        return jax.random.normal(next(keys), (d_in, d_out), jnp.float32) / jnp.sqrt(d_in)

    def bias(c):
        return 0.05 * jax.random.normal(next(keys), (1, c), jnp.float32)

    def bn(c):
        gamma = 1.0 + 0.1 * jax.random.normal(next(keys), (1, c), jnp.float32)
        beta = 0.1 * jax.random.normal(next(keys), (1, c), jnp.float32)
        mu = 0.1 * jax.random.normal(next(keys), (1, c), jnp.float32)
        var = 1.0 + 0.1 * jnp.abs(jax.random.normal(next(keys), (1, c), jnp.float32))
        return (gamma, beta, mu, var)

    p = {}
    p["w1"], p["b1"], p["bn1"] = conv_w(8, input_channels, 15), bias(8), bn(8)
    p["w21"], p["b21"], p["bn21"] = conv_w(16, 8, 9), bias(16), bn(16)
    p["w31"], p["b31"], p["bn31"] = conv_w(32, 16, 9), bias(32), bn(32)
    p["w4"], p["b4"], p["bn4"] = conv_w(64, 32, 2), bias(64), bn(64)
    p["w5"], p["b5"], p["bn5"] = lin_w(10048, 32), bias(32), bn(32)
    p["w6"], p["b6"], p["bn6"] = lin_w(32, 16), bias(16), bn(16)
    p["wa"], p["ba"] = lin_w(16, 4), bias(4)
    p["wb"], p["bb"] = lin_w(16, 4), bias(4)
    p["wc"], p["bc"] = lin_w(16, 4), bias(4)
    p["wx"], p["bx"] = lin_w(16, 4), bias(4)
    return p


if __name__ == "__main__":
    # Input length is pinned by Linear(10048, 32): 10048 = 64 * 157, which
    # forces L_out(core1) = 158  =>  L_in = 1114 (stride 7, k = 15).
    N, C_IN, L_IN = 2, 4, 1114

    key = jax.random.PRNGKey(0)
    k_x, k_p = jax.random.split(key)
    x = jax.random.normal(k_x, (N, C_IN, L_IN), jnp.float32)
    params = init_params(k_p, C_IN)

    out = jax.block_until_ready(forward(params, x))
    assert out.shape == (N, 4), out.shape
    assert bool(jnp.all(jnp.isfinite(out)))
    print("KERNEL_OK")
</pallas_src>

<mosaic_0001>
module attributes {stable_mosaic.version = 11 : i64} {
  func.func @_conv_stack_kernel(%arg0: i32, %arg1: memref<1x158x60xf32, #tpu.memory_space<vmem>>, %arg2: memref<60x8xf32, #tpu.memory_space<vmem>>, %arg3: memref<1x8xf32, #tpu.memory_space<vmem>>, %arg4: memref<9x8x16xf32, #tpu.memory_space<vmem>>, %arg5: memref<1x16xf32, #tpu.memory_space<vmem>>, %arg6: memref<9x16x32xf32, #tpu.memory_space<vmem>>, %arg7: memref<1x32xf32, #tpu.memory_space<vmem>>, %arg8: memref<2x32x64xf32, #tpu.memory_space<vmem>>, %arg9: memref<1x64xf32, #tpu.memory_space<vmem>>, %arg10: memref<1x157x64xf32, #tpu.memory_space<vmem>>, %arg11: memref<174x8xf32, #tpu.memory_space<vmem>>, %arg12: memref<174x16xf32, #tpu.memory_space<vmem>>) attributes {dimension_semantics = [#tpu.dimension_semantics<parallel>], iteration_bounds = array<i64: 2>, scalar_prefetch = 0 : i64, scratch_operands = 2 : i64, tpu.core_type = #tpu.core_type<tc>, window_params = [{transform_indices = @transform_0, window_bounds = array<i64: 1, 158, 60>}, {pipeline_mode = #tpu.pipeline_mode<synchronous>, transform_indices = @transform_1, window_bounds = array<i64: 60, 8>}, {pipeline_mode = #tpu.pipeline_mode<synchronous>, transform_indices = @transform_2, window_bounds = array<i64: 1, 8>}, {pipeline_mode = #tpu.pipeline_mode<synchronous>, transform_indices = @transform_3, window_bounds = array<i64: 9, 8, 16>}, {pipeline_mode = #tpu.pipeline_mode<synchronous>, transform_indices = @transform_4, window_bounds = array<i64: 1, 16>}, {pipeline_mode = #tpu.pipeline_mode<synchronous>, transform_indices = @transform_5, window_bounds = array<i64: 9, 16, 32>}, {pipeline_mode = #tpu.pipeline_mode<synchronous>, transform_indices = @transform_6, window_bounds = array<i64: 1, 32>}, {pipeline_mode = #tpu.pipeline_mode<synchronous>, transform_indices = @transform_7, window_bounds = array<i64: 2, 32, 64>}, {pipeline_mode = #tpu.pipeline_mode<synchronous>, transform_indices = @transform_8, window_bounds = array<i64: 1, 64>}, {transform_indices = @transform_9, window_bounds = array<i64: 1, 157, 64>}]} {
    %cst = arith.constant 0.000000e+00 : f32
    %0 = vector.broadcast %cst : f32 to vector<174x8xf32>
    %c0 = arith.constant 0 : index
    %c0_0 = arith.constant 0 : index
    %1 = vector.load %arg11[%c0, %c0_0] : memref<174x8xf32, #tpu.memory_space<vmem>>, vector<174x8xf32>
    tpu.vector_store %arg11[%c0, %c0_0], %0 {strides = array<i32>} : memref<174x8xf32, #tpu.memory_space<vmem>>, vector<174x8xf32>,
    %cst_1 = arith.constant 0.000000e+00 : f32
    %2 = vector.broadcast %cst_1 : f32 to vector<174x16xf32>
    %c0_2 = arith.constant 0 : index
    %c0_3 = arith.constant 0 : index
    %3 = vector.load %arg12[%c0_2, %c0_3] : memref<174x16xf32, #tpu.memory_space<vmem>>, vector<174x16xf32>
    tpu.vector_store %arg12[%c0_2, %c0_3], %2 {strides = array<i32>} : memref<174x16xf32, #tpu.memory_space<vmem>>, vector<174x16xf32>,
    %c0_4 = arith.constant 0 : index
    %c0_5 = arith.constant 0 : index
    %c0_6 = arith.constant 0 : index
    %4 = vector.load %arg1[%c0_4, %c0_5, %c0_6] : memref<1x158x60xf32, #tpu.memory_space<vmem>>, vector<1x158x60xf32>
    %5 = vector.shape_cast %4 : vector<1x158x60xf32> to vector<158x60xf32>
    %c0_7 = arith.constant 0 : index
    %c0_8 = arith.constant 0 : index
    %6 = vector.load %arg2[%c0_7, %c0_8] : memref<60x8xf32, #tpu.memory_space<vmem>>, vector<60x8xf32>
    %cst_9 = arith.constant dense<0.000000e+00> : vector<158x8xf32>
    %7 = tpu.matmul %5, %6, %cst_9 {dimension_numbers = #tpu.dot_dimension_numbers<[1], [0], [0], [1], [0, 0, 1, 1], [], []>} : vector<158x60xf32>, vector<60x8xf32>, vector<158x8xf32> -> vector<158x8xf32>
    %c0_10 = arith.constant 0 : index
    %c0_11 = arith.constant 0 : index
    %8 = vector.load %arg3[%c0_10, %c0_11] : memref<1x8xf32, #tpu.memory_space<vmem>>, vector<1x8xf32>
    %9 = vector.broadcast %8 : vector<1x8xf32> to vector<158x8xf32>
    %10 = arith.addf %7, %9 : vector<158x8xf32>
    %cst_12 = arith.constant 0.000000e+00 : f32
    %11 = vector.broadcast %cst_12 : f32 to vector<158x8xf32>
    %12 = arith.cmpf oge, %10, %11 : vector<158x8xf32>
    %cst_13 = arith.constant 0.00999999977 : f32
    %13 = vector.broadcast %cst_13 : f32 to vector<158x8xf32>
    %14 = arith.mulf %13, %10 : vector<158x8xf32>
    %15 = arith.select %12, %10, %14 : vector<158x8xi1>, vector<158x8xf32>
    %c8 = arith.constant 8 : index
    %c0_14 = arith.constant 0 : index
    %16 = vector.load %arg11[%c8, %c0_14] : memref<174x8xf32, #tpu.memory_space<vmem>>, vector<158x8xf32>
    tpu.vector_store %arg11[%c8, %c0_14], %15 {strides = array<i32>} : memref<174x8xf32, #tpu.memory_space<vmem>>, vector<158x8xf32>,
    %c0_15 = arith.constant 0 : index
    %c0_16 = arith.constant 0 : index
    %17 = vector.load %arg5[%c0_15, %c0_16] : memref<1x16xf32, #tpu.memory_space<vmem>>, vector<1x16xf32>
    %c4 = arith.constant 4 : index
    %c0_17 = arith.constant 0 : index
    %18 = vector.load %arg11[%c4, %c0_17] : memref<174x8xf32, #tpu.memory_space<vmem>>, vector<158x8xf32>
    %c0_18 = arith.constant 0 : index
    %c0_19 = arith.constant 0 : index
    %c0_20 = arith.constant 0 : index
    %19 = vector.load %arg4[%c0_18, %c0_19, %c0_20] : memref<9x8x16xf32, #tpu.memory_space<vmem>>, vector<1x8x16xf32>
    %20 = vector.shape_cast %19 : vector<1x8x16xf32> to vector<8x16xf32>
    %cst_21 = arith.constant dense<0.000000e+00> : vector<158x16xf32>
    %21 = tpu.matmul %18, %20, %cst_21 {dimension_numbers = #tpu.dot_dimension_numbers<[1], [0], [0], [1], [0, 0, 1, 1], [], []>} : vector<158x8xf32>, vector<8x16xf32>, vector<158x16xf32> -> vector<158x16xf32>
    %22 = vector.broadcast %17 : vector<1x16xf32> to vector<158x16xf32>
    %23 = arith.addf %22, %21 : vector<158x16xf32>
    %c5 = arith.constant 5 : index
    %c0_22 = arith.constant 0 : index
    %24 = vector.load %arg11[%c5, %c0_22] : memref<174x8xf32, #tpu.memory_space<vmem>>, vector<158x8xf32>
    %c1 = arith.constant 1 : index
    %c0_23 = arith.constant 0 : index
    %c0_24 = arith.constant 0 : index
    %25 = vector.load %arg4[%c1, %c0_23, %c0_24] : memref<9x8x16xf32, #tpu.memory_space<vmem>>, vector<1x8x16xf32>
    %26 = vector.shape_cast %25 : vector<1x8x16xf32> to vector<8x16xf32>
    %cst_25 = arith.constant dense<0.000000e+00> : vector<158x16xf32>
    %27 = tpu.matmul %24, %26, %cst_25 {dimension_numbers = #tpu.dot_dimension_numbers<[1], [0], [0], [1], [0, 0, 1, 1], [], []>} : vector<158x8xf32>, vector<8x16xf32>, vector<158x16xf32> -> vector<158x16xf32>
    %28 = arith.addf %23, %27 : vector<158x16xf32>
    %c6 = arith.constant 6 : index
    %c0_26 = arith.constant 0 : index
    %29 = vector.load %arg11[%c6, %c0_26] : memref<174x8xf32, #tpu.memory_space<vmem>>, vector<158x8xf32>
    %c2 = arith.constant 2 : index
    %c0_27 = arith.constant 0 : index
    %c0_28 = arith.constant 0 : index
    %30 = vector.load %arg4[%c2, %c0_27, %c0_28] : memref<9x8x16xf32, #tpu.memory_space<vmem>>, vector<1x8x16xf32>
    %31 = vector.shape_cast %30 : vector<1x8x16xf32> to vector<8x16xf32>
    %cst_29 = arith.constant dense<0.000000e+00> : vector<158x16xf32>
    %32 = tpu.matmul %29, %31, %cst_29 {dimension_numbers = #tpu.dot_dimension_numbers<[1], [0], [0], [1], [0, 0, 1, 1], [], []>} : vector<158x8xf32>, vector<8x16xf32>, vector<158x16xf32> -> vector<158x16xf32>
    %33 = arith.addf %28, %32 : vector<158x16xf32>
    %c7 = arith.constant 7 : index
    %c0_30 = arith.constant 0 : index
    %34 = vector.load %arg11[%c7, %c0_30] : memref<174x8xf32, #tpu.memory_space<vmem>>, vector<158x8xf32>
    %c3 = arith.constant 3 : index
    %c0_31 = arith.constant 0 : index
    %c0_32 = arith.constant 0 : index
    %35 = vector.load %arg4[%c3, %c0_31, %c0_32] : memref<9x8x16xf32, #tpu.memory_space<vmem>>, vector<1x8x16xf32>
    %36 = vector.shape_cast %35 : vector<1x8x16xf32> to vector<8x16xf32>
    %cst_33 = arith.constant dense<0.000000e+00> : vector<158x16xf32>
    %37 = tpu.matmul %34, %36, %cst_33 {dimension_numbers = #tpu.dot_dimension_numbers<[1], [0], [0], [1], [0, 0, 1, 1], [], []>} : vector<158x8xf32>, vector<8x16xf32>, vector<158x16xf32> -> vector<158x16xf32>
    %38 = arith.addf %33, %37 : vector<158x16xf32>
    %c8_34 = arith.constant 8 : index
    %c0_35 = arith.constant 0 : index
    %39 = vector.load %arg11[%c8_34, %c0_35] : memref<174x8xf32, #tpu.memory_space<vmem>>, vector<158x8xf32>
    %c4_36 = arith.constant 4 : index
    %c0_37 = arith.constant 0 : index
    %c0_38 = arith.constant 0 : index
    %40 = vector.load %arg4[%c4_36, %c0_37, %c0_38] : memref<9x8x16xf32, #tpu.memory_space<vmem>>, vector<1x8x16xf32>
    %41 = vector.shape_cast %40 : vector<1x8x16xf32> to vector<8x16xf32>
    %cst_39 = arith.constant dense<0.000000e+00> : vector<158x16xf32>
    %42 = tpu.matmul %39, %41, %cst_39 {dimension_numbers = #tpu.dot_dimension_numbers<[1], [0], [0], [1], [0, 0, 1, 1], [], []>} : vector<158x8xf32>, vector<8x16xf32>, vector<158x16xf32> -> vector<158x16xf32>
    %43 = arith.addf %38, %42 : vector<158x16xf32>
    %c9 = arith.constant 9 : index
    %c0_40 = arith.constant 0 : index
    %44 = vector.load %arg11[%c9, %c0_40] : memref<174x8xf32, #tpu.memory_space<vmem>>, vector<158x8xf32>
    %c5_41 = arith.constant 5 : index
    %c0_42 = arith.constant 0 : index
    %c0_43 = arith.constant 0 : index
    %45 = vector.load %arg4[%c5_41, %c0_42, %c0_43] : memref<9x8x16xf32, #tpu.memory_space<vmem>>, vector<1x8x16xf32>
    %46 = vector.shape_cast %45 : vector<1x8x16xf32> to vector<8x16xf32>
    %cst_44 = arith.constant dense<0.000000e+00> : vector<158x16xf32>
    %47 = tpu.matmul %44, %46, %cst_44 {dimension_numbers = #tpu.dot_dimension_numbers<[1], [0], [0], [1], [0, 0, 1, 1], [], []>} : vector<158x8xf32>, vector<8x16xf32>, vector<158x16xf32> -> vector<158x16xf32>
    %48 = arith.addf %43, %47 : vector<158x16xf32>
    %c10 = arith.constant 10 : index
    %c0_45 = arith.constant 0 : index
    %49 = vector.load %arg11[%c10, %c0_45] : memref<174x8xf32, #tpu.memory_space<vmem>>, vector<158x8xf32>
    %c6_46 = arith.constant 6 : index
    %c0_47 = arith.constant 0 : index
    %c0_48 = arith.constant 0 : index
    %50 = vector.load %arg4[%c6_46, %c0_47, %c0_48] : memref<9x8x16xf32, #tpu.memory_space<vmem>>, vector<1x8x16xf32>
    %51 = vector.shape_cast %50 : vector<1x8x16xf32> to vector<8x16xf32>
    %cst_49 = arith.constant dense<0.000000e+00> : vector<158x16xf32>
    %52 = tpu.matmul %49, %51, %cst_49 {dimension_numbers = #tpu.dot_dimension_numbers<[1], [0], [0], [1], [0, 0, 1, 1], [], []>} : vector<158x8xf32>, vector<8x16xf32>, vector<158x16xf32> -> vector<158x16xf32>
    %53 = arith.addf %48, %52 : vector<158x16xf32>
    %c11 = arith.constant 11 : index
    %c0_50 = arith.constant 0 : index
    %54 = vector.load %arg11[%c11, %c0_50] : memref<174x8xf32, #tpu.memory_space<vmem>>, vector<158x8xf32>
    %c7_51 = arith.constant 7 : index
    %c0_52 = arith.constant 0 : index
    %c0_53 = arith.constant 0 : index
    %55 = vector.load %arg4[%c7_51, %c0_52, %c0_53] : memref<9x8x16xf32, #tpu.memory_space<vmem>>, vector<1x8x16xf32>
    %56 = vector.shape_cast %55 : vector<1x8x16xf32> to vector<8x16xf32>
    %cst_54 = arith.constant dense<0.000000e+00> : vector<158x16xf32>
    %57 = tpu.matmul %54, %56, %cst_54 {dimension_numbers = #tpu.dot_dimension_numbers<[1], [0], [0], [1], [0, 0, 1, 1], [], []>} : vector<158x8xf32>, vector<8x16xf32>, vector<158x16xf32> -> vector<158x16xf32>
    %58 = arith.addf %53, %57 : vector<158x16xf32>
    %c12 = arith.constant 12 : index
    %c0_55 = arith.constant 0 : index
    %59 = vector.load %arg11[%c12, %c0_55] : memref<174x8xf32, #tpu.memory_space<vmem>>, vector<158x8xf32>
    %c8_56 = arith.constant 8 : index
    %c0_57 = arith.constant 0 : index
    %c0_58 = arith.constant 0 : index
    %60 = vector.load %arg4[%c8_56, %c0_57, %c0_58] : memref<9x8x16xf32, #tpu.memory_space<vmem>>, vector<1x8x16xf32>
    %61 = vector.shape_cast %60 : vector<1x8x16xf32> to vector<8x16xf32>
    %cst_59 = arith.constant dense<0.000000e+00> : vector<158x16xf32>
    %62 = tpu.matmul %59, %61, %cst_59 {dimension_numbers = #tpu.dot_dimension_numbers<[1], [0], [0], [1], [0, 0, 1, 1], [], []>} : vector<158x8xf32>, vector<8x16xf32>, vector<158x16xf32> -> vector<158x16xf32>
    %63 = arith.addf %58, %62 : vector<158x16xf32>
    %64 = math.tanh %63 : vector<158x16xf32>
    %cst_60 = arith.constant 0.000000e+00 : f32
    %65 = vector.broadcast %cst_60 : f32 to vector<158x16xf32>
    %66 = arith.cmpf oge, %64, %65 : vector<158x16xf32>
    %cst_61 = arith.constant 0.00999999977 : f32
    %67 = vector.broadcast %cst_61 : f32 to vector<158x16xf32>
    %68 = arith.mulf %67, %64 : vector<158x16xf32>
    %69 = arith.select %66, %64, %68 : vector<158x16xi1>, vector<158x16xf32>
    %c8_62 = arith.constant 8 : index
    %c0_63 = arith.constant 0 : index
    %70 = vector.load %arg12[%c8_62, %c0_63] : memref<174x16xf32, #tpu.memory_space<vmem>>, vector<158x16xf32>
    tpu.vector_store %arg12[%c8_62, %c0_63], %69 {strides = array<i32>} : memref<174x16xf32, #tpu.memory_space<vmem>>, vector<158x16xf32>,
    %c0_64 = arith.constant 0 : index
    %c0_65 = arith.constant 0 : index
    %71 = vector.load %arg7[%c0_64, %c0_65] : memref<1x32xf32, #tpu.memory_space<vmem>>, vector<1x32xf32>
    %c4_66 = arith.constant 4 : index
    %c0_67 = arith.constant 0 : index
    %72 = vector.load %arg12[%c4_66, %c0_67] : memref<174x16xf32, #tpu.memory_space<vmem>>, vector<158x16xf32>
    %c0_68 = arith.constant 0 : index
    %c0_69 = arith.constant 0 : index
    %c0_70 = arith.constant 0 : index
    %73 = vector.load %arg6[%c0_68, %c0_69, %c0_70] : memref<9x16x32xf32, #tpu.memory_space<vmem>>, vector<1x16x32xf32>
    %74 = vector.shape_cast %73 : vector<1x16x32xf32> to vector<16x32xf32>
    %cst_71 = arith.constant dense<0.000000e+00> : vector<158x32xf32>
    %75 = tpu.matmul %72, %74, %cst_71 {dimension_numbers = #tpu.dot_dimension_numbers<[1], [0], [0], [1], [0, 0, 1, 1], [], []>} : vector<158x16xf32>, vector<16x32xf32>, vector<158x32xf32> -> vector<158x32xf32>
    %76 = vector.broadcast %71 : vector<1x32xf32> to vector<158x32xf32>
    %77 = arith.addf %76, %75 : vector<158x32xf32>
    %c5_72 = arith.constant 5 : index
    %c0_73 = arith.constant 0 : index
    %78 = vector.load %arg12[%c5_72, %c0_73] : memref<174x16xf32, #tpu.memory_space<vmem>>, vector<158x16xf32>
    %c1_74 = arith.constant 1 : index
    %c0_75 = arith.constant 0 : index
    %c0_76 = arith.constant 0 : index
    %79 = vector.load %arg6[%c1_74, %c0_75, %c0_76] : memref<9x16x32xf32, #tpu.memory_space<vmem>>, vector<1x16x32xf32>
    %80 = vector.shape_cast %79 : vector<1x16x32xf32> to vector<16x32xf32>
    %cst_77 = arith.constant dense<0.000000e+00> : vector<158x32xf32>
    %81 = tpu.matmul %78, %80, %cst_77 {dimension_numbers = #tpu.dot_dimension_numbers<[1], [0], [0], [1], [0, 0, 1, 1], [], []>} : vector<158x16xf32>, vector<16x32xf32>, vector<158x32xf32> -> vector<158x32xf32>
    %82 = arith.addf %77, %81 : vector<158x32xf32>
    %c6_78 = arith.constant 6 : index
    %c0_79 = arith.constant 0 : index
    %83 = vector.load %arg12[%c6_78, %c0_79] : memref<174x16xf32, #tpu.memory_space<vmem>>, vector<158x16xf32>
    %c2_80 = arith.constant 2 : index
    %c0_81 = arith.constant 0 : index
    %c0_82 = arith.constant 0 : index
    %84 = vector.load %arg6[%c2_80, %c0_81, %c0_82] : memref<9x16x32xf32, #tpu.memory_space<vmem>>, vector<1x16x32xf32>
    %85 = vector.shape_cast %84 : vector<1x16x32xf32> to vector<16x32xf32>
    %cst_83 = arith.constant dense<0.000000e+00> : vector<158x32xf32>
    %86 = tpu.matmul %83, %85, %cst_83 {dimension_numbers = #tpu.dot_dimension_numbers<[1], [0], [0], [1], [0, 0, 1, 1], [], []>} : vector<158x16xf32>, vector<16x32xf32>, vector<158x32xf32> -> vector<158x32xf32>
    %87 = arith.addf %82, %86 : vector<158x32xf32>
    %c7_84 = arith.constant 7 : index
    %c0_85 = arith.constant 0 : index
    %88 = vector.load %arg12[%c7_84, %c0_85] : memref<174x16xf32, #tpu.memory_space<vmem>>, vector<158x16xf32>
    %c3_86 = arith.constant 3 : index
    %c0_87 = arith.constant 0 : index
    %c0_88 = arith.constant 0 : index
    %89 = vector.load %arg6[%c3_86, %c0_87, %c0_88] : memref<9x16x32xf32, #tpu.memory_space<vmem>>, vector<1x16x32xf32>
    %90 = vector.shape_cast %89 : vector<1x16x32xf32> to vector<16x32xf32>
    %cst_89 = arith.constant dense<0.000000e+00> : vector<158x32xf32>
    %91 = tpu.matmul %88, %90, %cst_89 {dimension_numbers = #tpu.dot_dimension_numbers<[1], [0], [0], [1], [0, 0, 1, 1], [], []>} : vector<158x16xf32>, vector<16x32xf32>, vector<158x32xf32> -> vector<158x32xf32>
    %92 = arith.addf %87, %91 : vector<158x32xf32>
    %c8_90 = arith.constant 8 : index
    %c0_91 = arith.constant 0 : index
    %93 = vector.load %arg12[%c8_90, %c0_91] : memref<174x16xf32, #tpu.memory_space<vmem>>, vector<158x16xf32>
    %c4_92 = arith.constant 4 : index
    %c0_93 = arith.constant 0 : index
    %c0_94 = arith.constant 0 : index
    %94 = vector.load %arg6[%c4_92, %c0_93, %c0_94] : memref<9x16x32xf32, #tpu.memory_space<vmem>>, vector<1x16x32xf32>
    %95 = vector.shape_cast %94 : vector<1x16x32xf32> to vector<16x32xf32>
    %cst_95 = arith.constant dense<0.000000e+00> : vector<158x32xf32>
    %96 = tpu.matmul %93, %95, %cst_95 {dimension_numbers = #tpu.dot_dimension_numbers<[1], [0], [0], [1], [0, 0, 1, 1], [], []>} : vector<158x16xf32>, vector<16x32xf32>, vector<158x32xf32> -> vector<158x32xf32>
    %97 = arith.addf %92, %96 : vector<158x32xf32>
    %c9_96 = arith.constant 9 : index
    %c0_97 = arith.constant 0 : index
    %98 = vector.load %arg12[%c9_96, %c0_97] : memref<174x16xf32, #tpu.memory_space<vmem>>, vector<158x16xf32>
    %c5_98 = arith.constant 5 : index
    %c0_99 = arith.constant 0 : index
    %c0_100 = arith.constant 0 : index
    %99 = vector.load %arg6[%c5_98, %c0_99, %c0_100] : memref<9x16x32xf32, #tpu.memory_space<vmem>>, vector<1x16x32xf32>
    %100 = vector.shape_cast %99 : vector<1x16x32xf32> to vector<16x32xf32>
    %cst_101 = arith.constant dense<0.000000e+00> : vector<158x32xf32>
    %101 = tpu.matmul %98, %100, %cst_101 {dimension_numbers = #tpu.dot_dimension_numbers<[1], [0], [0], [1], [0, 0, 1, 1], [], []>} : vector<158x16xf32>, vector<16x32xf32>, vector<158x32xf32> -> vector<158x32xf32>
    %102 = arith.addf %97, %101 : vector<158x32xf32>
    %c10_102 = arith.constant 10 : index
    %c0_103 = arith.constant 0 : index
    %103 = vector.load %arg12[%c10_102, %c0_103] : memref<174x16xf32, #tpu.memory_space<vmem>>, vector<158x16xf32>
    %c6_104 = arith.constant 6 : index
    %c0_105 = arith.constant 0 : index
    %c0_106 = arith.constant 0 : index
    %104 = vector.load %arg6[%c6_104, %c0_105, %c0_106] : memref<9x16x32xf32, #tpu.memory_space<vmem>>, vector<1x16x32xf32>
    %105 = vector.shape_cast %104 : vector<1x16x32xf32> to vector<16x32xf32>
    %cst_107 = arith.constant dense<0.000000e+00> : vector<158x32xf32>
    %106 = tpu.matmul %103, %105, %cst_107 {dimension_numbers = #tpu.dot_dimension_numbers<[1], [0], [0], [1], [0, 0, 1, 1], [], []>} : vector<158x16xf32>, vector<16x32xf32>, vector<158x32xf32> -> vector<158x32xf32>
    %107 = arith.addf %102, %106 : vector<158x32xf32>
    %c11_108 = arith.constant 11 : index
    %c0_109 = arith.constant 0 : index
    %108 = vector.load %arg12[%c11_108, %c0_109] : memref<174x16xf32, #tpu.memory_space<vmem>>, vector<158x16xf32>
    %c7_110 = arith.constant 7 : index
    %c0_111 = arith.constant 0 : index
    %c0_112 = arith.constant 0 : index
    %109 = vector.load %arg6[%c7_110, %c0_111, %c0_112] : memref<9x16x32xf32, #tpu.memory_space<vmem>>, vector<1x16x32xf32>
    %110 = vector.shape_cast %109 : vector<1x16x32xf32> to vector<16x32xf32>
    %cst_113 = arith.constant dense<0.000000e+00> : vector<158x32xf32>
    %111 = tpu.matmul %108, %110, %cst_113 {dimension_numbers = #tpu.dot_dimension_numbers<[1], [0], [0], [1], [0, 0, 1, 1], [], []>} : vector<158x16xf32>, vector<16x32xf32>, vector<158x32xf32> -> vector<158x32xf32>
    %112 = arith.addf %107, %111 : vector<158x32xf32>
    %c12_114 = arith.constant 12 : index
    %c0_115 = arith.constant 0 : index
    %113 = vector.load %arg12[%c12_114, %c0_115] : memref<174x16xf32, #tpu.memory_space<vmem>>, vector<158x16xf32>
    %c8_116 = arith.constant 8 : index
    %c0_117 = arith.constant 0 : index
    %c0_118 = arith.constant 0 : index
    %114 = vector.load %arg6[%c8_116, %c0_117, %c0_118] : memref<9x16x32xf32, #tpu.memory_space<vmem>>, vector<1x16x32xf32>
    %115 = vector.shape_cast %114 : vector<1x16x32xf32> to vector<16x32xf32>
    %cst_119 = arith.constant dense<0.000000e+00> : vector<158x32xf32>
    %116 = tpu.matmul %113, %115, %cst_119 {dimension_numbers = #tpu.dot_dimension_numbers<[1], [0], [0], [1], [0, 0, 1, 1], [], []>} : vector<158x16xf32>, vector<16x32xf32>, vector<158x32xf32> -> vector<158x32xf32>
    %117 = arith.addf %112, %116 : vector<158x32xf32>
    %118 = math.tanh %117 : vector<158x32xf32>
    %cst_120 = arith.constant 0.000000e+00 : f32
    %119 = vector.broadcast %cst_120 : f32 to vector<158x32xf32>
    %120 = arith.cmpf oge, %118, %119 : vector<158x32xf32>
    %cst_121 = arith.constant 0.00999999977 : f32
    %121 = vector.broadcast %cst_121 : f32 to vector<158x32xf32>
    %122 = arith.mulf %121, %118 : vector<158x32xf32>
    %123 = arith.select %120, %118, %122 : vector<158x32xi1>, vector<158x32xf32>
    %124 = vector.extract_strided_slice %123 {offsets = [0, 0], sizes = [157, 32], strides = [1, 1]} : vector<158x32xf32> to vector<157x32xf32>
    %c0_122 = arith.constant 0 : index
    %c0_123 = arith.constant 0 : index
    %c0_124 = arith.constant 0 : index
    %125 = vector.load %arg8[%c0_122, %c0_123, %c0_124] : memref<2x32x64xf32, #tpu.memory_space<vmem>>, vector<1x32x64xf32>
    %126 = vector.shape_cast %125 : vector<1x32x64xf32> to vector<32x64xf32>
    %cst_125 = arith.constant dense<0.000000e+00> : vector<157x64xf32>
    %127 = tpu.matmul %124, %126, %cst_125 {dimension_numbers = #tpu.dot_dimension_numbers<[1], [0], [0], [1], [0, 0, 1, 1], [], []>} : vector<157x32xf32>, vector<32x64xf32>, vector<157x64xf32> -> vector<157x64xf32>
    %128 = vector.extract_strided_slice %123 {offsets = [1, 0], sizes = [157, 32], strides = [1, 1]} : vector<158x32xf32> to vector<157x32xf32>
    %c1_126 = arith.constant 1 : index
    %c0_127 = arith.constant 0 : index
    %c0_128 = arith.constant 0 : index
    %129 = vector.load %arg8[%c1_126, %c0_127, %c0_128] : memref<2x32x64xf32, #tpu.memory_space<vmem>>, vector<1x32x64xf32>
    %130 = vector.shape_cast %129 : vector<1x32x64xf32> to vector<32x64xf32>
    %cst_129 = arith.constant dense<0.000000e+00> : vector<157x64xf32>
    %131 = tpu.matmul %128, %130, %cst_129 {dimension_numbers = #tpu.dot_dimension_numbers<[1], [0], [0], [1], [0, 0, 1, 1], [], []>} : vector<157x32xf32>, vector<32x64xf32>, vector<157x64xf32> -> vector<157x64xf32>
    %132 = arith.addf %127, %131 : vector<157x64xf32>
    %c0_130 = arith.constant 0 : index
    %c0_131 = arith.constant 0 : index
    %133 = vector.load %arg9[%c0_130, %c0_131] : memref<1x64xf32, #tpu.memory_space<vmem>>, vector<1x64xf32>
    %134 = vector.broadcast %133 : vector<1x64xf32> to vector<157x64xf32>
    %135 = arith.addf %132, %134 : vector<157x64xf32>
    %c0_132 = arith.constant 0 : index
    %c0_133 = arith.constant 0 : index
    %c0_134 = arith.constant 0 : index
    %136 = vector.load %arg10[%c0_132, %c0_133, %c0_134] : memref<1x157x64xf32, #tpu.memory_space<vmem>>, vector<1x157x64xf32>
    %137 = vector.shape_cast %136 : vector<1x157x64xf32> to vector<157x64xf32>
    %138 = vector.shape_cast %135 : vector<157x64xf32> to vector<1x157x64xf32>
    tpu.vector_store %arg10[%c0_132, %c0_133, %c0_134], %138 {strides = array<i32>} : memref<1x157x64xf32, #tpu.memory_space<vmem>>, vector<1x157x64xf32>,
    return
  }
  func.func @transform_0(%arg0: i32) -> (i32, i32, i32) {
    %c0_i32 = arith.constant 0 : i32
    %c0_i32_0 = arith.constant 0 : i32
    %c0_i32_1 = arith.constant 0 : i32
    return %arg0, %c0_i32, %c0_i32_0 : i32, i32, i32
  }
  func.func @transform_1(%arg0: i32) -> (i32, i32) {
    %c0_i32 = arith.constant 0 : i32
    %c0_i32_0 = arith.constant 0 : i32
    %c0_i32_1 = arith.constant 0 : i32
    return %c0_i32, %c0_i32_0 : i32, i32
  }
  func.func @transform_2(%arg0: i32) -> (i32, i32) {
    %c0_i32 = arith.constant 0 : i32
    %c0_i32_0 = arith.constant 0 : i32
    %c0_i32_1 = arith.constant 0 : i32
    return %c0_i32, %c0_i32_0 : i32, i32
  }
  func.func @transform_3(%arg0: i32) -> (i32, i32, i32) {
    %c0_i32 = arith.constant 0 : i32
    %c0_i32_0 = arith.constant 0 : i32
    %c0_i32_1 = arith.constant 0 : i32
    %c0_i32_2 = arith.constant 0 : i32
    return %c0_i32, %c0_i32_0, %c0_i32_1 : i32, i32, i32
  }
  func.func @transform_4(%arg0: i32) -> (i32, i32) {
    %c0_i32 = arith.constant 0 : i32
    %c0_i32_0 = arith.constant 0 : i32
    %c0_i32_1 = arith.constant 0 : i32
    return %c0_i32, %c0_i32_0 : i32, i32
  }
  func.func @transform_5(%arg0: i32) -> (i32, i32, i32) {
    %c0_i32 = arith.constant 0 : i32
    %c0_i32_0 = arith.constant 0 : i32
    %c0_i32_1 = arith.constant 0 : i32
    %c0_i32_2 = arith.constant 0 : i32
    return %c0_i32, %c0_i32_0, %c0_i32_1 : i32, i32, i32
  }
  func.func @transform_6(%arg0: i32) -> (i32, i32) {
    %c0_i32 = arith.constant 0 : i32
    %c0_i32_0 = arith.constant 0 : i32
    %c0_i32_1 = arith.constant 0 : i32
    return %c0_i32, %c0_i32_0 : i32, i32
  }
  func.func @transform_7(%arg0: i32) -> (i32, i32, i32) {
    %c0_i32 = arith.constant 0 : i32
    %c0_i32_0 = arith.constant 0 : i32
    %c0_i32_1 = arith.constant 0 : i32
    %c0_i32_2 = arith.constant 0 : i32
    return %c0_i32, %c0_i32_0, %c0_i32_1 : i32, i32, i32
  }
  func.func @transform_8(%arg0: i32) -> (i32, i32) {
    %c0_i32 = arith.constant 0 : i32
    %c0_i32_0 = arith.constant 0 : i32
    %c0_i32_1 = arith.constant 0 : i32
    return %c0_i32, %c0_i32_0 : i32, i32
  }
  func.func @transform_9(%arg0: i32) -> (i32, i32, i32) {
    %c0_i32 = arith.constant 0 : i32
    %c0_i32_0 = arith.constant 0 : i32
    %c0_i32_1 = arith.constant 0 : i32
    return %arg0, %c0_i32, %c0_i32_0 : i32, i32, i32
  }
}

module attributes {stable_mosaic.version = 11 : i64} {
  func.func @_dense_head_kernel(%arg0: memref<2x10048xf32, #tpu.memory_space<vmem>>, %arg1: memref<32x10048xf32, #tpu.memory_space<vmem>>, %arg2: memref<1x32xf32, #tpu.memory_space<vmem>>, %arg3: memref<32x16xf32, #tpu.memory_space<vmem>>, %arg4: memref<1x16xf32, #tpu.memory_space<vmem>>, %arg5: memref<16x16xf32, #tpu.memory_space<vmem>>, %arg6: memref<1x16xf32, #tpu.memory_space<vmem>>, %arg7: memref<2x4xf32, #tpu.memory_space<vmem>>) attributes {dimension_semantics = [], scalar_prefetch = 0 : i64, scratch_operands = 0 : i64, tpu.core_type = #tpu.core_type<tc>} {
    %c0 = arith.constant 0 : index
    %c0_0 = arith.constant 0 : index
    %0 = vector.load %arg0[%c0, %c0_0] : memref<2x10048xf32, #tpu.memory_space<vmem>>, vector<2x10048xf32>
    %c0_1 = arith.constant 0 : index
    %c0_2 = arith.constant 0 : index
    %1 = vector.load %arg1[%c0_1, %c0_2] : memref<32x10048xf32, #tpu.memory_space<vmem>>, vector<32x10048xf32>
    %cst = arith.constant dense<0.000000e+00> : vector<2x32xf32>
    %2 = tpu.matmul %0, %1, %cst {dimension_numbers = #tpu.dot_dimension_numbers<[1], [1], [0], [0], [0, 0, 1, 0], [], []>} : vector<2x10048xf32>, vector<32x10048xf32>, vector<2x32xf32> -> vector<2x32xf32>
    %c0_3 = arith.constant 0 : index
    %c0_4 = arith.constant 0 : index
    %3 = vector.load %arg2[%c0_3, %c0_4] : memref<1x32xf32, #tpu.memory_space<vmem>>, vector<1x32xf32>
    %4 = vector.broadcast %3 : vector<1x32xf32> to vector<2x32xf32>
    %5 = arith.addf %2, %4 : vector<2x32xf32>
    %6 = math.tanh %5 : vector<2x32xf32>
    %cst_5 = arith.constant 0.000000e+00 : f32
    %7 = vector.broadcast %cst_5 : f32 to vector<2x32xf32>
    %8 = arith.cmpf oge, %6, %7 : vector<2x32xf32>
    %cst_6 = arith.constant 0.00999999977 : f32
    %9 = vector.broadcast %cst_6 : f32 to vector<2x32xf32>
    %10 = arith.mulf %9, %6 : vector<2x32xf32>
    %11 = arith.select %8, %6, %10 : vector<2x32xi1>, vector<2x32xf32>
    %c0_7 = arith.constant 0 : index
    %c0_8 = arith.constant 0 : index
    %12 = vector.load %arg3[%c0_7, %c0_8] : memref<32x16xf32, #tpu.memory_space<vmem>>, vector<32x16xf32>
    %cst_9 = arith.constant dense<0.000000e+00> : vector<2x16xf32>
    %13 = tpu.matmul %11, %12, %cst_9 {dimension_numbers = #tpu.dot_dimension_numbers<[1], [0], [0], [1], [0, 0, 1, 1], [], []>} : vector<2x32xf32>, vector<32x16xf32>, vector<2x16xf32> -> vector<2x16xf32>
    %c0_10 = arith.constant 0 : index
    %c0_11 = arith.constant 0 : index
    %14 = vector.load %arg4[%c0_10, %c0_11] : memref<1x16xf32, #tpu.memory_space<vmem>>, vector<1x16xf32>
    %15 = vector.broadcast %14 : vector<1x16xf32> to vector<2x16xf32>
    %16 = arith.addf %13, %15 : vector<2x16xf32>
    %17 = math.tanh %16 : vector<2x16xf32>
    %cst_12 = arith.constant 0.000000e+00 : f32
    %18 = vector.broadcast %cst_12 : f32 to vector<2x16xf32>
    %19 = arith.cmpf oge, %17, %18 : vector<2x16xf32>
    %cst_13 = arith.constant 0.00999999977 : f32
    %20 = vector.broadcast %cst_13 : f32 to vector<2x16xf32>
    %21 = arith.mulf %20, %17 : vector<2x16xf32>
    %22 = arith.select %19, %17, %21 : vector<2x16xi1>, vector<2x16xf32>
    %c0_14 = arith.constant 0 : index
    %c0_15 = arith.constant 0 : index
    %23 = vector.load %arg5[%c0_14, %c0_15] : memref<16x16xf32, #tpu.memory_space<vmem>>, vector<16x16xf32>
    %cst_16 = arith.constant dense<0.000000e+00> : vector<2x16xf32>
    %24 = tpu.matmul %22, %23, %cst_16 {dimension_numbers = #tpu.dot_dimension_numbers<[1], [0], [0], [1], [0, 0, 1, 1], [], []>} : vector<2x16xf32>, vector<16x16xf32>, vector<2x16xf32> -> vector<2x16xf32>
    %c0_17 = arith.constant 0 : index
    %c0_18 = arith.constant 0 : index
    %25 = vector.load %arg6[%c0_17, %c0_18] : memref<1x16xf32, #tpu.memory_space<vmem>>, vector<1x16xf32>
    %26 = vector.broadcast %25 : vector<1x16xf32> to vector<2x16xf32>
    %27 = arith.addf %24, %26 : vector<2x16xf32>
    %28 = vector.extract_strided_slice %27 {offsets = [0, 0], sizes = [2, 4], strides = [1, 1]} : vector<2x16xf32> to vector<2x4xf32>
    %29 = vector.extract_strided_slice %27 {offsets = [0, 4], sizes = [2, 4], strides = [1, 1]} : vector<2x16xf32> to vector<2x4xf32>
    %30 = vector.extract_strided_slice %27 {offsets = [0, 8], sizes = [2, 4], strides = [1, 1]} : vector<2x16xf32> to vector<2x4xf32>
    %31 = vector.extract_strided_slice %27 {offsets = [0, 12], sizes = [2, 4], strides = [1, 1]} : vector<2x16xf32> to vector<2x4xf32>
    %32 = arith.subf %31, %29 : vector<2x4xf32>
    %33 = arith.mulf %28, %32 : vector<2x4xf32>
    %cst_19 = arith.constant -3.000000e+01 : f32
    %cst_20 = arith.constant 3.000000e+01 : f32
    %34 = vector.broadcast %cst_19 : f32 to vector<2x4xf32>
    %35 = arith.maximumf %34, %33 : vector<2x4xf32>
    %36 = vector.broadcast %cst_20 : f32 to vector<2x4xf32>
    %37 = arith.minimumf %36, %35 : vector<2x4xf32>
    %cst_21 = arith.constant 1.000000e+00 : f32
    %38 = vector.broadcast %cst_21 : f32 to vector<2x4xf32>
    %39 = arith.subf %38, %30 : vector<2x4xf32>
    %cst_22 = arith.constant 0.000000e+00 : f32
    %40 = vector.broadcast %cst_22 : f32 to vector<2x4xf32>
    %41 = arith.subf %40, %37 : vector<2x4xf32>
    %42 = math.exp %41 : vector<2x4xf32>
    %cst_23 = arith.constant 1.000000e+00 : f32
    %43 = vector.broadcast %cst_23 : f32 to vector<2x4xf32>
    %44 = arith.addf %43, %42 : vector<2x4xf32>
    %45 = arith.divf %39, %44 : vector<2x4xf32>
    %46 = arith.addf %30, %45 : vector<2x4xf32>
    %c0_24 = arith.constant 0 : index
    %c0_25 = arith.constant 0 : index
    %47 = vector.load %arg7[%c0_24, %c0_25] : memref<2x4xf32, #tpu.memory_space<vmem>>, vector<2x4xf32>
    tpu.vector_store %arg7[%c0_24, %c0_25], %46 {strides = array<i32>} : memref<2x4xf32, #tpu.memory_space<vmem>>, vector<2x4xf32>,
    return
  }
}

</mosaic_0001>

<bundles_post_ra>
// kernel: forward.2
= control target key start
LH: loop header
LB: loop body
LE: loop exit
PB: predicated region body
PF: predicated region fallthrough
CT: control target
= control target key end

     0   :  { %s8109_s30 = smov 0   ;;  %s9904_s0 = inlined_call_operand.vmem [shape: f32[2,158,60], index: 0, kind: input, shape index: {}]   ;;  %s9905_s1 = inlined_call_operand.vmem [shape: f32[60,8], index: 1, kind: input, shape index: {}]   ;;  %s9906_s2 = inlined_call_operand.vmem [shape: f32[1,8], index: 2, kind: input, shape index: {}]   ;;  %s9907_s3 = inlined_call_operand.vmem [shape: f32[9,8,16], index: 3, kind: input, shape index: {}]   ;;  %s9908_s4 = inlined_call_operand.vmem [shape: f32[1,16], index: 4, kind: input, shape index: {}]   ;;  %s9909_s5 = inlined_call_operand.vmem [shape: f32[9,16,32], index: 5, kind: input, shape index: {}]   ;;  %s9910_s6 = inlined_call_operand.vmem [shape: f32[1,32], index: 6, kind: input, shape index: {}]   ;;  %s9911_s7 = inlined_call_operand.vmem [shape: f32[2,32,64], index: 7, kind: input, shape index: {}]   ;;  %s9912_s8 = inlined_call_operand.vmem [shape: f32[1,64], index: 8, kind: input, shape index: {}]   ;;  %s9913_s9 = inlined_call_operand.vmem [shape: f32[2,157,64], index: 9, kind: output, shape index: {}]  }
   0x1 LB: > { %s6317_s10 = sadd.s32 4294967295, %s8056_s30   ;;  %p6321_p0 = scmp.ge.s32.totalorder %s8056_s30, 1  ;;  %s8056_s30 = sphi %s8109_s30, %s19_s30  }
   0x2   : > { %p287_p1 = scmp.lt.s32.totalorder %s8056_s30, 3 }
   0x4   : > { %p288_p2 = pnand %p6321_p0, %p287_p1 }
   0x6   : > { %291 = sbr.rel (%p288_p2) target bundleno = 1241 (0x4d9), region = 56 }
   0xb   : > { %v408_v0 = vld [vmem:[%s9905_s1 + $0x38] sm:$0xf]  ;;  %vm477_vm0 = vcmask 1043456   ;;  %v407_v1 = vld [vmem:[%s9905_s1 + $0x30] sm:$0xff]  ;;  %p323_p3 = scmp.lt.s32.totalorder %s6317_s10, 1  ;;  %vm333_vm1 = vcmask 64512  }
   0xc   : > { %7242 = vmatprep.subr.msk.mxu0 %vm477_vm0, %v408_v0  ;;  %v406_v2 = vld [vmem:[%s9905_s1 + $0x28] sm:$0xff]  ;;  %v9914_v3 = vmov 0.0   ;;  %v405_v4 = vld [vmem:[%s9905_s1 + $0x20] sm:$0xff]  ;;  %vm416_vm2 = vcmask 490496   ;;  %v404_v5 = vld [vmem:[%s9905_s1 + $0x18] sm:$0xff]  ;;  %vm355_vm3 = vcmask 62464  }
   0xd   : > { %7243 = vmatpush3.msk.msra.mxu0 %vm477_vm0, %v408_v0  ;;  %s10047_s10 = smov (!%p323_p3, %s6317_s10), 1  ;;  %336 = vst.msk [vmem:[#allocation2 + $0x10] sm:$0xff] %vm333_vm1, %v9914_v3  ;;  %334 = vst.msk [vmem:[#allocation2] sm:$0xff] %vm333_vm1, %v9914_v3  ;;  %v403_v7 = vld [vmem:[%s9905_s1 + $0x10] sm:$0xff]  ;;  %v402_v8 = vld [vmem:[%s9905_s1 + $0x8] sm:$0xff] }
   0xe   : > { %335 = vst.msk [vmem:[#allocation2 + $0x8] sm:$0xff] %vm333_vm1, %v9914_v3  ;;  %337 = vst.msk [vmem:[#allocation2 + $0x18] sm:$0xff] %vm333_vm1, %v9914_v3  ;;  %7244 = vmatprep.subr.mxu0 %v407_v1  ;;  %s7960_s19 = smul.u32 160, %s10047_s10  ;;  %v401_v9 = vld [vmem:[%s9905_s1] sm:$0xff]  ;;  %v6388_v30 = vld [vmem:[%s9907_s3 + $0x10] sm:$0xff] }
   0xf   : > { %338 = vst.msk [vmem:[#allocation2 + $0x20] sm:$0xff] %vm333_vm1, %v9914_v3  ;;  %339 = vst.msk [vmem:[#allocation2 + $0x28] sm:$0xff] %vm333_vm1, %v9914_v3  ;;  %7245 = vmatpush3.msra.mxu0 %v407_v1  ;;  %v747_v29 = vld [vmem:[%s9907_s3] sm:$0xff]  ;;  %v8242_v31 = vld [vmem:[%s9907_s3 + $0x8] sm:$0xff] }
  0x10   : > { %340 = vst.msk [vmem:[#allocation2 + $0x30] sm:$0xff] %vm333_vm1, %v9914_v3  ;;  %341 = vst.msk [vmem:[#allocation2 + $0x38] sm:$0xff] %vm333_vm1, %v9914_v3  ;;  %7246 = vmatprep.subr.mxu0 %v406_v2  ;;  %s8182_s24 = scalar_lea.vmem %s9904_s0, %s7960_s19  ;;  %7958 = vmatprep.subr.mxu1 %v747_v29  ;;  %v8250_v32 = vld [vmem:[%s9906_s2] ss:$0 sm:$0xff]  ;;  %s9840_s21 = scalar_lea.vmem %s9913_s9, %s7960_s19 }
  0x11   : > { %342 = vst.msk [vmem:[#allocation2 + $0x40] sm:$0xff] %vm333_vm1, %v9914_v3  ;;  %343 = vst.msk [vmem:[#allocation2 + $0x48] sm:$0xff] %vm333_vm1, %v9914_v3  ;;  %7247 = vmatpush3.msra.mxu0 %v406_v2  ;;  %v381_v6 = vld [vmem:[%s8182_s24] sm:$0xff]  ;;  %v382_v10 = vld [vmem:[%s8182_s24 + $0x8] sm:$0xff]  ;;  %7959 = vmatpush3.msra.mxu1 %v747_v29 }
  0x12   : > { %344 = vst.msk [vmem:[#allocation2 + $0x50] sm:$0xff] %vm333_vm1, %v9914_v3  ;;  %345 = vst.msk [vmem:[#allocation2 + $0x58] sm:$0xff] %vm333_vm1, %v9914_v3  ;;  %7248 = vmatprep.subr.mxu0 %v405_v4  ;;  %7258 = vmatprep.mubr.msk.f32.mxu0 %vm416_vm2, %v381_v6  ;;  %v383_v11 = vld [vmem:[%s8182_s24 + $0x10] sm:$0xff]  ;;  %v384_v12 = vld [vmem:[%s8182_s24 + $0x18] sm:$0xff] }
  0x13   : > { %346 = vst.msk [vmem:[#allocation2 + $0x60] sm:$0xff] %vm333_vm1, %v9914_v3  ;;  %347 = vst.msk [vmem:[#allocation2 + $0x68] sm:$0xff] %vm333_vm1, %v9914_v3  ;;  %7249 = vmatpush3.msra.mxu0 %v405_v4  ;;  %v385_v13 = vld [vmem:[%s8182_s24 + $0x20] sm:$0xff]  ;;  %v386_v14 = vld [vmem:[%s8182_s24 + $0x28] sm:$0xff]  ;;  %7320 = vmatprep.subr.mxu1 %v8242_v31 }
  0x14   : > { %348 = vst.msk [vmem:[#allocation2 + $0x70] sm:$0xff] %vm333_vm1, %v9914_v3  ;;  %349 = vst.msk [vmem:[#allocation2 + $0x78] sm:$0xff] %vm333_vm1, %v9914_v3  ;;  %7250 = vmatprep.subr.mxu0 %v404_v5  ;;  %v387_v15 = vld [vmem:[%s8182_s24 + $0x30] sm:$0xff]  ;;  %v388_v16 = vld [vmem:[%s8182_s24 + $0x38] sm:$0xff] }
  0x15   : > { %350 = vst.msk [vmem:[#allocation2 + $0x80] sm:$0xff] %vm333_vm1, %v9914_v3  ;;  %351 = vst.msk [vmem:[#allocation2 + $0x88] sm:$0xff] %vm333_vm1, %v9914_v3  ;;  %7251 = vmatpush3.msra.mxu0 %v404_v5  ;;  %v389_v17 = vld [vmem:[%s8182_s24 + $0x40] sm:$0xff]  ;;  %v390_v18 = vld [vmem:[%s8182_s24 + $0x48] sm:$0xff] }
  0x16   : > { %352 = vst.msk [vmem:[#allocation2 + $0x90] sm:$0xff] %vm333_vm1, %v9914_v3  ;;  %353 = vst.msk [vmem:[#allocation2 + $0x98] sm:$0xff] %vm333_vm1, %v9914_v3  ;;  %7252 = vmatprep.subr.mxu0 %v403_v7  ;;  %v391_v19 = vld [vmem:[%s8182_s24 + $0x50] sm:$0xff]  ;;  %v392_v20 = vld [vmem:[%s8182_s24 + $0x58] sm:$0xff] }
  0x17   : > { %354 = vst.msk [vmem:[#allocation2 + $0xa0] sm:$0xff] %vm333_vm1, %v9914_v3  ;;  %7253 = vmatpush3.msra.mxu0 %v403_v7  ;;  %v393_v21 = vld [vmem:[%s8182_s24 + $0x60] sm:$0xff]  ;;  %v394_v22 = vld [vmem:[%s8182_s24 + $0x68] sm:$0xff]  ;;  %v395_v23 = vld [vmem:[%s8182_s24 + $0x70] sm:$0xff] }
  0x18   : > { %7254 = vmatprep.subr.mxu0 %v402_v8  ;;  %v396_v24 = vld [vmem:[%s8182_s24 + $0x78] sm:$0xff]  ;;  %v397_v25 = vld [vmem:[%s8182_s24 + $0x80] sm:$0xff]  ;;  %v398_v26 = vld [vmem:[%s8182_s24 + $0x88] sm:$0xff]  ;;  %356 = vst.msk [vmem:[#allocation2 + $0xa8] sm:$0x3f] %vm355_vm3, %v9914_v3 }
  0x19   : > { %7255 = vmatpush3.msra.mxu0 %v402_v8  ;;  %v399_v27 = vld [vmem:[%s8182_s24 + $0x90] sm:$0xff]  ;;  %v400_v28 = vld [vmem:[%s8182_s24 + $0x98] sm:$0x3f]  ;;  %v8272_v1 = vld [vmem:[%s9907_s3 + $0x20] sm:$0xff] }
  0x1a   : > { %7256 = vmatprep.subr.mxu0 %v401_v9 }
  0x1b   : > { %7257 = vmatpush3.msra.mxu0 %v401_v9 }
  0x1c   : > { %7259 = vmatmul.mubr.msk.f32.vlgmr.msra.gmra.mxu0 %vm416_vm2, %v382_v10  ;;  %7288 = vmatprep.subr.mxu0 %v747_v29 }
  0x1d   : > { %7261 = vmatprep.mubr.msk.f32.mxu0 %vm416_vm2, %v383_v11  ;;  %7289 = vmatpush3.msra.mxu0 %v747_v29 }
  0x1e   : > { %7352 = vmatprep.subr.mxu0 %v6388_v30 }
  0x20   : > { %7262 = vmatmul.mubr.msk.f32.gmra.mxu0 %vm416_vm2, %v384_v12 }
  0x21   : > { %7264 = vmatprep.mubr.msk.f32.mxu0 %vm416_vm2, %v385_v13 }
  0x24   : > { %7265 = vmatmul.mubr.msk.f32.gmra.mxu0 %vm416_vm2, %v386_v14 }
  0x25   : > { %7267 = vmatprep.mubr.msk.f32.mxu0 %vm416_vm2, %v387_v15 }
  0x28   : > { %7268 = vmatmul.mubr.msk.f32.gmra.mxu0 %vm416_vm2, %v388_v16 }
  0x29   : > { %7270 = vmatprep.mubr.msk.f32.mxu0 %vm416_vm2, %v389_v17 }
  0x2c   : > { %7271 = vmatmul.mubr.msk.f32.gmra.mxu0 %vm416_vm2, %v390_v18 }
  0x2d   : > { %7273 = vmatprep.mubr.msk.f32.mxu0 %vm416_vm2, %v391_v19 }
  0x30   : > { %7274 = vmatmul.mubr.msk.f32.gmra.mxu0 %vm416_vm2, %v392_v20 }
  0x31   : > { %7276 = vmatprep.mubr.msk.f32.mxu0 %vm416_vm2, %v393_v21 }
  0x34   : > { %7277 = vmatmul.mubr.msk.f32.gmra.mxu0 %vm416_vm2, %v394_v22 }
  0x35   : > { %7279 = vmatprep.mubr.msk.f32.mxu0 %vm416_vm2, %v395_v23 }
  0x38   : > { %7280 = vmatmul.mubr.msk.f32.gmra.mxu0 %vm416_vm2, %v396_v24 }
  0x39   : > { %7282 = vmatprep.mubr.msk.f32.mxu0 %vm416_vm2, %v397_v25 }
  0x3c   : > { %7283 = vmatmul.mubr.msk.f32.gmra.mxu0 %vm416_vm2, %v398_v26 }
  0x3d   : > { %7285 = vmatprep.mubr.msk.f32.mxu0 %vm416_vm2, %v399_v27 }
  0x40   : > { %7286 = vmatmul.mubr.msk.f32.gmra.mxu0 %vm416_vm2, %v400_v28 }
  0xdc   : > { %v7260_v33 = vpop.f32.mrf.mxu0 }
  0xdd   : > { %v553_v34 = vadd.f32 %v7260_v33, %v8250_v32 }
  0xde   : > { %v547_v35 = vpop.f32.mrf.mxu0 }
  0xdf   : > { %vm647_vm4 = vcmp.ge.f32.partialorder %v553_v34, 0.0  ;;  %v667_v36 = vmul.f32 0.01, %v553_v34  ;;  %v548_v37 = vadd.f32 %v8250_v32, %v547_v35 }
  0xe0   : > { %v7263_v38 = vpop.f32.mrf.mxu0 }
  0xe1   : > { %v687_v39 = vsel %vm647_vm4, %v553_v34, %v667_v36  ;;  %vm646_vm5 = vcmp.ge.f32.partialorder %v548_v37, 0.0  ;;  %v666_v40 = vmul.f32 0.01, %v548_v37  ;;  %v563_v41 = vadd.f32 %v7263_v38, %v8250_v32 }
  0xe2   : > { %707 = vst.msk [vmem:[#allocation2 + $0x10] sm:$0xff] %vm333_vm1, %v687_v39  ;;  %v557_v42 = vpop.f32.mrf.mxu0 }
  0xe3   : > { %v686_v43 = vsel %vm646_vm5, %v548_v37, %v666_v40  ;;  %vm649_vm6 = vcmp.ge.f32.partialorder %v563_v41, 0.0  ;;  %v669_v44 = vmul.f32 0.01, %v563_v41  ;;  %v558_v45 = vadd.f32 %v8250_v32, %v557_v42  ;;  %v8315_v37 = vld [vmem:[%s9907_s3 + $0x18] sm:$0xff]  ;;  %v8324_v42 = vld [vmem:[%s9907_s3 + $0x30] sm:$0xff] }
  0xe4   : > { %706 = vst.msk [vmem:[#allocation2 + $0x8] sm:$0xff] %vm333_vm1, %v686_v43  ;;  %v7266_v46 = vpop.f32.mrf.mxu0 }
  0xe5   : > { %v689_v47 = vsel %vm649_vm6, %v563_v41, %v669_v44  ;;  %vm648_vm7 = vcmp.ge.f32.partialorder %v558_v45, 0.0  ;;  %v668_v48 = vmul.f32 0.01, %v558_v45  ;;  %v573_v49 = vadd.f32 %v7266_v46, %v8250_v32 }
  0xe6   : > { %709 = vst.msk [vmem:[#allocation2 + $0x20] sm:$0xff] %vm333_vm1, %v689_v47  ;;  %v567_v50 = vpop.f32.mrf.mxu0 }
  0xe7   : > { %v688_v51 = vsel %vm648_vm7, %v558_v45, %v668_v48  ;;  %vm651_vm8 = vcmp.ge.f32.partialorder %v573_v49, 0.0  ;;  %v671_v52 = vmul.f32 0.01, %v573_v49  ;;  %v568_v53 = vadd.f32 %v8250_v32, %v567_v50 }
  0xe8   : > { %708 = vst.msk [vmem:[#allocation2 + $0x18] sm:$0xff] %vm333_vm1, %v688_v51  ;;  %v7269_v54 = vpop.f32.mrf.mxu0 }
  0xe9   : > { %v691_v55 = vsel %vm651_vm8, %v573_v49, %v671_v52  ;;  %vm650_vm9 = vcmp.ge.f32.partialorder %v568_v53, 0.0  ;;  %v670_v56 = vmul.f32 0.01, %v568_v53  ;;  %v583_v57 = vadd.f32 %v7269_v54, %v8250_v32 }
  0xea   : > { %711 = vst.msk [vmem:[#allocation2 + $0x30] sm:$0xff] %vm333_vm1, %v691_v55  ;;  %v577_v58 = vpop.f32.mrf.mxu0 }
  0xeb   : > { %v690_v59 = vsel %vm650_vm9, %v568_v53, %v670_v56  ;;  %vm653_vm10 = vcmp.ge.f32.partialorder %v583_v57, 0.0  ;;  %v673_v60 = vmul.f32 0.01, %v583_v57  ;;  %v578_v61 = vadd.f32 %v8250_v32, %v577_v58  ;;  %v727_v62 = vld [vmem:[#allocation2 + $0x4] sm:$0xff]  ;;  %v8265_v63 = vld [vmem:[#allocation2 + $0xc] sm:$0xff] }
  0xec   : > { %710 = vst.msk [vmem:[#allocation2 + $0x28] sm:$0xff] %vm333_vm1, %v690_v59  ;;  %v7272_v0 = vpop.f32.mrf.mxu0  ;;  %7290 = vmatprep.mubr.msk.f32.mxu0 %vm333_vm1, %v727_v62  ;;  %v1266_v26 = vld [vmem:[#allocation2 + $0x6] sm:$0xff]  ;;  %v1267_v36 = vld [vmem:[#allocation2 + $0xe] sm:$0xff] }
  0xed   : > { %v693_v2 = vsel %vm653_vm10, %v583_v57, %v673_v60  ;;  %vm652_vm11 = vcmp.ge.f32.partialorder %v578_v61, 0.0  ;;  %v672_v4 = vmul.f32 0.01, %v578_v61  ;;  %v593_v5 = vadd.f32 %v7272_v0, %v8250_v32  ;;  %7291 = vmatmul.mubr.msk.f32.vlgmr.msra.gmra.mxu0 %vm333_vm1, %v8265_v63 }
  0xee   : > { %713 = vst.msk [vmem:[#allocation2 + $0x40] sm:$0xff] %vm333_vm1, %v693_v2  ;;  %v587_v6 = vpop.f32.mrf.mxu0  ;;  %7353 = vmatpush3.msra.mxu0 %v6388_v30 }
  0xef   : > { %v692_v7 = vsel %vm652_vm11, %v578_v61, %v672_v4  ;;  %vm655_vm12 = vcmp.ge.f32.partialorder %v593_v5, 0.0  ;;  %v675_v8 = vmul.f32 0.01, %v593_v5  ;;  %v588_v9 = vadd.f32 %v8250_v32, %v587_v6  ;;  %v8279_v10 = vld [vmem:[#allocation2 + $0x14] sm:$0xff]  ;;  %v8281_v11 = vld [vmem:[#allocation2 + $0x1c] sm:$0xff]  ;;  %7416 = vmatprep.subr.mxu0 %v8272_v1 }
  0xf0   : > { %712 = vst.msk [vmem:[#allocation2 + $0x38] sm:$0xff] %vm333_vm1, %v692_v7  ;;  %v7275_v12 = vpop.f32.mrf.mxu0  ;;  %7293 = vmatprep.mubr.msk.f32.mxu0 %vm333_vm1, %v8279_v10  ;;  %v1268_v41 = vld [vmem:[#allocation2 + $0x16] sm:$0xff] }
  0xf1   : > { %v695_v13 = vsel %vm655_vm12, %v593_v5, %v675_v8  ;;  %vm654_vm13 = vcmp.ge.f32.partialorder %v588_v9, 0.0  ;;  %v674_v14 = vmul.f32 0.01, %v588_v9  ;;  %v603_v15 = vadd.f32 %v7275_v12, %v8250_v32  ;;  %7294 = vmatmul.mubr.msk.f32.gmra.mxu0 %vm333_vm1, %v8281_v11 }
  0xf2   : > { %715 = vst.msk [vmem:[#allocation2 + $0x50] sm:$0xff] %vm333_vm1, %v695_v13  ;;  %v597_v16 = vpop.f32.mrf.mxu0 }
  0xf3   : > { %v694_v17 = vsel %vm654_vm13, %v588_v9, %v674_v14  ;;  %vm657_vm14 = vcmp.ge.f32.partialorder %v603_v15, 0.0  ;;  %v677_v18 = vmul.f32 0.01, %v603_v15  ;;  %v598_v19 = vadd.f32 %v8250_v32, %v597_v16  ;;  %v8292_v20 = vld [vmem:[#allocation2 + $0x24] sm:$0xff]  ;;  %v8294_v21 = vld [vmem:[#allocation2 + $0x2c] sm:$0xff] }
  0xf4   : > { %714 = vst.msk [vmem:[#allocation2 + $0x48] sm:$0xff] %vm333_vm1, %v694_v17  ;;  %v7278_v22 = vpop.f32.mrf.mxu0  ;;  %7296 = vmatprep.mubr.msk.f32.mxu0 %vm333_vm1, %v8292_v20  ;;  %v1270_v53 = vld [vmem:[#allocation2 + $0x26] sm:$0xff]  ;;  %v1271_v61 = vld [vmem:[#allocation2 + $0x2e] sm:$0xff] }
  0xf5   : > { %v697_v23 = vsel %vm657_vm14, %v603_v15, %v677_v18  ;;  %vm656_vm15 = vcmp.ge.f32.partialorder %v598_v19, 0.0  ;;  %v676_v24 = vmul.f32 0.01, %v598_v19  ;;  %v613_v25 = vadd.f32 %v7278_v22, %v8250_v32  ;;  %7297 = vmatmul.mubr.msk.f32.gmra.mxu0 %vm333_vm1, %v8294_v21 }
  0xf6   : > { %717 = vst.msk [vmem:[#allocation2 + $0x60] sm:$0xff] %vm333_vm1, %v697_v23  ;;  %v607_v27 = vpop.f32.mrf.mxu0  ;;  %7354 = vmatprep.mubr.msk.f32.mxu0 %vm333_vm1, %v1266_v26 }
  0xf7   : > { %v696_v28 = vsel %vm656_vm15, %v598_v19, %v676_v24  ;;  %vm659_vm0 = vcmp.ge.f32.partialorder %v613_v25, 0.0  ;;  %v679_v29 = vmul.f32 0.01, %v613_v25  ;;  %v608_v30 = vadd.f32 %v8250_v32, %v607_v27  ;;  %v8305_v33 = vld [vmem:[#allocation2 + $0x34] sm:$0xff]  ;;  %v8307_v34 = vld [vmem:[#allocation2 + $0x3c] sm:$0xff] }
  0xf8   : > { %716 = vst.msk [vmem:[#allocation2 + $0x58] sm:$0xff] %vm333_vm1, %v696_v28  ;;  %v7281_v35 = vpop.f32.mrf.mxu0  ;;  %7299 = vmatprep.mubr.msk.f32.mxu1 %vm333_vm1, %v8305_v33  ;;  %v1272_v2 = vld [vmem:[#allocation2 + $0x36] sm:$0xff]  ;;  %v1273_v12 = vld [vmem:[#allocation2 + $0x3e] sm:$0xff] }
  0xf9   : > { %v699_v38 = vsel %vm659_vm0, %v613_v25, %v679_v29  ;;  %vm658_vm2 = vcmp.ge.f32.partialorder %v608_v30, 0.0  ;;  %v678_v39 = vmul.f32 0.01, %v608_v30  ;;  %v623_v40 = vadd.f32 %v7281_v35, %v8250_v32  ;;  %7300 = vmatmul.mubr.msk.f32.vlgmr.msra.gmra.mxu1 %vm333_vm1, %v8307_v34  ;;  %7355 = vmatmul.mubr.msk.f32.vlgmr.msra.gmra.mxu0 %vm333_vm1, %v1267_v36  ;;  %v999_v29 = vld [vmem:[#allocation2 + $0x5] sm:$0xff]  ;;  %v1000_v35 = vld [vmem:[#allocation2 + $0xd] sm:$0xff] }
  0xfa   : > { %719 = vst.msk [vmem:[#allocation2 + $0x70] sm:$0xff] %vm333_vm1, %v699_v38  ;;  %7321 = vmatpush3.msra.mxu1 %v8242_v31  ;;  %v617_v43 = vpop.f32.mrf.mxu0  ;;  %7357 = vmatprep.mubr.msk.f32.mxu0 %vm333_vm1, %v1268_v41  ;;  %v1269_v31 = vld [vmem:[#allocation2 + $0x1e] sm:$0xff]  ;;  %v8405_v38 = vld [vmem:[%s9907_s3 + $0x28] sm:$0xff] }
  0xfb   : > { %v698_v44 = vsel %vm658_vm2, %v608_v30, %v678_v39  ;;  %vm661_vm4 = vcmp.ge.f32.partialorder %v623_v40, 0.0  ;;  %v681_v45 = vmul.f32 0.01, %v623_v40  ;;  %v618_v46 = vadd.f32 %v8250_v32, %v617_v43  ;;  %v8330_v47 = vld [vmem:[#allocation2 + $0x44] sm:$0xff]  ;;  %v8332_v48 = vld [vmem:[#allocation2 + $0x4c] sm:$0xff]  ;;  %7384 = vmatprep.subr.mxu1 %v8315_v37  ;;  %7417 = vmatpush3.msra.mxu0 %v8272_v1  ;;  %v1001_v39 = vld [vmem:[#allocation2 + $0x15] sm:$0xff] }
  0xfc   : > { %718 = vst.msk [vmem:[#allocation2 + $0x68] sm:$0xff] %vm333_vm1, %v698_v44  ;;  %v7284_v49 = vpop.f32.mrf.mxu0  ;;  %7302 = vmatprep.mubr.msk.f32.mxu1 %vm333_vm1, %v8330_v47  ;;  %7480 = vmatprep.subr.mxu0 %v8324_v42  ;;  %v1274_v15 = vld [vmem:[#allocation2 + $0x46] sm:$0xff]  ;;  %v1275_v18 = vld [vmem:[#allocation2 + $0x4e] sm:$0xff]  ;;  %v1002_v41 = vld [vmem:[#allocation2 + $0x1d] sm:$0xff] }
  0xfd   : > { %v701_v50 = vsel %vm661_vm4, %v623_v40, %v681_v45  ;;  %vm660_vm5 = vcmp.ge.f32.partialorder %v618_v46, 0.0  ;;  %v680_v51 = vmul.f32 0.01, %v618_v46  ;;  %v633_v52 = vadd.f32 %v7284_v49, %v8250_v32  ;;  %7303 = vmatmul.mubr.msk.f32.gmra.mxu1 %vm333_vm1, %v8332_v48  ;;  %7358 = vmatmul.mubr.msk.f32.gmra.mxu0 %vm333_vm1, %v1269_v31  ;;  %v1003_v44 = vld [vmem:[#allocation2 + $0x25] sm:$0xff]  ;;  %v1005_v49 = vld [vmem:[#allocation2 + $0x35] sm:$0xff] }
  0xfe   : > { %721 = vst.msk [vmem:[#allocation2 + $0x80] sm:$0xff] %vm333_vm1, %v701_v50  ;;  %v627_v54 = vpop.f32.mrf.mxu0  ;;  %7360 = vmatprep.mubr.msk.f32.mxu0 %vm333_vm1, %v1270_v53  ;;  %v1800_v31 = vld [vmem:[#allocation2 + $0x8] sm:$0xff]  ;;  %v1006_v50 = vld [vmem:[#allocation2 + $0x3d] sm:$0xff] }
  0xff   : > { %v700_v55 = vsel %vm660_vm5, %v618_v46, %v680_v51  ;;  %vm663_vm6 = vcmp.ge.f32.partialorder %v633_v52, 0.0  ;;  %v683_v56 = vmul.f32 0.01, %v633_v52  ;;  %v628_v57 = vadd.f32 %v8250_v32, %v627_v54  ;;  %v8347_v58 = vld [vmem:[#allocation2 + $0x54] sm:$0xff]  ;;  %v8349_v59 = vld [vmem:[#allocation2 + $0x5c] sm:$0xff] }
 0x100   : > { %720 = vst.msk [vmem:[#allocation2 + $0x78] sm:$0xff] %vm333_vm1, %v700_v55  ;;  %v7287_v60 = vpop.f32.mrf.mxu0  ;;  %7305 = vmatprep.mubr.msk.f32.mxu1 %vm333_vm1, %v8347_v58  ;;  %v1276_v19 = vld [vmem:[#allocation2 + $0x56] sm:$0xff]  ;;  %v1277_v24 = vld [vmem:[#allocation2 + $0x5e] sm:$0xff]  ;;  %v1008_v55 = vld [vmem:[#allocation2 + $0x4d] sm:$0xff] }
 0x101   : > { %v703_v62 = vsel %vm663_vm6, %v633_v52, %v683_v56  ;;  %vm662_vm7 = vcmp.ge.f32.partialorder %v628_v57, 0.0  ;;  %v682_v0 = vmul.f32 0.01, %v628_v57  ;;  %v643_v1 = vadd.f32 %v7287_v60, %v8250_v32  ;;  %7306 = vmatmul.mubr.msk.f32.gmra.mxu1 %vm333_vm1, %v8349_v59  ;;  %7361 = vmatmul.mubr.msk.f32.gmra.mxu0 %vm333_vm1, %v1271_v61  ;;  %v1801_v51 = vld [vmem:[#allocation2 + $0x10] sm:$0xff]  ;;  %v1007_v52 = vld [vmem:[#allocation2 + $0x45] sm:$0xff]  ;;  %v1802_v53 = vld [vmem:[#allocation2 + $0x18] sm:$0xff] }
 0x102   : > { %723 = vst.msk [vmem:[#allocation2 + $0x90] sm:$0xff] %vm333_vm1, %v703_v62  ;;  %v637_v4 = vpop.f32.mrf.mxu0  ;;  %7363 = vmatprep.mubr.msk.f32.mxu0 %vm333_vm1, %v1272_v2  ;;  %v8426_v54 = vld [vmem:[%s9907_s3 + $0x40] sm:$0xff]  ;;  %v1804_v60 = vld [vmem:[#allocation2 + $0x28] sm:$0xff]  ;;  %v1805_v62 = vld [vmem:[#allocation2 + $0x30] sm:$0xff] }
 0x103   : > { %v702_v5 = vsel %vm662_vm7, %v628_v57, %v682_v0  ;;  %vm665_vm8 = vcmp.ge.f32.partialorder %v643_v1, 0.0  ;;  %v685_v6 = vmul.f32 0.01, %v643_v1  ;;  %v638_v7 = vadd.f32 %v8250_v32, %v637_v4  ;;  %v8361_v8 = vld [vmem:[#allocation2 + $0x64] sm:$0xff]  ;;  %v8363_v9 = vld [vmem:[#allocation2 + $0x6c] sm:$0xff]  ;;  %v1009_v57 = vld [vmem:[#allocation2 + $0x55] sm:$0xff] }
 0x104   : > { %722 = vst.msk [vmem:[#allocation2 + $0x88] sm:$0xff] %vm333_vm1, %v702_v5  ;;  %7308 = vmatprep.mubr.msk.f32.mxu1 %vm333_vm1, %v8361_v8  ;;  %v1278_v25 = vld [vmem:[#allocation2 + $0x66] sm:$0xff]  ;;  %v1279_v28 = vld [vmem:[#allocation2 + $0x6e] sm:$0xff]  ;;  %v1010_v61 = vld [vmem:[#allocation2 + $0x5d] sm:$0xff] }
 0x105   : > { %v705_v13 = vsel %vm665_vm8, %v643_v1, %v685_v6  ;;  %vm664_vm9 = vcmp.ge.f32.partialorder %v638_v7, 0.0  ;;  %v684_v14 = vmul.f32 0.01, %v638_v7  ;;  %7309 = vmatmul.mubr.msk.f32.gmra.mxu1 %vm333_vm1, %v8363_v9  ;;  %7364 = vmatmul.mubr.msk.f32.gmra.mxu0 %vm333_vm1, %v1273_v12  ;;  %v1803_v56 = vld [vmem:[#allocation2 + $0x20] sm:$0xff]  ;;  %v1806_v0 = vld [vmem:[#allocation2 + $0x38] sm:$0xff]  ;;  %v1012_v1 = vld [vmem:[#allocation2 + $0x6d] sm:$0xff] }
 0x106   : > { %725 = vst.msk [vmem:[#allocation2 + $0xa0] sm:$0x3f] %vm355_vm3, %v705_v13  ;;  %7366 = vmatprep.mubr.msk.f32.mxu0 %vm333_vm1, %v1274_v15  ;;  %v1807_v2 = vld [vmem:[#allocation2 + $0x40] sm:$0xff]  ;;  %v1808_v5 = vld [vmem:[#allocation2 + $0x48] sm:$0xff]  ;;  %v1810_v13 = vld [vmem:[#allocation2 + $0x58] sm:$0xff]  ;;  %vm379_vm3 = vcmask 128000  }
 0x107   : > { %v704_v32 = vsel %vm664_vm9, %v638_v7, %v684_v14  ;;  %v8373_v16 = vld [vmem:[#allocation2 + $0x74] sm:$0xff]  ;;  %v8375_v17 = vld [vmem:[#allocation2 + $0x7c] sm:$0xff] }
 0x108   : > { %724 = vst.msk [vmem:[#allocation2 + $0x98] sm:$0xff] %vm333_vm1, %v704_v32  ;;  %7311 = vmatprep.mubr.msk.f32.mxu1 %vm333_vm1, %v8373_v16  ;;  %v1280_v30 = vld [vmem:[#allocation2 + $0x76] sm:$0xff]  ;;  %v1281_v36 = vld [vmem:[#allocation2 + $0x7e] sm:$0xff] }
 0x109   : > { %7312 = vmatmul.mubr.msk.f32.gmra.mxu1 %vm333_vm1, %v8375_v17  ;;  %7367 = vmatmul.mubr.msk.f32.gmra.mxu0 %vm333_vm1, %v1275_v18  ;;  %v1013_v4 = vld [vmem:[#allocation2 + $0x75] sm:$0xff]  ;;  %v1014_v6 = vld [vmem:[#allocation2 + $0x7d] sm:$0xff]  ;;  %v1812_v18 = vld [vmem:[#allocation2 + $0x68] sm:$0xff] }
 0x10a   : > { %7369 = vmatprep.mubr.msk.f32.mxu0 %vm333_vm1, %v1276_v19  ;;  %v1809_v7 = vld [vmem:[#allocation2 + $0x50] sm:$0xff]  ;;  %v1811_v15 = vld [vmem:[#allocation2 + $0x60] sm:$0xff] }
 0x10b   : > { %v8384_v22 = vld [vmem:[#allocation2 + $0x84] sm:$0xff]  ;;  %v8386_v23 = vld [vmem:[#allocation2 + $0x8c] sm:$0xff] }
 0x10c   : > { %7314 = vmatprep.mubr.msk.f32.mxu1 %vm333_vm1, %v8384_v22  ;;  %v1282_v40 = vld [vmem:[#allocation2 + $0x86] sm:$0xff]  ;;  %v1283_v43 = vld [vmem:[#allocation2 + $0x8e] sm:$0xff] }
 0x10d   : > { %7315 = vmatmul.mubr.msk.f32.gmra.mxu1 %vm333_vm1, %v8386_v23  ;;  %7370 = vmatmul.mubr.msk.f32.gmra.mxu0 %vm333_vm1, %v1277_v24  ;;  %v1015_v12 = vld [vmem:[#allocation2 + $0x85] sm:$0xff]  ;;  %v1016_v14 = vld [vmem:[#allocation2 + $0x8d] sm:$0xff] }
 0x10e   : > { %7372 = vmatprep.mubr.msk.f32.mxu0 %vm333_vm1, %v1278_v25  ;;  %v1813_v24 = vld [vmem:[#allocation2 + $0x70] sm:$0xff]  ;;  %v1533_v25 = vld [vmem:[#allocation2 + $0x7] sm:$0xff] }
 0x10f   : > { %v8394_v26 = vld [vmem:[#allocation2 + $0x94] sm:$0xff]  ;;  %v746_v27 = vld [vmem:[#allocation2 + $0x9c] sm:$0x3f] }
 0x110   : > { %7317 = vmatprep.mubr.msk.f32.mxu1 %vm333_vm1, %v8394_v26  ;;  %v1284_v45 = vld [vmem:[#allocation2 + $0x96] sm:$0xff]  ;;  %v1285_v46 = vld [vmem:[#allocation2 + $0x9e] sm:$0x3f] }
 0x111   : > { %7318 = vmatmul.mubr.msk.f32.gmra.mxu1 %vm333_vm1, %v746_v27  ;;  %7373 = vmatmul.mubr.msk.f32.gmra.mxu0 %vm333_vm1, %v1279_v28  ;;  %v1017_v32 = vld [vmem:[#allocation2 + $0x95] sm:$0xff]  ;;  %v1018_v19 = vld [vmem:[#allocation2 + $0x9d] sm:$0x3f] }
 0x112   : > { %7322 = vmatprep.mubr.msk.f32.mxu1 %vm333_vm1, %v999_v29  ;;  %7375 = vmatprep.mubr.msk.f32.mxu0 %vm333_vm1, %v1280_v30  ;;  %v1814_v27 = vld [vmem:[#allocation2 + $0x78] sm:$0xff]  ;;  %v1534_v28 = vld [vmem:[#allocation2 + $0xf] sm:$0xff]  ;;  %v1815_v29 = vld [vmem:[#allocation2 + $0x80] sm:$0xff] }
 0x113   : > { %v8459_v30 = vld [vmem:[%s9907_s3 + $0x38] sm:$0xff] }
 0x115   : > { %7323 = vmatmul.mubr.msk.f32.vlgmr.msra.gmra.mxu1 %vm333_vm1, %v1000_v35  ;;  %7376 = vmatmul.mubr.msk.f32.gmra.mxu0 %vm333_vm1, %v1281_v36  ;;  %v1535_v35 = vld [vmem:[#allocation2 + $0x17] sm:$0xff]  ;;  %v1816_v36 = vld [vmem:[#allocation2 + $0x88] sm:$0xff] }
 0x116   : > { %7385 = vmatpush3.msra.mxu1 %v8315_v37  ;;  %7325 = vmatprep.mubr.msk.f32.mxu1 %vm333_vm1, %v1001_v39  ;;  %v1004_v37 = vld [vmem:[#allocation2 + $0x2d] sm:$0xff]  ;;  %v1536_v39 = vld [vmem:[#allocation2 + $0x1f] sm:$0xff] }
 0x117   : > { %7378 = vmatprep.mubr.msk.f32.mxu0 %vm333_vm1, %v1282_v40  ;;  %7448 = vmatprep.subr.mxu1 %v8405_v38  ;;  %v1817_v40 = vld [vmem:[#allocation2 + $0x90] sm:$0xff] }
 0x119   : > { %7326 = vmatmul.mubr.msk.f32.gmra.mxu1 %vm333_vm1, %v1002_v41  ;;  %7379 = vmatmul.mubr.msk.f32.gmra.mxu0 %vm333_vm1, %v1283_v43  ;;  %v1537_v41 = vld [vmem:[#allocation2 + $0x27] sm:$0xff]  ;;  %v1818_v43 = vld [vmem:[#allocation2 + $0x98] sm:$0xff] }
 0x11a   : > { %7328 = vmatprep.mubr.msk.f32.mxu1 %vm333_vm1, %v1003_v44  ;;  %7381 = vmatprep.mubr.msk.f32.mxu0 %vm333_vm1, %v1284_v45  ;;  %v1819_v44 = vld [vmem:[#allocation2 + $0xa0] sm:$0x3f]  ;;  %v1539_v45 = vld [vmem:[#allocation2 + $0x37] sm:$0xff] }
 0x11d   : > { %7329 = vmatmul.mubr.msk.f32.gmra.mxu1 %vm333_vm1, %v1004_v37  ;;  %7382 = vmatmul.mubr.msk.f32.gmra.mxu0 %vm333_vm1, %v1285_v46  ;;  %v2334_v37 = vld [vmem:[#allocation2 + $0xa] sm:$0xff]  ;;  %v1540_v46 = vld [vmem:[#allocation2 + $0x3f] sm:$0xff] }
 0x11e   : > { %7331 = vmatprep.mubr.msk.f32.mxu1 %vm333_vm1, %v1005_v49  ;;  %7418 = vmatprep.mubr.msk.f32.mxu0 %vm333_vm1, %v1800_v31  ;;  %v2335_v49 = vld [vmem:[#allocation2 + $0x12] sm:$0xff]  ;;  %v1541_v31 = vld [vmem:[#allocation2 + $0x47] sm:$0xff] }
 0x121   : > { %7332 = vmatmul.mubr.msk.f32.gmra.mxu1 %vm333_vm1, %v1006_v50  ;;  %7419 = vmatmul.mubr.msk.f32.vlgmr.msra.gmra.mxu0 %vm333_vm1, %v1801_v51  ;;  %v2336_v50 = vld [vmem:[#allocation2 + $0x1a] sm:$0xff]  ;;  %v1542_v51 = vld [vmem:[#allocation2 + $0x4f] sm:$0xff] }
 0x122   : > { %7334 = vmatprep.mubr.msk.f32.mxu1 %vm333_vm1, %v1007_v52  ;;  %7421 = vmatprep.mubr.msk.f32.mxu0 %vm333_vm1, %v1802_v53  ;;  %v2337_v52 = vld [vmem:[#allocation2 + $0x22] sm:$0xff]  ;;  %v1543_v53 = vld [vmem:[#allocation2 + $0x57] sm:$0xff] }
 0x123   : > { %7481 = vmatpush3.msra.mxu0 %v8324_v42  ;;  %v1011_v42 = vld [vmem:[#allocation2 + $0x65] sm:$0xff] }
 0x124   : > { %7544 = vmatprep.subr.mxu0 %v8426_v54 }
 0x125   : > { %7335 = vmatmul.mubr.msk.f32.gmra.mxu1 %vm333_vm1, %v1008_v55  ;;  %7422 = vmatmul.mubr.msk.f32.gmra.mxu0 %vm333_vm1, %v1803_v56  ;;  %v2338_v55 = vld [vmem:[#allocation2 + $0x2a] sm:$0xff]  ;;  %v1544_v56 = vld [vmem:[#allocation2 + $0x5f] sm:$0xff] }
 0x126   : > { %7337 = vmatprep.mubr.msk.f32.mxu1 %vm333_vm1, %v1009_v57  ;;  %7424 = vmatprep.mubr.msk.f32.mxu0 %vm333_vm1, %v1804_v60  ;;  %v2339_v57 = vld [vmem:[#allocation2 + $0x32] sm:$0xff]  ;;  %v1545_v60 = vld [vmem:[#allocation2 + $0x67] sm:$0xff] }
 0x129   : > { %7338 = vmatmul.mubr.msk.f32.gmra.mxu1 %vm333_vm1, %v1010_v61  ;;  %7425 = vmatmul.mubr.msk.f32.gmra.mxu0 %vm333_vm1, %v1805_v62  ;;  %v1546_v61 = vld [vmem:[#allocation2 + $0x6f] sm:$0xff]  ;;  %v2341_v62 = vld [vmem:[#allocation2 + $0x42] sm:$0xff] }
 0x12a   : > { %7340 = vmatprep.mubr.msk.f32.mxu1 %vm333_vm1, %v1011_v42  ;;  %7427 = vmatprep.mubr.msk.f32.mxu0 %vm333_vm1, %v1806_v0  ;;  %v1547_v42 = vld [vmem:[#allocation2 + $0x77] sm:$0xff]  ;;  %v2342_v0 = vld [vmem:[#allocation2 + $0x4a] sm:$0xff] }
 0x12d   : > { %7341 = vmatmul.mubr.msk.f32.gmra.mxu1 %vm333_vm1, %v1012_v1  ;;  %7428 = vmatmul.mubr.msk.f32.gmra.mxu0 %vm333_vm1, %v1807_v2  ;;  %v1548_v1 = vld [vmem:[#allocation2 + $0x7f] sm:$0xff]  ;;  %v2343_v2 = vld [vmem:[#allocation2 + $0x52] sm:$0xff] }
 0x12e   : > { %7343 = vmatprep.mubr.msk.f32.mxu1 %vm333_vm1, %v1013_v4  ;;  %7430 = vmatprep.mubr.msk.f32.mxu0 %vm333_vm1, %v1808_v5  ;;  %v1549_v4 = vld [vmem:[#allocation2 + $0x87] sm:$0xff]  ;;  %v2344_v5 = vld [vmem:[#allocation2 + $0x5a] sm:$0xff] }
 0x131   : > { %7344 = vmatmul.mubr.msk.f32.gmra.mxu1 %vm333_vm1, %v1014_v6  ;;  %7431 = vmatmul.mubr.msk.f32.gmra.mxu0 %vm333_vm1, %v1809_v7  ;;  %v1550_v6 = vld [vmem:[#allocation2 + $0x8f] sm:$0xff]  ;;  %v2345_v7 = vld [vmem:[#allocation2 + $0x62] sm:$0xff] }
 0x132   : > { %7346 = vmatprep.mubr.msk.f32.mxu1 %vm333_vm1, %v1015_v12  ;;  %7433 = vmatprep.mubr.msk.f32.mxu0 %vm333_vm1, %v1810_v13  ;;  %v1551_v12 = vld [vmem:[#allocation2 + $0x97] sm:$0xff]  ;;  %v2346_v13 = vld [vmem:[#allocation2 + $0x6a] sm:$0xff] }
 0x135   : > { %7347 = vmatmul.mubr.msk.f32.gmra.mxu1 %vm333_vm1, %v1016_v14  ;;  %7434 = vmatmul.mubr.msk.f32.gmra.mxu0 %vm333_vm1, %v1811_v15  ;;  %v1552_v14 = vld [vmem:[#allocation2 + $0x9f] sm:$0x3f]  ;;  %v2347_v15 = vld [vmem:[#allocation2 + $0x72] sm:$0xff] }
 0x136   : > { %7349 = vmatprep.mubr.msk.f32.mxu1 %vm333_vm1, %v1017_v32  ;;  %7436 = vmatprep.mubr.msk.f32.mxu0 %vm333_vm1, %v1812_v18  ;;  %v2067_v32 = vld [vmem:[#allocation2 + $0x9] sm:$0xff]  ;;  %v2348_v18 = vld [vmem:[#allocation2 + $0x7a] sm:$0xff] }
 0x139   : > { %7350 = vmatmul.mubr.msk.f32.gmra.mxu1 %vm333_vm1, %v1018_v19  ;;  %7437 = vmatmul.mubr.msk.f32.gmra.mxu0 %vm333_vm1, %v1813_v24  ;;  %v2068_v19 = vld [vmem:[#allocation2 + $0x11] sm:$0xff]  ;;  %v2349_v24 = vld [vmem:[#allocation2 + $0x82] sm:$0xff] }
 0x13a   : > { %7386 = vmatprep.mubr.msk.f32.mxu1 %vm333_vm1, %v1533_v25  ;;  %7439 = vmatprep.mubr.msk.f32.mxu0 %vm333_vm1, %v1814_v27  ;;  %v2069_v25 = vld [vmem:[#allocation2 + $0x19] sm:$0xff]  ;;  %v2350_v27 = vld [vmem:[#allocation2 + $0x8a] sm:$0xff] }
 0x13d   : > { %7387 = vmatmul.mubr.msk.f32.vlgmr.msra.gmra.mxu1 %vm333_vm1, %v1534_v28  ;;  %7440 = vmatmul.mubr.msk.f32.gmra.mxu0 %vm333_vm1, %v1815_v29  ;;  %v2070_v28 = vld [vmem:[#allocation2 + $0x21] sm:$0xff]  ;;  %v2351_v29 = vld [vmem:[#allocation2 + $0x92] sm:$0xff] }
 0x13e   : > { %7449 = vmatpush3.msra.mxu1 %v8405_v38  ;;  %7389 = vmatprep.mubr.msk.f32.mxu1 %vm333_vm1, %v1535_v35  ;;  %v1538_v38 = vld [vmem:[#allocation2 + $0x2f] sm:$0xff] }
 0x13f   : > { %7442 = vmatprep.mubr.msk.f32.mxu0 %vm333_vm1, %v1816_v36  ;;  %7512 = vmatprep.subr.mxu1 %v8459_v30  ;;  %v2071_v35 = vld [vmem:[#allocation2 + $0x29] sm:$0xff]  ;;  %v2352_v36 = vld [vmem:[#allocation2 + $0x9a] sm:$0xff] }
 0x141   : > { %7390 = vmatmul.mubr.msk.f32.gmra.mxu1 %vm333_vm1, %v1536_v39  ;;  %7443 = vmatmul.mubr.msk.f32.gmra.mxu0 %vm333_vm1, %v1817_v40  ;;  %v2072_v39 = vld [vmem:[#allocation2 + $0x31] sm:$0xff]  ;;  %v2353_v40 = vld [vmem:[#allocation2 + $0xa2] sm:$0x3f] }
 0x142   : > { %7392 = vmatprep.mubr.msk.f32.mxu1 %vm333_vm1, %v1537_v41  ;;  %7445 = vmatprep.mubr.msk.f32.mxu0 %vm333_vm1, %v1818_v43  ;;  %v2074_v41 = vld [vmem:[#allocation2 + $0x41] sm:$0xff]  ;;  %v2075_v43 = vld [vmem:[#allocation2 + $0x49] sm:$0xff] }
 0x145   : > { %7393 = vmatmul.mubr.msk.f32.gmra.mxu1 %vm333_vm1, %v1538_v38  ;;  %7446 = vmatmul.mubr.msk.f32.gmra.mxu0 %vm333_vm1, %v1819_v44  ;;  %v2076_v38 = vld [vmem:[#allocation2 + $0x51] sm:$0xff]  ;;  %v2077_v44 = vld [vmem:[#allocation2 + $0x59] sm:$0xff] }
 0x146   : > { %7395 = vmatprep.mubr.msk.f32.mxu1 %vm333_vm1, %v1539_v45  ;;  %7482 = vmatprep.mubr.msk.f32.mxu0 %vm333_vm1, %v2334_v37  ;;  %v2606_v45 = vld [vmem:[#allocation2 + $0x33] sm:$0xff]  ;;  %v2607_v37 = vld [vmem:[#allocation2 + $0x3b] sm:$0xff] }
 0x149   : > { %7396 = vmatmul.mubr.msk.f32.gmra.mxu1 %vm333_vm1, %v1540_v46  ;;  %7483 = vmatmul.mubr.msk.f32.vlgmr.msra.gmra.mxu0 %vm333_vm1, %v2335_v49  ;;  %v2609_v46 = vld [vmem:[#allocation2 + $0x4b] sm:$0xff]  ;;  %v2611_v49 = vld [vmem:[#allocation2 + $0x5b] sm:$0xff] }
 0x14a   : > { %7398 = vmatprep.mubr.msk.f32.mxu1 %vm333_vm1, %v1541_v31  ;;  %7485 = vmatprep.mubr.msk.f32.mxu0 %vm333_vm1, %v2336_v50  ;;  %v2612_v31 = vld [vmem:[#allocation2 + $0x63] sm:$0xff]  ;;  %v2613_v50 = vld [vmem:[#allocation2 + $0x6b] sm:$0xff] }
 0x14b   : > { %7545 = vmatpush3.msra.mxu0 %v8426_v54  ;;  %v2340_v54 = vld [vmem:[#allocation2 + $0x3a] sm:$0xff] }
 0x14d   : > { %7399 = vmatmul.mubr.msk.f32.gmra.mxu1 %vm333_vm1, %v1542_v51  ;;  %7486 = vmatmul.mubr.msk.f32.gmra.mxu0 %vm333_vm1, %v2337_v52  ;;  %v2614_v51 = vld [vmem:[#allocation2 + $0x73] sm:$0xff]  ;;  %v2615_v52 = vld [vmem:[#allocation2 + $0x7b] sm:$0xff] }
 0x14e   : > { %7401 = vmatprep.mubr.msk.f32.mxu1 %vm333_vm1, %v1543_v53  ;;  %7488 = vmatprep.mubr.msk.f32.mxu0 %vm333_vm1, %v2338_v55  ;;  %v2616_v53 = vld [vmem:[#allocation2 + $0x83] sm:$0xff]  ;;  %v2617_v55 = vld [vmem:[#allocation2 + $0x8b] sm:$0xff] }
 0x151   : > { %7402 = vmatmul.mubr.msk.f32.gmra.mxu1 %vm333_vm1, %v1544_v56  ;;  %7489 = vmatmul.mubr.msk.f32.gmra.mxu0 %vm333_vm1, %v2339_v57  ;;  %v2618_v56 = vld [vmem:[#allocation2 + $0x93] sm:$0xff] }
 0x152   : > { %7404 = vmatprep.mubr.msk.f32.mxu1 %vm333_vm1, %v1545_v60  ;;  %7491 = vmatprep.mubr.msk.f32.mxu0 %vm333_vm1, %v2340_v54  ;;  %v2619_v60 = vld [vmem:[#allocation2 + $0x9b] sm:$0xff] }
 0x155   : > { %7405 = vmatmul.mubr.msk.f32.gmra.mxu1 %vm333_vm1, %v1546_v61  ;;  %7492 = vmatmul.mubr.msk.f32.gmra.mxu0 %vm333_vm1, %v2341_v62  ;;  %v2620_v61 = vld [vmem:[#allocation2 + $0xa3] sm:$0x3f] }
 0x156   : > { %7407 = vmatprep.mubr.msk.f32.mxu1 %vm333_vm1, %v1547_v42  ;;  %7494 = vmatprep.mubr.msk.f32.mxu0 %vm333_vm1, %v2342_v0 }
 0x159   : > { %7408 = vmatmul.mubr.msk.f32.gmra.mxu1 %vm333_vm1, %v1548_v1  ;;  %7495 = vmatmul.mubr.msk.f32.gmra.mxu0 %vm333_vm1, %v2343_v2 }
 0x15a   : > { %7410 = vmatprep.mubr.msk.f32.mxu1 %vm333_vm1, %v1549_v4  ;;  %7497 = vmatprep.mubr.msk.f32.mxu0 %vm333_vm1, %v2344_v5 }
 0x15d   : > { %7411 = vmatmul.mubr.msk.f32.gmra.mxu1 %vm333_vm1, %v1550_v6  ;;  %7498 = vmatmul.mubr.msk.f32.gmra.mxu0 %vm333_vm1, %v2345_v7 }
 0x15e   : > { %7413 = vmatprep.mubr.msk.f32.mxu1 %vm333_vm1, %v1551_v12  ;;  %7500 = vmatprep.mubr.msk.f32.mxu0 %vm333_vm1, %v2346_v13 }
 0x161   : > { %7414 = vmatmul.mubr.msk.f32.gmra.mxu1 %vm333_vm1, %v1552_v14  ;;  %7501 = vmatmul.mubr.msk.f32.gmra.mxu0 %vm333_vm1, %v2347_v15 }
 0x162   : > { %7450 = vmatprep.mubr.msk.f32.mxu1 %vm333_vm1, %v2067_v32  ;;  %7503 = vmatprep.mubr.msk.f32.mxu0 %vm333_vm1, %v2348_v18 }
 0x165   : > { %7451 = vmatmul.mubr.msk.f32.vlgmr.msra.gmra.mxu1 %vm333_vm1, %v2068_v19  ;;  %7504 = vmatmul.mubr.msk.f32.gmra.mxu0 %vm333_vm1, %v2349_v24 }
 0x166   : > { %7513 = vmatpush3.msra.mxu1 %v8459_v30  ;;  %7453 = vmatprep.mubr.msk.f32.mxu1 %vm333_vm1, %v2069_v25  ;;  %v2073_v30 = vld [vmem:[#allocation2 + $0x39] sm:$0xff] }
 0x167   : > { %7506 = vmatprep.mubr.msk.f32.mxu0 %vm333_vm1, %v2350_v27  ;;  %v3257_v27 = vld [vmem:[%s9909_s5 + $0x8] sm:$0xff] }
 0x168   : > { %7576 = vmatprep.subr.mxu1 %v3257_v27 }
 0x169   : > { %7454 = vmatmul.mubr.msk.f32.gmra.mxu1 %vm333_vm1, %v2070_v28  ;;  %7507 = vmatmul.mubr.msk.f32.gmra.mxu0 %vm333_vm1, %v2351_v29 }
 0x16a   : > { %7456 = vmatprep.mubr.msk.f32.mxu1 %vm333_vm1, %v2071_v35  ;;  %7509 = vmatprep.mubr.msk.f32.mxu0 %vm333_vm1, %v2352_v36 }
 0x16d   : > { %7457 = vmatmul.mubr.msk.f32.gmra.mxu1 %vm333_vm1, %v2072_v39  ;;  %7510 = vmatmul.mubr.msk.f32.gmra.mxu0 %vm333_vm1, %v2353_v40 }
 0x16e   : > { %7459 = vmatprep.mubr.msk.f32.mxu1 %vm333_vm1, %v2073_v30  ;;  %7546 = vmatprep.mubr.msk.f32.mxu0 %vm333_vm1, %v8265_v63  ;;  %v2078_v63 = vld [vmem:[#allocation2 + $0x61] sm:$0xff] }
 0x171   : > { %7460 = vmatmul.mubr.msk.f32.gmra.mxu1 %vm333_vm1, %v2074_v41  ;;  %7547 = vmatmul.mubr.msk.f32.vlgmr.msra.gmra.mxu0 %vm333_vm1, %v8279_v10  ;;  %v2079_v10 = vld [vmem:[#allocation2 + $0x69] sm:$0xff] }
 0x172   : > { %7462 = vmatprep.mubr.msk.f32.mxu1 %vm333_vm1, %v2075_v43  ;;  %7549 = vmatprep.mubr.msk.f32.mxu0 %vm333_vm1, %v8281_v11  ;;  %v2080_v11 = vld [vmem:[#allocation2 + $0x71] sm:$0xff] }
 0x175   : > { %7463 = vmatmul.mubr.msk.f32.gmra.mxu1 %vm333_vm1, %v2076_v38  ;;  %7550 = vmatmul.mubr.msk.f32.gmra.mxu0 %vm333_vm1, %v8292_v20  ;;  %v2081_v20 = vld [vmem:[#allocation2 + $0x79] sm:$0xff] }
 0x176   : > { %7465 = vmatprep.mubr.msk.f32.mxu1 %vm333_vm1, %v2077_v44  ;;  %7552 = vmatprep.mubr.msk.f32.mxu0 %vm333_vm1, %v8294_v21  ;;  %v2082_v21 = vld [vmem:[#allocation2 + $0x81] sm:$0xff]  ;;  %v8693_v44 = vld [vmem:[%s9908_s4] ss:$0 sm:$0xff] }
 0x179   : > { %7466 = vmatmul.mubr.msk.f32.gmra.mxu1 %vm333_vm1, %v2078_v63  ;;  %7553 = vmatmul.mubr.msk.f32.gmra.mxu0 %vm333_vm1, %v8305_v33  ;;  %v2083_v33 = vld [vmem:[#allocation2 + $0x89] sm:$0xff] }
 0x17a   : > { %7468 = vmatprep.mubr.msk.f32.mxu1 %vm333_vm1, %v2079_v10  ;;  %7555 = vmatprep.mubr.msk.f32.mxu0 %vm333_vm1, %v8307_v34  ;;  %v2084_v34 = vld [vmem:[#allocation2 + $0x91] sm:$0xff] }
 0x17d   : > { %7469 = vmatmul.mubr.msk.f32.gmra.mxu1 %vm333_vm1, %v2080_v11  ;;  %7556 = vmatmul.mubr.msk.f32.gmra.mxu0 %vm333_vm1, %v8330_v47  ;;  %v2085_v47 = vld [vmem:[#allocation2 + $0x99] sm:$0xff] }
 0x17e   : > { %7471 = vmatprep.mubr.msk.f32.mxu1 %vm333_vm1, %v2081_v20  ;;  %7558 = vmatprep.mubr.msk.f32.mxu0 %vm333_vm1, %v8332_v48  ;;  %v2086_v48 = vld [vmem:[#allocation2 + $0xa1] sm:$0x3f] }
 0x181   : > { %7472 = vmatmul.mubr.msk.f32.gmra.mxu1 %vm333_vm1, %v2082_v21  ;;  %7559 = vmatmul.mubr.msk.f32.gmra.mxu0 %vm333_vm1, %v8347_v58  ;;  %v2601_v58 = vld [vmem:[#allocation2 + $0xb] sm:$0xff] }
 0x182   : > { %7474 = vmatprep.mubr.msk.f32.mxu1 %vm333_vm1, %v2083_v33  ;;  %7561 = vmatprep.mubr.msk.f32.mxu0 %vm333_vm1, %v8349_v59  ;;  %v2602_v59 = vld [vmem:[#allocation2 + $0x13] sm:$0xff] }
 0x185   : > { %7475 = vmatmul.mubr.msk.f32.gmra.mxu1 %vm333_vm1, %v2084_v34  ;;  %7562 = vmatmul.mubr.msk.f32.gmra.mxu0 %vm333_vm1, %v8361_v8  ;;  %v2603_v8 = vld [vmem:[#allocation2 + $0x1b] sm:$0xff] }
 0x186   : > { %7477 = vmatprep.mubr.msk.f32.mxu1 %vm333_vm1, %v2085_v47  ;;  %7564 = vmatprep.mubr.msk.f32.mxu0 %vm333_vm1, %v8363_v9  ;;  %v2604_v9 = vld [vmem:[#allocation2 + $0x23] sm:$0xff] }
 0x189   : > { %7478 = vmatmul.mubr.msk.f32.gmra.mxu1 %vm333_vm1, %v2086_v48  ;;  %7565 = vmatmul.mubr.msk.f32.gmra.mxu0 %vm333_vm1, %v8373_v16  ;;  %v2605_v16 = vld [vmem:[#allocation2 + $0x2b] sm:$0xff] }
 0x18a   : > { %7514 = vmatprep.mubr.msk.f32.mxu1 %vm333_vm1, %v2601_v58  ;;  %7567 = vmatprep.mubr.msk.f32.mxu0 %vm333_vm1, %v8375_v17  ;;  %v2886_v17 = vld [vmem:[#allocation2 + $0x9c] sm:$0xff] }
 0x18d   : > { %7515 = vmatmul.mubr.msk.f32.vlgmr.msra.gmra.mxu1 %vm333_vm1, %v2602_v59  ;;  %7568 = vmatmul.mubr.msk.f32.gmra.mxu0 %vm333_vm1, %v8384_v22  ;;  %v2887_v22 = vld [vmem:[#allocation2 + $0xa4] sm:$0x3f] }
 0x18e   : > { %7517 = vmatprep.mubr.msk.f32.mxu1 %vm333_vm1, %v2603_v8  ;;  %7570 = vmatprep.mubr.msk.f32.mxu0 %vm333_vm1, %v8386_v23  ;;  %v2608_v23 = vld [vmem:[#allocation2 + $0x43] sm:$0xff] }
 0x18f   : > { %7577 = vmatpush3.msra.mxu1 %v3257_v27 }
 0x191   : > { %7518 = vmatmul.mubr.msk.f32.gmra.mxu1 %vm333_vm1, %v2604_v9  ;;  %7571 = vmatmul.mubr.msk.f32.gmra.mxu0 %vm333_vm1, %v8394_v26  ;;  %v2610_v26 = vld [vmem:[#allocation2 + $0x53] sm:$0xff] }
 0x192   : > { %7520 = vmatprep.mubr.msk.f32.mxu1 %vm333_vm1, %v2605_v16  ;;  %7573 = vmatprep.mubr.msk.f32.mxu0 %vm333_vm1, %v2886_v17 }
 0x195   : > { %7521 = vmatmul.mubr.msk.f32.gmra.mxu1 %vm333_vm1, %v2606_v45  ;;  %7574 = vmatmul.mubr.msk.f32.gmra.mxu0 %vm333_vm1, %v2887_v22 }
 0x196   : > { %7523 = vmatprep.mubr.msk.f32.mxu1 %vm333_vm1, %v2607_v37 }
 0x199   : > { %7524 = vmatmul.mubr.msk.f32.gmra.mxu1 %vm333_vm1, %v2608_v23 }
 0x19a   : > { %7526 = vmatprep.mubr.msk.f32.mxu1 %vm333_vm1, %v2609_v46 }
 0x19d   : > { %7527 = vmatmul.mubr.msk.f32.gmra.mxu1 %vm333_vm1, %v2610_v26 }
 0x19e   : > { %7529 = vmatprep.mubr.msk.f32.mxu1 %vm333_vm1, %v2611_v49 }
 0x1a1   : > { %7530 = vmatmul.mubr.msk.f32.gmra.mxu1 %vm333_vm1, %v2612_v31 }
 0x1a2   : > { %7532 = vmatprep.mubr.msk.f32.mxu1 %vm333_vm1, %v2613_v50 }
 0x1a5   : > { %7533 = vmatmul.mubr.msk.f32.gmra.mxu1 %vm333_vm1, %v2614_v51 }
 0x1a6   : > { %7535 = vmatprep.mubr.msk.f32.mxu1 %vm333_vm1, %v2615_v52 }
 0x1a9   : > { %7536 = vmatmul.mubr.msk.f32.gmra.mxu1 %vm333_vm1, %v2616_v53 }
 0x1aa   : > { %7538 = vmatprep.mubr.msk.f32.mxu1 %vm333_vm1, %v2617_v55 }
 0x1ad   : > { %v8584_v57 = vpop.f32.mrf.mxu0  ;;  %7539 = vmatmul.mubr.msk.f32.gmra.mxu1 %vm333_vm1, %v2618_v56 }
 0x1ae   : > { %7541 = vmatprep.mubr.msk.f32.mxu1 %vm333_vm1, %v2619_v60  ;;  %v980_v21 = vadd.f32 %v8584_v57, %v8693_v44 }
 0x1af   : > { %v8588_v54 = vpop.f32.mrf.mxu0 }
 0x1b1   : > { %v8590_v62 = vpop.f32.mrf.mxu0  ;;  %7542 = vmatmul.mubr.msk.f32.gmra.mxu1 %vm333_vm1, %v2620_v61  ;;  %vm357_vm1 = vcmask 130048  }
 0x1b2   : > { %360 = vst.msk [vmem:[#allocation3 + $0x10] sm:$0xff] %vm357_vm1, %v9914_v3  ;;  %358 = vst.msk [vmem:[#allocation3] sm:$0xff] %vm357_vm1, %v9914_v3  ;;  %v982_v59 = vadd.f32 %v8590_v62, %v8693_v44 }
 0x1b3   : > { %v8593_v42 = vpop.f32.mrf.mxu0  ;;  %359 = vst.msk [vmem:[#allocation3 + $0x8] sm:$0xff] %vm357_vm1, %v9914_v3  ;;  %361 = vst.msk [vmem:[#allocation3 + $0x18] sm:$0xff] %vm357_vm1, %v9914_v3 }
 0x1b4   : > { %362 = vst.msk [vmem:[#allocation3 + $0x20] sm:$0xff] %vm357_vm1, %v9914_v3  ;;  %363 = vst.msk [vmem:[#allocation3 + $0x28] sm:$0xff] %vm357_vm1, %v9914_v3 }
 0x1b5   : > { %v8595_v0 = vpop.f32.mrf.mxu0  ;;  %364 = vst.msk [vmem:[#allocation3 + $0x30] sm:$0xff] %vm357_vm1, %v9914_v3  ;;  %365 = vst.msk [vmem:[#allocation3 + $0x38] sm:$0xff] %vm357_vm1, %v9914_v3 }
 0x1b6   : > { %366 = vst.msk [vmem:[#allocation3 + $0x40] sm:$0xff] %vm357_vm1, %v9914_v3  ;;  %367 = vst.msk [vmem:[#allocation3 + $0x48] sm:$0xff] %vm357_vm1, %v9914_v3  ;;  %v984_v37 = vadd.f32 %v8595_v0, %v8693_v44 }
 0x1b7   : > { %v8597_v1 = vpop.f32.mrf.mxu0  ;;  %368 = vst.msk [vmem:[#allocation3 + $0x50] sm:$0xff] %vm357_vm1, %v9914_v3  ;;  %369 = vst.msk [vmem:[#allocation3 + $0x58] sm:$0xff] %vm357_vm1, %v9914_v3 }
 0x1b8   : > { %370 = vst.msk [vmem:[#allocation3 + $0x60] sm:$0xff] %vm357_vm1, %v9914_v3  ;;  %371 = vst.msk [vmem:[#allocation3 + $0x68] sm:$0xff] %vm357_vm1, %v9914_v3 }
 0x1b9   : > { %v8599_v2 = vpop.f32.mrf.mxu1  ;;  %v7356_v4 = vpop.f32.mrf.mxu0  ;;  %372 = vst.msk [vmem:[#allocation3 + $0x70] sm:$0xff] %vm357_vm1, %v9914_v3  ;;  %373 = vst.msk [vmem:[#allocation3 + $0x78] sm:$0xff] %vm357_vm1, %v9914_v3 }
 0x1ba   : > { %374 = vst.msk [vmem:[#allocation3 + $0x80] sm:$0xff] %vm357_vm1, %v9914_v3  ;;  %375 = vst.msk [vmem:[#allocation3 + $0x88] sm:$0xff] %vm357_vm1, %v9914_v3  ;;  %v986_v51 = vadd.f32 %v8599_v2, %v8693_v44 }
 0x1bb   : > { %v8601_v5 = vpop.f32.mrf.mxu1  ;;  %v8603_v6 = vpop.f32.mrf.mxu0  ;;  %376 = vst.msk [vmem:[#allocation3 + $0x90] sm:$0xff] %vm357_vm1, %v9914_v3  ;;  %377 = vst.msk [vmem:[#allocation3 + $0x98] sm:$0xff] %vm357_vm1, %v9914_v3 }
 0x1bc   : > { %378 = vst.msk [vmem:[#allocation3 + $0xa0] sm:$0xff] %vm357_vm1, %v9914_v3 }
 0x1bd   : > { %v8605_v7 = vpop.f32.mrf.mxu1  ;;  %v8607_v12 = vpop.f32.mrf.mxu0 }
 0x1be   : > { %v988_v61 = vadd.f32 %v8605_v7, %v8693_v44 }
 0x1bf   : > { %v8609_v13 = vpop.f32.mrf.mxu1  ;;  %v8611_v14 = vpop.f32.mrf.mxu0 }
 0x1c1   : > { %v8613_v15 = vpop.f32.mrf.mxu1  ;;  %v8615_v32 = vpop.f32.mrf.mxu0 }
 0x1c2   : > { %v990_v27 = vadd.f32 %v8613_v15, %v8693_v44 }
 0x1c3   : > { %v8617_v18 = vpop.f32.mrf.mxu1  ;;  %v8619_v19 = vpop.f32.mrf.mxu0 }
 0x1c5   : > { %v8621_v24 = vpop.f32.mrf.mxu1  ;;  %v8623_v25 = vpop.f32.mrf.mxu0 }
 0x1c7   : > { %v8628_v28 = vpop.f32.mrf.mxu1  ;;  %v8630_v29 = vpop.f32.mrf.mxu0 }
 0x1c9   : > { %v8632_v35 = vpop.f32.mrf.mxu1  ;;  %v8634_v36 = vpop.f32.mrf.mxu0 }
 0x1cb   : > { %v8636_v39 = vpop.f32.mrf.mxu1  ;;  %v8638_v40 = vpop.f32.mrf.mxu0 }
 0x1cd   : > { %v8640_v30 = vpop.f32.mrf.mxu1  ;;  %v8642_v41 = vpop.f32.mrf.mxu0 }
 0x1cf   : > { %v8686_v43 = vpop.f32.mrf.mxu1  ;;  %v8688_v38 = vpop.f32.mrf.mxu0 }
 0x1d1   : > { %v8695_v63 = vpop.f32.mrf.mxu1  ;;  %v7374_v10 = vpop.f32.mrf.mxu0 }
 0x1d3   : > { %v8697_v11 = vpop.f32.mrf.mxu1  ;;  %v8699_v20 = vpop.f32.mrf.mxu0 }
 0x1d4   : > { %9917 = vst [vmem:[#allocation4_spill] sm:$0xff] %v8699_v20 }
 0x1d5   : > { %v7324_v33 = vpop.f32.mrf.mxu1  ;;  %v7377_v34 = vpop.f32.mrf.mxu0 }
 0x1d6   : > { %v1247_v47 = vadd.f32 %v7324_v33, %v980_v21 }
 0x1d7   : > { %v8703_v48 = vpop.f32.mrf.mxu1  ;;  %v8705_v58 = vpop.f32.mrf.mxu0 }
 0x1d8   : > { %9918 = vst [vmem:[#allocation5_spill] sm:$0xff] %v8705_v58  ;;  %v8709_v8 = vadd.f32 %v7356_v4, %v1247_v47 }
 0x1d9   : > { %v7327_v9 = vpop.f32.mrf.mxu1  ;;  %v7380_v16 = vpop.f32.mrf.mxu0 }
 0x1da   : > { %v1249_v17 = vadd.f32 %v7327_v9, %v982_v59  ;;  %v992_v9 = vadd.f32 %v8621_v24, %v8693_v44 }
 0x1db   : > { %v8711_v45 = vpop.f32.mrf.mxu1  ;;  %v8713_v22 = vpop.f32.mrf.mxu0 }
 0x1dc   : > { %9919 = vst [vmem:[#allocation6_spill] sm:$0xff] %v8713_v22  ;;  %v8718_v23 = vadd.f32 %v8607_v12, %v1249_v17 }
 0x1dd   : > { %v7330_v46 = vpop.f32.mrf.mxu1  ;;  %v7383_v26 = vpop.f32.mrf.mxu0 }
 0x1de   : > { %v1251_v49 = vadd.f32 %v7330_v46, %v984_v37 }
 0x1df   : > { %v8720_v31 = vpop.f32.mrf.mxu1  ;;  %v8722_v50 = vpop.f32.mrf.mxu0 }
 0x1e0   : > { %9920 = vst [vmem:[#allocation7_spill] sm:$0xff] %v8722_v50  ;;  %v8727_v52 = vadd.f32 %v8615_v32, %v1251_v49 }
 0x1e1   : > { %v7333_v53 = vpop.f32.mrf.mxu1  ;;  %v7420_v55 = vpop.f32.mrf.mxu0 }
 0x1e2   : > { %v1253_v56 = vadd.f32 %v7333_v53, %v986_v51  ;;  %v3256_v51 = vld [vmem:[%s9909_s5] sm:$0xff]  ;;  %v994_v53 = vadd.f32 %v8632_v35, %v8693_v44 }
 0x1e3   : > { %v8729_v57 = vpop.f32.mrf.mxu1  ;;  %v8731_v60 = vpop.f32.mrf.mxu0  ;;  %7578 = vmatprep.subr.mxu1 %v3256_v51 }
 0x1e4   : > { %v8736_v62 = vadd.f32 %v8623_v25, %v1253_v56  ;;  %7579 = vmatpush3.msra.mxu1 %v3256_v51 }
 0x1e5   : > { %v7336_v0 = vpop.f32.mrf.mxu1  ;;  %v7423_v4 = vpop.f32.mrf.mxu0 }
 0x1e6   : > { %v1255_v12 = vadd.f32 %v7336_v0, %v988_v61 }
 0x1e7   : > { %v8738_v2 = vpop.f32.mrf.mxu1  ;;  %v8740_v32 = vpop.f32.mrf.mxu0 }
 0x1e8   : > { %v8745_v21 = vadd.f32 %v8634_v36, %v1255_v12 }
 0x1e9   : > { %v7339_v33 = vpop.f32.mrf.mxu1  ;;  %v8747_v47 = vpop.f32.mrf.mxu0 }
 0x1ea   : > { %v1257_v7 = vadd.f32 %v7339_v33, %v990_v27  ;;  %v996_v27 = vadd.f32 %v8640_v30, %v8693_v44 }
 0x1eb   : > { %v8749_v59 = vpop.f32.mrf.mxu1  ;;  %v8751_v25 = vpop.f32.mrf.mxu0 }
 0x1ec   : > { %v8756_v17 = vadd.f32 %v8642_v41, %v1257_v7 }
 0x1ed   : > { %v7342_v37 = vpop.f32.mrf.mxu1  ;;  %v7429_v46 = vpop.f32.mrf.mxu0 }
 0x1ee   : > { %v1259_v15 = vadd.f32 %v7342_v37, %v992_v9 }
 0x1ef   : > { %v8758_v49 = vpop.f32.mrf.mxu1  ;;  %v8760_v36 = vpop.f32.mrf.mxu0 }
 0x1f0   : > { %v8767_v56 = vadd.f32 %v7374_v10, %v1259_v15  ;;  %v998_v15 = vadd.f32 %v8695_v63, %v8693_v44  ;;  %v6557_v63 = vld [vmem:[%s9909_s5 + $0x18] sm:$0xff] }
 0x1f1   : > { %v7345_v24 = vpop.f32.mrf.mxu1  ;;  %v7432_v41 = vpop.f32.mrf.mxu0  ;;  %7610 = vmatprep.subr.mxu0 %v6557_v63 }
 0x1f2   : > { %v1261_v61 = vadd.f32 %v7345_v24, %v994_v53  ;;  %7611 = vmatpush3.msra.mxu0 %v6557_v63 }
 0x1f3   : > { %v8769_v0 = vpop.f32.mrf.mxu1  ;;  %v8771_v12 = vpop.f32.mrf.mxu0 }
 0x1f4   : > { %9921 = vst [vmem:[#allocation8_spill] sm:$0xff] %v8771_v12  ;;  %v8775_v33 = vadd.f32 %v7377_v34, %v1261_v61 }
 0x1f5   : > { %v7348_v7 = vpop.f32.mrf.mxu1  ;;  %v7435_v9 = vpop.f32.mrf.mxu0 }
 0x1f6   : > { %v1263_v37 = vadd.f32 %v7348_v7, %v996_v27 }
 0x1f7   : > { %v8777_v35 = vpop.f32.mrf.mxu1  ;;  %v8779_v10 = vpop.f32.mrf.mxu0 }
 0x1f8   : > { %9922 = vst [vmem:[#allocation9_spill] sm:$0xff] %v8779_v10  ;;  %v8783_v51 = vadd.f32 %v7380_v16, %v1263_v37 }
 0x1f9   : > { %v7351_v53 = vpop.f32.mrf.mxu1  ;;  %v7438_v24 = vpop.f32.mrf.mxu0 }
 0x1fa   : > { %v1265_v3 = vadd.f32 %v7351_v53, %v998_v15 }
 0x1fb   : > { %v8785_v12 = vpop.f32.mrf.mxu1  ;;  %v8787_v30 = vpop.f32.mrf.mxu0 }
 0x1fc   : > { %9923 = vst [vmem:[#allocation10_spill] sm:$0xff] %v8785_v12  ;;  %9924 = vst [vmem:[#allocation11_spill] sm:$0xff] %v8787_v30  ;;  %v8789_v34 = vadd.f32 %v7383_v26, %v1265_v3 }
 0x1fd   : > { %v7388_v61 = vpop.f32.mrf.mxu1  ;;  %v7441_v27 = vpop.f32.mrf.mxu0 }
 0x1fe   : > { %v1781_v7 = vadd.f32 %v7388_v61, %v8709_v8  ;;  %v6556_v8 = vld [vmem:[%s9909_s5 + $0x10] sm:$0xff] }
 0x1ff   : > { %v8792_v50 = vpop.f32.mrf.mxu1  ;;  %v8794_v10 = vpop.f32.mrf.mxu0  ;;  %7612 = vmatprep.subr.mxu0 %v6556_v8 }
 0x200   : > { %9925 = vst [vmem:[#allocation12_spill] sm:$0xff] %v8794_v10  ;;  %v8799_v16 = vadd.f32 %v7420_v55, %v1781_v7  ;;  %7613 = vmatpush3.msra.mxu0 %v6556_v8  ;;  %v8814_v55 = vld [vmem:[%s9909_s5 + $0x28] sm:$0xff] }
 0x201   : > { %v7391_v37 = vpop.f32.mrf.mxu1  ;;  %v7444_v15 = vpop.f32.mrf.mxu0  ;;  %9927 = vst [vmem:[#allocation14_spill] sm:$0xff] %v8814_v55  ;;  %7644 = vmatprep.subr.mxu1 %v8814_v55 }
 0x202   : > { %v1783_v3 = vadd.f32 %v7391_v37, %v8718_v23  ;;  %v9928_v37 = vmov 0.0  }
 0x203   : > { %v8805_v26 = vpop.f32.mrf.mxu1  ;;  %v8807_v53 = vpop.f32.mrf.mxu0  ;;  %380 = vst.msk [vmem:[#allocation3 + $0xa8] sm:$0x3f] %vm379_vm3, %v9928_v37 }
 0x204   : > { %9926 = vst [vmem:[#allocation13_spill] sm:$0xff] %v8807_v53  ;;  %v8809_v61 = vadd.f32 %v7423_v4, %v1783_v3 }
 0x205   : > { %v7394_v7 = vpop.f32.mrf.mxu1  ;;  %v7447_v63 = vpop.f32.mrf.mxu0 }
 0x206   : > { %v1785_v23 = vadd.f32 %v7394_v7, %v8727_v52 }
 0x207   : > { %v8820_v53 = vpop.f32.mrf.mxu1  ;;  %v8822_v4 = vpop.f32.mrf.mxu0 }
 0x208   : > { %9929 = vst [vmem:[#allocation15_spill] sm:$0xff] %v8822_v4  ;;  %v8825_v3 = vadd.f32 %v8747_v47, %v1785_v23 }
 0x209   : > { %v7397_v8 = vpop.f32.mrf.mxu1  ;;  %v8827_v10 = vpop.f32.mrf.mxu0 }
 0x20a   : > { %v1787_v30 = vadd.f32 %v7397_v8, %v8736_v62 }
 0x20b   : > { %v8830_v22 = vpop.f32.mrf.mxu1  ;;  %v8832_v55 = vpop.f32.mrf.mxu0 }
 0x20c   : > { %v8834_v52 = vadd.f32 %v7429_v46, %v1787_v30  ;;  %v8855_v30 = vld [vmem:[%s9909_s5 + $0x38] sm:$0xff] }
 0x20d   : > { %v7400_v7 = vpop.f32.mrf.mxu1  ;;  %v8836_v37 = vpop.f32.mrf.mxu0  ;;  %9934 = vst [vmem:[#allocation20_spill] sm:$0xff] %v8855_v30  ;;  %7678 = vmatprep.subr.mxu0 %v8855_v30 }
 0x20e   : > { %v1789_v58 = vadd.f32 %v7400_v7, %v8745_v21 }
 0x20f   : > { %v8839_v4 = vpop.f32.mrf.mxu1  ;;  %v8841_v47 = vpop.f32.mrf.mxu0 }
 0x210   : > { %9930 = vst [vmem:[#allocation16_spill] sm:$0xff] %v8839_v4  ;;  %v8843_v23 = vadd.f32 %v7432_v41, %v1789_v58 }
 0x211   : > { %v7403_v20 = vpop.f32.mrf.mxu1  ;;  %v8845_v12 = vpop.f32.mrf.mxu0 }
 0x212   : > { %9931 = vst [vmem:[#allocation17_spill] sm:$0xff] %v8843_v23  ;;  %v1791_v62 = vadd.f32 %v7403_v20, %v8756_v17 }
 0x213   : > { %v8848_v8 = vpop.f32.mrf.mxu1  ;;  %v8850_v46 = vpop.f32.mrf.mxu0 }
 0x214   : > { %9932 = vst [vmem:[#allocation18_spill] sm:$0xff] %v8848_v8  ;;  %9933 = vst [vmem:[#allocation19_spill] sm:$0xff] %v8850_v46  ;;  %v8857_v21 = vadd.f32 %v7435_v9, %v1791_v62 }
 0x215   : > { %v7406_v58 = vpop.f32.mrf.mxu1  ;;  %v8860_v41 = vpop.f32.mrf.mxu0 }
 0x216   : > { %9935 = vst [vmem:[#allocation21_spill] sm:$0xff] %v8857_v21  ;;  %9936 = vst [vmem:[#allocation22_spill] sm:$0xff] %v8860_v41  ;;  %v1793_v7 = vadd.f32 %v7406_v58, %v8767_v56 }
 0x217   : > { %v8863_v23 = vpop.f32.mrf.mxu1  ;;  %v8865_v20 = vpop.f32.mrf.mxu0 }
 0x218   : > { %9937 = vst [vmem:[#allocation23_spill] sm:$0xff] %v8863_v23  ;;  %9938 = vst [vmem:[#allocation24_spill] sm:$0xff] %v8865_v20  ;;  %v8867_v17 = vadd.f32 %v7438_v24, %v1793_v7 }
 0x219   : > { %v7409_v8 = vpop.f32.mrf.mxu1  ;;  %v8869_v46 = vpop.f32.mrf.mxu0 }
 0x21a   : > { %9939 = vst [vmem:[#allocation25_spill] sm:$0xff] %v8867_v17  ;;  %9940 = vst [vmem:[#allocation26_spill] sm:$0xff] %v8869_v46  ;;  %v1795_v4 = vadd.f32 %v7409_v8, %v8775_v33 }
 0x21b   : > { %v8872_v9 = vpop.f32.mrf.mxu1  ;;  %v8874_v62 = vpop.f32.mrf.mxu0 }
 0x21c   : > { %9941 = vst [vmem:[#allocation27_spill] sm:$0xff] %v8872_v9  ;;  %9942 = vst [vmem:[#allocation28_spill] sm:$0xff] %v8874_v62  ;;  %v8876_v30 = vadd.f32 %v7441_v27, %v1795_v4 }
 0x21d   : > { %v7412_v21 = vpop.f32.mrf.mxu1  ;;  %v8878_v41 = vpop.f32.mrf.mxu0 }
 0x21e   : > { %9943 = vst [vmem:[#allocation29_spill] sm:$0xff] %v8876_v30  ;;  %9944 = vst [vmem:[#allocation30_spill] sm:$0xff] %v8878_v41  ;;  %v1797_v56 = vadd.f32 %v7412_v21, %v8783_v51 }
 0x21f   : > { %v8881_v58 = vpop.f32.mrf.mxu1  ;;  %v8883_v24 = vpop.f32.mrf.mxu0 }
 0x220   : > { %9945 = vst [vmem:[#allocation31_spill] sm:$0xff] %v8881_v58  ;;  %9946 = vst [vmem:[#allocation32_spill] sm:$0xff] %v8883_v24  ;;  %v8885_v7 = vadd.f32 %v7444_v15, %v1797_v56  ;;  %v979_v58 = vadd.f32 %v8693_v44, %v8588_v54  ;;  %v983_v54 = vadd.f32 %v8693_v44, %v8597_v1 }
 0x221   : > { %v7415_v17 = vpop.f32.mrf.mxu1  ;;  %v8887_v46 = vpop.f32.mrf.mxu0 }
 0x222   : > { %9947 = vst [vmem:[#allocation33_spill] sm:$0xff] %v8885_v7  ;;  %9948 = vst [vmem:[#allocation34_spill] sm:$0xff] %v8887_v46  ;;  %v1799_v33 = vadd.f32 %v7415_v17, %v8789_v34  ;;  %v1246_v23 = vadd.f32 %v8703_v48, %v979_v58  ;;  %v1250_v58 = vadd.f32 %v8720_v31, %v983_v54 }
 0x223   : > { %v8890_v8 = vpop.f32.mrf.mxu1  ;;  %v8892_v27 = vpop.f32.mrf.mxu0 }
 0x224   : > { %9949 = vst [vmem:[#allocation35_spill] sm:$0xff] %v8890_v8  ;;  %9950 = vst [vmem:[#allocation36_spill] sm:$0xff] %v8892_v27  ;;  %v8894_v4 = vadd.f32 %v7447_v63, %v1799_v33  ;;  %v1517_v31 = vadd.f32 %v8619_v19, %v1250_v58 }
 0x225   : > { %v7452_v30 = vpop.f32.mrf.mxu1  ;;  %v8896_v41 = vpop.f32.mrf.mxu0 }
 0x226   : > { %9951 = vst [vmem:[#allocation37_spill] sm:$0xff] %v8894_v4  ;;  %9952 = vst [vmem:[#allocation38_spill] sm:$0xff] %v8896_v41  ;;  %v2315_v1 = vadd.f32 %v7452_v30, %v8799_v16  ;;  %v991_v30 = vadd.f32 %v8693_v44, %v8628_v28  ;;  %v997_v28 = vadd.f32 %v8693_v44, %v8697_v11 }
 0x227   : > { %v2215_v51 = vpop.f32.mrf.mxu1  ;;  %v8898_v21 = vpop.f32.mrf.mxu0 }
 0x228   : > { %9953 = vst [vmem:[#allocation39_spill] sm:$0xff] %v8898_v21  ;;  %v2582_v19 = vadd.f32 %v8827_v10, %v2315_v1  ;;  %v995_v10 = vadd.f32 %v8693_v44, %v8686_v43 }
 0x229   : > { %v7455_v24 = vpop.f32.mrf.mxu1  ;;  %v8900_v15 = vpop.f32.mrf.mxu0 }
 0x22a   : > { %9954 = vst [vmem:[#allocation40_spill] sm:$0xff] %v8900_v15 }
 0x22b   : > { %v2225_v56 = vpop.f32.mrf.mxu1  ;;  %v8902_v7 = vpop.f32.mrf.mxu0 }
 0x22c   : > { %9955 = vst [vmem:[#allocation41_spill] sm:$0xff] %v8902_v7 }
 0x22d   : > { %v8904_v46 = vpop.f32.mrf.mxu1  ;;  %v8906_v34 = vpop.f32.mrf.mxu0 }
 0x22e   : > { %9956 = vst [vmem:[#allocation42_spill] sm:$0xff] %v8906_v34  ;;  %v2319_v58 = vadd.f32 %v8904_v46, %v8825_v3 }
 0x22f   : > { %v8908_v17 = vpop.f32.mrf.mxu1  ;;  %v8910_v63 = vpop.f32.mrf.mxu0 }
 0x230   : > { %9957 = vst [vmem:[#allocation43_spill] sm:$0xff] %v8910_v63 }
 0x231   : > { %v8912_v33 = vpop.f32.mrf.mxu1  ;;  %v7548_v4 = vpop.f32.mrf.mxu0 }
 0x233   : > { %v8914_v41 = vpop.f32.mrf.mxu1  ;;  %v8916_v21 = vpop.f32.mrf.mxu0 }
 0x235   : > { %v8918_v27 = vpop.f32.mrf.mxu1  ;;  %v8920_v15 = vpop.f32.mrf.mxu0 }
 0x236   : > { %9958 = vst [vmem:[#allocation44_spill] sm:$0xff] %v8918_v27 }
 0x237   : > { %v8922_v7 = vpop.f32.mrf.mxu1  ;;  %v8924_v62 = vpop.f32.mrf.mxu0 }
 0x238   : > { %9959 = vst [vmem:[#allocation45_spill] sm:$0xff] %v8922_v7  ;;  %9960 = vst [vmem:[#allocation46_spill] sm:$0xff] %v8924_v62  ;;  %v981_v7 = vadd.f32 %v8693_v44, %v8593_v42 }
 0x239   : > { %v8926_v34 = vpop.f32.mrf.mxu1  ;;  %v8928_v8 = vpop.f32.mrf.mxu0 }
 0x23a   : > { %9961 = vst [vmem:[#allocation47_spill] sm:$0xff] %v8926_v34  ;;  %9962 = vst [vmem:[#allocation48_spill] sm:$0xff] %v8928_v8  ;;  %v1513_v8 = vadd.f32 %v8603_v6, %v1246_v23 }
 0x23b   : > { %v8930_v63 = vpop.f32.mrf.mxu1  ;;  %v8934_v20 = vpop.f32.mrf.mxu0 }
 0x23c   : > { %9963 = vst [vmem:[#allocation49_spill] sm:$0xff] %v8930_v63  ;;  %9964 = vst [vmem:[#allocation50_spill] sm:$0xff] %v8934_v20  ;;  %v1248_v63 = vadd.f32 %v8711_v45, %v981_v7  ;;  %v1780_v48 = vadd.f32 %v8792_v50, %v1513_v8  ;;  %v985_v45 = vadd.f32 %v8693_v44, %v8601_v5 }
 0x23d   : > { %v8936_v9 = vpop.f32.mrf.mxu1  ;;  %v8943_v62 = vpop.f32.mrf.mxu0  ;;  %v987_v5 = vadd.f32 %v8693_v44, %v8609_v13 }
 0x23e   : > { %9965 = vst [vmem:[#allocation51_spill] sm:$0xff] %v8936_v9  ;;  %v1515_v9 = vadd.f32 %v8611_v14, %v1248_v63  ;;  %v2047_v23 = vadd.f32 %v8731_v60, %v1780_v48  ;;  %v1252_v50 = vadd.f32 %v8729_v57, %v985_v45  ;;  %v989_v63 = vadd.f32 %v8693_v44, %v8617_v18 }
 0x23f   : > { %v8939_v27 = vpop.f32.mrf.mxu1  ;;  %v2317_v60 = vadd.f32 %v7455_v24, %v8809_v61  ;;  %v993_v48 = vadd.f32 %v8693_v44, %v8636_v39 }
 0x240   : > { %9966 = vst [vmem:[#allocation52_spill] sm:$0xff] %v8939_v27  ;;  %v8955_v27 = vpop.f32.mrf.mxu0  ;;  %v1782_v6 = vadd.f32 %v8805_v26, %v1515_v9  ;;  %v2314_v14 = vadd.f32 %v2215_v51, %v2047_v23  ;;  %v1784_v26 = vadd.f32 %v8820_v53, %v1517_v31  ;;  %v1254_v9 = vadd.f32 %v8738_v2, %v987_v5  ;;  %v9968_v31 = vld [vmem:[#allocation16_spill] sm:$0xff] }
 0x241   : > { %v8945_v34 = vpop.f32.mrf.mxu1  ;;  %v1256_v13 = vadd.f32 %v8749_v59, %v989_v63  ;;  %v1519_v51 = vadd.f32 %v8630_v29, %v1252_v50  ;;  %v1260_v46 = vadd.f32 %v8769_v0, %v993_v48  ;;  %v2586_v23 = vadd.f32 %v8845_v12, %v2319_v58  ;;  %v9970_v63 = vld [vmem:[#allocation19_spill] sm:$0xff]  ;;  %v9973_v12 = vld [vmem:[#allocation5_spill] sm:$0xff] }
 0x242   : > { %v8969_v8 = vpop.f32.mrf.mxu0  ;;  %v2049_v57 = vadd.f32 %v8740_v32, %v1782_v6  ;;  %v2581_v32 = vadd.f32 %v8832_v55, %v2314_v14  ;;  %v2051_v29 = vadd.f32 %v8751_v25, %v1784_v26  ;;  %v1258_v55 = vadd.f32 %v8758_v49, %v991_v30  ;;  %v9969_v14 = vld [vmem:[#allocation4_spill] sm:$0xff]  ;;  %v9974_v30 = vld [vmem:[#allocation6_spill] sm:$0xff]  ;;  %v9976_v48 = vld [vmem:[#allocation17_spill] sm:$0xff] }
 0x243   : > { %v8951_v20 = vpop.f32.mrf.mxu1  ;;  %v1786_v2 = vadd.f32 %v8830_v22, %v1519_v51  ;;  %v1521_v6 = vadd.f32 %v8638_v40, %v1254_v9  ;;  %v1523_v43 = vadd.f32 %v8688_v38, %v1256_v13  ;;  %v2321_v40 = vadd.f32 %v8912_v33, %v8834_v52  ;;  %v9971_v33 = vld [vmem:[#allocation46_spill] sm:$0xff]  ;;  %v9981_v58 = vld [vmem:[#allocation7_spill] sm:$0xff] }
 0x244   : > { %v8988_v18 = vpop.f32.mrf.mxu0  ;;  %v2316_v61 = vadd.f32 %v2225_v56, %v2049_v57  ;;  %v2584_v56 = vadd.f32 %v8836_v37, %v2317_v60  ;;  %v2318_v44 = vadd.f32 %v8908_v17, %v2051_v29  ;;  %v1262_v37 = vadd.f32 %v8777_v35, %v995_v10  ;;  %v9972_v60 = vld [vmem:[#allocation18_spill] sm:$0xff]  ;;  %v9980_v29 = vld [vmem:[#allocation27_spill] sm:$0xff] }
 0x245   : > { %v8957_v42 = vpop.f32.mrf.mxu1  ;;  %v2053_v38 = vadd.f32 %v8760_v36, %v1786_v2  ;;  %v1525_v0 = vadd.f32 %v9969_v14, %v1258_v55  ;;  %v1790_v57 = vadd.f32 %v9972_v60, %v1523_v43  ;;  %v9975_v51 = vld [vmem:[#allocation22_spill] sm:$0xff]  ;;  %v9990_v14 = vld [vmem:[#allocation21_spill] sm:$0xff]  ;;  %v9994_v60 = vld [vmem:[#allocation12_spill] sm:$0xff] }
 0x246   : > { %v9006_v11 = vpop.f32.mrf.mxu0  ;;  %v2583_v3 = vadd.f32 %v8841_v47, %v2316_v61  ;;  %v1788_v47 = vadd.f32 %v9968_v31, %v1521_v6  ;;  %v2585_v52 = vadd.f32 %v9970_v63, %v2318_v44  ;;  %v1529_v9 = vadd.f32 %v9974_v30, %v1262_v37  ;;  %v9977_v61 = vld [vmem:[#allocation44_spill] sm:$0xff]  ;;  %v9983_v43 = vld [vmem:[#allocation50_spill] sm:$0xff]  ;;  %v9986_v37 = vld [vmem:[#allocation35_spill] sm:$0xff] }
 0x247   : > { %v8962_v7 = vpop.f32.mrf.mxu1  ;;  %v2320_v36 = vadd.f32 %v8914_v41, %v2053_v38  ;;  %v9987_v38 = vld [vmem:[#allocation45_spill] sm:$0xff]  ;;  %v9989_v31 = vld [vmem:[#allocation26_spill] sm:$0xff] }
 0x248   : > { %v9020_v5 = vpop.f32.mrf.mxu0  ;;  %v9992_v63 = vld [vmem:[#allocation49_spill] sm:$0xff] }
 0x249   : > { %v8971_v54 = vpop.f32.mrf.mxu1  ;;  %v9995_v30 = vld [vmem:[#allocation25_spill] sm:$0xff] }
 0x24a   : > { %v9036_v55 = vpop.f32.mrf.mxu0 }
 0x24b   : > { %v8978_v16 = vpop.f32.mrf.mxu1 }
 0x24d   : > { %v7516_v53 = vpop.f32.mrf.mxu1 }
 0x24e   : > { %v2849_v24 = vadd.f32 %v7516_v53, %v2582_v19  ;;  %v1527_v19 = vadd.f32 %v9973_v12, %v1260_v46  ;;  %v2588_v53 = vadd.f32 %v9975_v51, %v2321_v40  ;;  %v9997_v51 = vld [vmem:[#allocation13_spill] sm:$0xff] }
 0x24f   : > { %v2749_v59 = vpop.f32.mrf.mxu1 }
 0x250   : > { %v3116_v45 = vadd.f32 %v7548_v4, %v2849_v24  ;;  %v2848_v39 = vadd.f32 %v2749_v59, %v2581_v32  ;;  %v2323_v24 = vadd.f32 %v9977_v61, %v9976_v48  ;;  %v9978_v32 = vld [vmem:[#allocation48_spill] sm:$0xff]  ;;  %v1794_v59 = vadd.f32 %v9980_v29, %v1527_v19  ;;  %v9998_v48 = vld [vmem:[#allocation15_spill] sm:$0xff] }
 0x251   : > { %v7519_v22 = vpop.f32.mrf.mxu1 }
 0x252   : > { %7970 = vtanh.f32 %v3116_v45  ;;  %v3115_v25 = vadd.f32 %v8916_v21, %v2848_v39  ;;  %v2851_v1 = vadd.f32 %v7519_v22, %v2584_v56  ;;  %v9967_v21 = vld [vmem:[#allocation10_spill] sm:$0xff]  ;;  %v9982_v39 = vld [vmem:[#allocation8_spill] sm:$0xff]  ;;  %v2061_v12 = vadd.f32 %v9994_v60, %v1794_v59 }
 0x253   : > { %v2759_v49 = vpop.f32.mrf.mxu1  ;;  %v1264_v50 = vadd.f32 %v9967_v21, %v997_v28  ;;  %v9979_v28 = vld [vmem:[#allocation23_spill] sm:$0xff]  ;;  %v2055_v56 = vadd.f32 %v9982_v39, %v1788_v47  ;;  %v2590_v47 = vadd.f32 %v9989_v31, %v2323_v24  ;;  %v9999_v24 = vld [vmem:[#allocation28_spill] sm:$0xff] }
 0x254   : > { %7972 = vtanh.f32 %v3115_v25  ;;  %v3118_v4 = vadd.f32 %v8920_v15, %v2851_v1  ;;  %v2850_v17 = vadd.f32 %v2759_v49, %v2583_v3  ;;  %v1792_v2 = vadd.f32 %v9979_v28, %v1525_v0  ;;  %v9984_v25 = vld [vmem:[#allocation24_spill] sm:$0xff]  ;;  %v9985_v3 = vld [vmem:[#allocation31_spill] sm:$0xff] }
 0x255   : > { %v7522_v35 = vpop.f32.mrf.mxu1  ;;  %v1531_v45 = vadd.f32 %v9981_v58, %v1264_v50  ;;  %v2587_v1 = vadd.f32 %v9984_v25, %v2320_v36  ;;  %v1796_v46 = vadd.f32 %v9985_v3, %v1529_v9  ;;  %v2322_v49 = vadd.f32 %v9987_v38, %v2055_v56  ;;  %v9991_v0 = vld [vmem:[#allocation47_spill] sm:$0xff] }
 0x256   : > { %7974 = vtanh.f32 %v3118_v4  ;;  %v3117_v26 = vadd.f32 %v9971_v33, %v2850_v17  ;;  %v2853_v15 = vadd.f32 %v7522_v35, %v2586_v23  ;;  %v9988_v4 = vld [vmem:[#allocation9_spill] sm:$0xff]  ;;  %v2325_v35 = vadd.f32 %v9991_v0, %v9990_v14  ;;  %v9993_v36 = vld [vmem:[#allocation11_spill] sm:$0xff] }
 0x257   : > { %v2769_v13 = vpop.f32.mrf.mxu1  ;;  %v1798_v40 = vadd.f32 %v9986_v37, %v1531_v45  ;;  %v2057_v17 = vadd.f32 %v9988_v4, %v1790_v57  ;;  %v2059_v33 = vadd.f32 %v9993_v36, %v1792_v2  ;;  %v9996_v9 = vld [vmem:[#allocation51_spill] sm:$0xff]  ;;  %v10001_v45 = vld [vmem:[#allocation30_spill] sm:$0xff] }
 0x258   : > { %7976 = vtanh.f32 %v3117_v26  ;;  %v3120_v10 = vadd.f32 %v9978_v32, %v2853_v15  ;;  %v2852_v41 = vadd.f32 %v2769_v13, %v2585_v52  ;;  %v9050_v26 = vpop.f32.mrf.mxu0  ;;  %v2327_v13 = vadd.f32 %v9996_v9, %v9995_v30  ;;  %v10008_v9 = vld [vmem:[#allocation39_spill] sm:$0xff] }
 0x259   : > { %v7525_v6 = vpop.f32.mrf.mxu1  ;;  %v2324_v52 = vadd.f32 %v9992_v63, %v2057_v17  ;;  %v9058_v61 = vadd.f32 %v9998_v48, %v1798_v40  ;;  %v2589_v32 = vadd.f32 %v9999_v24, %v2322_v49  ;;  %v2592_v39 = vadd.f32 %v10001_v45, %v2325_v35  ;;  %v10004_v40 = vld [vmem:[#allocation34_spill] sm:$0xff] }
 0x25a   : > { %7978 = vtanh.f32 %v3120_v10  ;;  %v3119_v44 = vadd.f32 %v9983_v43, %v2852_v41  ;;  %v2855_v22 = vadd.f32 %v7525_v6, %v2588_v53  ;;  %v2063_v53 = vadd.f32 %v9997_v51, %v1796_v46  ;;  %v9063_v59 = vpop.f32.mrf.mxu0  ;;  %v10002_v6 = vld [vmem:[#allocation32_spill] sm:$0xff] }
 0x25b   : > { %v2779_v23 = vpop.f32.mrf.mxu1  ;;  %v2591_v43 = vadd.f32 %v10002_v6, %v2324_v52  ;;  %v2594_v38 = vadd.f32 %v10004_v40, %v2327_v13  ;;  %v10006_v52 = vld [vmem:[#allocation33_spill] sm:$0xff] }
 0x25c   : > { %7980 = vtanh.f32 %v3119_v44  ;;  %v3122_v21 = vadd.f32 %v8943_v62, %v2855_v22  ;;  %v2854_v50 = vadd.f32 %v2779_v23, %v2587_v1  ;;  %v10003_v1 = vld [vmem:[#allocation29_spill] sm:$0xff]  ;;  %v2331_v36 = vadd.f32 %v8957_v42, %v10006_v52 }
 0x25d   : > { %v7528_v15 = vpop.f32.mrf.mxu1  ;;  %v2329_v3 = vadd.f32 %v8945_v34, %v10003_v1  ;;  %v9131_v52 = vld [vmem:[%s9909_s5 + $0x48] sm:$0xff] }
 0x25e   : > { %7982 = vtanh.f32 %v3122_v21  ;;  %v3121_v57 = vadd.f32 %v8955_v27, %v2854_v50  ;;  %v2857_v19 = vadd.f32 %v7528_v15, %v2590_v47  ;;  %v10000_v27 = vld [vmem:[#allocation52_spill] sm:$0xff]  ;;  %v2328_v21 = vadd.f32 %v8951_v20, %v2061_v12  ;;  %v9074_v50 = vpop.f32.mrf.mxu0  ;;  %v10007_v15 = vld [vmem:[#allocation38_spill] sm:$0xff] }
 0x25f   : > { %v7971_v62 = vpop.eup %7970  ;;  %v2789_v10 = vpop.f32.mrf.mxu1  ;;  %v2326_v29 = vadd.f32 %v10000_v27, %v2059_v33  ;;  %v2596_v60 = vadd.f32 %v10007_v15, %v2329_v3 }
 0x260   : > { %vm3156_vm10 = vcmp.ge.f32.partialorder %v7971_v62, 0.0  ;;  %v3176_v41 = vmul.f32 0.01, %v7971_v62  ;;  %7984 = vtanh.f32 %v3121_v57  ;;  %v3124_v28 = vadd.f32 %v8969_v8, %v2857_v19 }
 0x261   : > { %v7973_v2 = vpop.eup %7972  ;;  %v2856_v58 = vadd.f32 %v2789_v10, %v2589_v32  ;;  %v7531_v56 = vpop.f32.mrf.mxu1  ;;  %v2330_v19 = vadd.f32 %v8962_v7, %v2063_v53  ;;  %v2595_v13 = vadd.f32 %v10008_v9, %v2328_v21  ;;  %v10009_v10 = vld [vmem:[#allocation37_spill] sm:$0xff] }
 0x262   : > { %v3196_v44 = vsel %vm3156_vm10, %v7971_v62, %v3176_v41  ;;  %vm3155_vm11 = vcmp.ge.f32.partialorder %v7973_v2, 0.0  ;;  %v3175_v22 = vmul.f32 0.01, %v7973_v2  ;;  %7986 = vtanh.f32 %v3124_v28  ;;  %v9084_v62 = vpop.f32.mrf.mxu0  ;;  %v10010_v28 = vld [vmem:[#allocation40_spill] sm:$0xff] }
 0x263   : > { %v7975_v25 = vpop.eup %7974  ;;  %3216 = vst.msk [vmem:[#allocation3 + $0x10] sm:$0xff] %vm357_vm1, %v3196_v44  ;;  %v3123_v8 = vadd.f32 %v8988_v18, %v2856_v58  ;;  %v2859_v46 = vadd.f32 %v7531_v56, %v2592_v39  ;;  %v2799_v37 = vpop.f32.mrf.mxu1  ;;  %v10005_v18 = vld [vmem:[#allocation36_spill] sm:$0xff]  ;;  %v2333_v41 = vadd.f32 %v8971_v54, %v10009_v10  ;;  %v2332_v54 = vadd.f32 %v8978_v16, %v9058_v61  ;;  %v6600_v16 = vld [vmem:[%s9909_s5 + $0x30] sm:$0xff] }
 0x264   : > { %v3195_v49 = vsel %vm3155_vm11, %v7973_v2, %v3175_v22  ;;  %vm3158_vm12 = vcmp.ge.f32.partialorder %v7975_v25, 0.0  ;;  %v3178_v4 = vmul.f32 0.01, %v7975_v25  ;;  %v2858_v17 = vadd.f32 %v2799_v37, %v2591_v43  ;;  %v3096_v6 = vpop.f32.mrf.mxu0  ;;  %v10012_v37 = vld [vmem:[#allocation14_spill] sm:$0xff] }
 0x265   : > { %v7977_v23 = vpop.eup %7976  ;;  %3215 = vst.msk [vmem:[#allocation3 + $0x8] sm:$0xff] %vm357_vm1, %v3195_v49  ;;  %7988 = vtanh.f32 %v3123_v8  ;;  %v3126_v34 = vadd.f32 %v9006_v11, %v2859_v46  ;;  %v7534_v31 = vpop.f32.mrf.mxu1  ;;  %v2593_v47 = vadd.f32 %v10005_v18, %v2326_v29 }
 0x266   : > { %v3198_v14 = vsel %vm3158_vm12, %v7975_v25, %v3178_v4  ;;  %vm3157_vm13 = vcmp.ge.f32.partialorder %v7977_v23, 0.0  ;;  %v3177_v0 = vmul.f32 0.01, %v7977_v23  ;;  %v3125_v35 = vadd.f32 %v9020_v5, %v2858_v17  ;;  %v6578_v25 = vld [vmem:[%s9909_s5 + $0x20] sm:$0xff] }
 0x267   : > { %v7979_v63 = vpop.eup %7978  ;;  %3218 = vst.msk [vmem:[#allocation3 + $0x20] sm:$0xff] %vm357_vm1, %v3198_v14  ;;  %7990 = vtanh.f32 %v3126_v34  ;;  %v2861_v20 = vadd.f32 %v7534_v31, %v2594_v38  ;;  %v2809_v33 = vpop.f32.mrf.mxu1  ;;  %v10013_v38 = vld [vmem:[#allocation42_spill] sm:$0xff]  ;;  %v10014_v4 = vld [vmem:[#allocation20_spill] sm:$0xff] }
 0x268   : > { %v3197_v11 = vsel %vm3157_vm13, %v7977_v23, %v3177_v0  ;;  %vm3160_vm14 = vcmp.ge.f32.partialorder %v7979_v63, 0.0  ;;  %v3180_v12 = vmul.f32 0.01, %v7979_v63  ;;  %7992 = vtanh.f32 %v3125_v35  ;;  %v10015_v35 = vld [vmem:[#allocation43_spill] sm:$0xff] }
 0x269   : > { %v7981_v57 = vpop.eup %7980  ;;  %3217 = vst.msk [vmem:[#allocation3 + $0x18] sm:$0xff] %vm357_vm1, %v3197_v11  ;;  %v3128_v42 = vadd.f32 %v9036_v55, %v2861_v20  ;;  %v2860_v5 = vadd.f32 %v2809_v33, %v2593_v47  ;;  %v7537_v30 = vpop.f32.mrf.mxu1  ;;  %v2598_v55 = vadd.f32 %v10010_v28, %v2331_v36  ;;  %v2600_v49 = vadd.f32 %v10013_v38, %v2333_v41  ;;  %v9136_v36 = vld [vmem:[%s9909_s5 + $0x58] sm:$0xff] }
 0x26a   : > { %v3200_v51 = vsel %vm3160_vm14, %v7979_v63, %v3180_v12  ;;  %vm3159_vm15 = vcmp.ge.f32.partialorder %v7981_v57, 0.0  ;;  %v3179_v48 = vmul.f32 0.01, %v7981_v57  ;;  %v2863_v24 = vadd.f32 %v7537_v30, %v2596_v60 }
 0x26b   : > { %v7983_v32 = vpop.eup %7982  ;;  %3220 = vst.msk [vmem:[#allocation3 + $0x30] sm:$0xff] %vm357_vm1, %v3200_v51  ;;  %7994 = vtanh.f32 %v3128_v42  ;;  %v3127_v7 = vadd.f32 %v9050_v26, %v2860_v5  ;;  %v2819_v53 = vpop.f32.mrf.mxu1  ;;  %v2599_v63 = vadd.f32 %v10015_v35, %v2332_v54 }
 0x26c   : > { %v3199_v2 = vsel %vm3159_vm15, %v7981_v57, %v3179_v48  ;;  %vm3162_vm0 = vcmp.ge.f32.partialorder %v7983_v32, 0.0  ;;  %v3182_v27 = vmul.f32 0.01, %v7983_v32  ;;  %v3130_v29 = vadd.f32 %v9063_v59, %v2863_v24  ;;  %v3236_v58 = vld [vmem:[#allocation3 + $0x4] sm:$0xff]  ;;  %v9095_v39 = vld [vmem:[#allocation3 + $0xc] sm:$0xff]  ;;  %v10011_v59 = vld [vmem:[#allocation41_spill] sm:$0xff] }
 0x26d   : > { %v3509_v45 = vld [vmem:[#allocation3 + $0x5] sm:$0xff]  ;;  %v7985_v56 = vpop.eup %7984  ;;  %3219 = vst.msk [vmem:[#allocation3 + $0x28] sm:$0xff] %vm357_vm1, %v3199_v2  ;;  %7996 = vtanh.f32 %v3127_v7  ;;  %v2862_v26 = vadd.f32 %v2819_v53, %v2595_v13  ;;  %v7540_v43 = vpop.f32.mrf.mxu1  ;;  %7580 = vmatprep.mubr.msk.f32.mxu1 %vm357_vm1, %v3236_v58  ;;  %v3510_v44 = vld [vmem:[#allocation3 + $0xd] sm:$0xff]  ;;  %v2597_v22 = vadd.f32 %v10011_v59, %v2330_v19 }
 0x26e   : > { %7614 = vmatprep.mubr.msk.f32.mxu0 %vm357_vm1, %v3509_v45  ;;  %v3202_v61 = vsel %vm3162_vm0, %v7983_v32, %v3182_v27  ;;  %vm3161_vm2 = vcmp.ge.f32.partialorder %v7985_v56, 0.0  ;;  %v3181_v1 = vmul.f32 0.01, %v7985_v56  ;;  %7998 = vtanh.f32 %v3130_v29  ;;  %7581 = vmatmul.mubr.msk.f32.vlgmr.msra.gmra.mxu1 %vm357_vm1, %v9095_v39 }
 0x26f   : > { %7615 = vmatmul.mubr.msk.f32.vlgmr.msra.gmra.mxu0 %vm357_vm1, %v3510_v44  ;;  %v7987_v3 = vpop.eup %7986  ;;  %3222 = vst.msk [vmem:[#allocation3 + $0x40] sm:$0xff] %vm357_vm1, %v3202_v61  ;;  %v3129_v8 = vadd.f32 %v9074_v50, %v2862_v26  ;;  %v2865_v46 = vadd.f32 %v7540_v43, %v2598_v55  ;;  %7645 = vmatpush3.msra.mxu1 %v10012_v37  ;;  %v2829_v40 = vpop.f32.mrf.mxu1 }
 0x270   : > { %7679 = vmatpush3.msra.mxu0 %v10014_v4  ;;  %v3201_v17 = vsel %vm3161_vm2, %v7985_v56, %v3181_v1  ;;  %vm3164_vm4 = vcmp.ge.f32.partialorder %v7987_v3, 0.0  ;;  %v3184_v23 = vmul.f32 0.01, %v7987_v3  ;;  %v2864_v21 = vadd.f32 %v2829_v40, %v2597_v22  ;;  %v9118_v34 = vld [vmem:[#allocation3 + $0x14] sm:$0xff]  ;;  %v9120_v18 = vld [vmem:[#allocation3 + $0x1c] sm:$0xff]  ;;  %7646 = vmatprep.subr.mxu1 %v6578_v25  ;;  %v7575_v50 = vpop.f32.mrf.mxu0 }
 0x271   : > { %v3511_v31 = vld [vmem:[#allocation3 + $0x15] sm:$0xff]  ;;  %7680 = vmatprep.subr.mxu0 %v6600_v16  ;;  %3221 = vst.msk [vmem:[#allocation3 + $0x38] sm:$0xff] %vm357_vm1, %v3201_v17  ;;  %8000 = vtanh.f32 %v3129_v8  ;;  %v3132_v47 = vadd.f32 %v9084_v62, %v2865_v46  ;;  %v7543_v14 = vpop.f32.mrf.mxu1  ;;  %7583 = vmatprep.mubr.msk.f32.mxu1 %vm357_vm1, %v9118_v34  ;;  %v3512_v0 = vld [vmem:[#allocation3 + $0x1d] sm:$0xff] }
 0x272   : > { %7617 = vmatprep.mubr.msk.f32.mxu0 %vm357_vm1, %v3511_v31  ;;  %v7989_v20 = vpop.eup %7988  ;;  %v3204_v33 = vsel %vm3164_vm4, %v7987_v3, %v3184_v23  ;;  %v3131_v15 = vadd.f32 %v3096_v6, %v2864_v21  ;;  %v2867_v60 = vadd.f32 %v7543_v14, %v2600_v49  ;;  %7584 = vmatmul.mubr.msk.f32.gmra.mxu1 %vm357_vm1, %v9120_v18  ;;  %v3106_v13 = vpop.f32.mrf.mxu0 }
 0x273   : > { %7618 = vmatmul.mubr.msk.f32.gmra.mxu0 %vm357_vm1, %v3512_v0  ;;  %3224 = vst.msk [vmem:[#allocation3 + $0x50] sm:$0xff] %vm357_vm1, %v3204_v33  ;;  %vm3163_vm5 = vcmp.ge.f32.partialorder %v7989_v20, 0.0  ;;  %v3183_v11 = vmul.f32 0.01, %v7989_v20  ;;  %8002 = vtanh.f32 %v3132_v47  ;;  %v2839_v12 = vpop.f32.mrf.mxu1  ;;  %7647 = vmatpush3.msra.mxu1 %v6578_v25 }
 0x274   : > { %7681 = vmatpush3.msra.mxu0 %v6600_v16  ;;  %v7991_v57 = vpop.eup %7990  ;;  %8004 = vtanh.f32 %v3131_v15  ;;  %v3134_v19 = vadd.f32 %v7575_v50, %v2867_v60  ;;  %v2866_v62 = vadd.f32 %v2839_v12, %v2599_v63  ;;  %v9143_v42 = vld [vmem:[#allocation3 + $0x24] sm:$0xff]  ;;  %v9145_v30 = vld [vmem:[#allocation3 + $0x2c] sm:$0xff]  ;;  %7712 = vmatprep.subr.mxu1 %v9131_v52 }
 0x275   : > { %v3513_v5 = vld [vmem:[#allocation3 + $0x25] sm:$0xff]  ;;  %7746 = vmatprep.subr.mxu0 %v9136_v36  ;;  %v7993_v9 = vpop.eup %7992  ;;  %v3203_v51 = vsel %vm3163_vm5, %v7989_v20, %v3183_v11  ;;  %vm3166_vm6 = vcmp.ge.f32.partialorder %v7991_v57, 0.0  ;;  %v3186_v48 = vmul.f32 0.01, %v7991_v57  ;;  %7586 = vmatprep.mubr.msk.f32.mxu1 %vm357_vm1, %v9143_v42  ;;  %v3514_v24 = vld [vmem:[#allocation3 + $0x2d] sm:$0xff] }
 0x276   : > { %7620 = vmatprep.mubr.msk.f32.mxu0 %vm357_vm1, %v3513_v5  ;;  %3223 = vst.msk [vmem:[#allocation3 + $0x48] sm:$0xff] %vm357_vm1, %v3203_v51  ;;  %vm3165_vm7 = vcmp.ge.f32.partialorder %v7993_v9, 0.0  ;;  %v3185_v32 = vmul.f32 0.01, %v7993_v9  ;;  %8006 = vtanh.f32 %v3134_v19  ;;  %v3133_v10 = vadd.f32 %v3106_v13, %v2866_v62  ;;  %7587 = vmatmul.mubr.msk.f32.gmra.mxu1 %vm357_vm1, %v9145_v30 }
 0x277   : > { %7621 = vmatmul.mubr.msk.f32.gmra.mxu0 %vm357_vm1, %v3514_v24  ;;  %v3206_v41 = vsel %vm3166_vm6, %v7991_v57, %v3186_v48  ;;  %v3777_v24 = vld [vmem:[#allocation3 + $0x6] sm:$0xff] }
 0x278   : > { %v7995_v7 = vpop.eup %7994  ;;  %3226 = vst.msk [vmem:[#allocation3 + $0x60] sm:$0xff] %vm357_vm1, %v3206_v41  ;;  %v3205_v53 = vsel %vm3165_vm7, %v7993_v9, %v3185_v32  ;;  %8008 = vtanh.f32 %v3133_v10  ;;  %v9158_v28 = vld [vmem:[#allocation3 + $0x34] sm:$0xff]  ;;  %v9160_v2 = vld [vmem:[#allocation3 + $0x3c] sm:$0xff]  ;;  %v4045_v32 = vld [vmem:[#allocation3 + $0x7] sm:$0xff] }
 0x279   : > { %v3515_v55 = vld [vmem:[#allocation3 + $0x35] sm:$0xff]  ;;  %3225 = vst.msk [vmem:[#allocation3 + $0x58] sm:$0xff] %vm357_vm1, %v3205_v53  ;;  %vm3168_vm8 = vcmp.ge.f32.partialorder %v7995_v7, 0.0  ;;  %v3188_v27 = vmul.f32 0.01, %v7995_v7  ;;  %7589 = vmatprep.mubr.msk.f32.mxu1 %vm357_vm1, %v9158_v28  ;;  %v3516_v29 = vld [vmem:[#allocation3 + $0x3d] sm:$0xff] }
 0x27a   : > { %7623 = vmatprep.mubr.msk.f32.mxu0 %vm357_vm1, %v3515_v55  ;;  %v7997_v58 = vpop.eup %7996  ;;  %7590 = vmatmul.mubr.msk.f32.gmra.mxu1 %vm357_vm1, %v9160_v2  ;;  %v3778_v10 = vld [vmem:[#allocation3 + $0xe] sm:$0xff]  ;;  %v3779_v53 = vld [vmem:[#allocation3 + $0x16] sm:$0xff] }
 0x27b   : > { %7624 = vmatmul.mubr.msk.f32.gmra.mxu0 %vm357_vm1, %v3516_v29  ;;  %v7999_v45 = vpop.eup %7998  ;;  %v3208_v56 = vsel %vm3168_vm8, %v7995_v7, %v3188_v27  ;;  %vm3167_vm9 = vcmp.ge.f32.partialorder %v7997_v58, 0.0  ;;  %v3187_v54 = vmul.f32 0.01, %v7997_v58  ;;  %v4046_v41 = vld [vmem:[#allocation3 + $0xf] sm:$0xff]  ;;  %v4047_v55 = vld [vmem:[#allocation3 + $0x17] sm:$0xff]  ;;  %v6644_v27 = vld [vmem:[%s9909_s5 + $0x50] sm:$0xff] }
 0x27c   : > { %3228 = vst.msk [vmem:[#allocation3 + $0x70] sm:$0xff] %vm357_vm1, %v3208_v56  ;;  %vm3170_vm10 = vcmp.ge.f32.partialorder %v7999_v45, 0.0  ;;  %v3190_v6 = vmul.f32 0.01, %v7999_v45  ;;  %v6622_v7 = vld [vmem:[%s9909_s5 + $0x40] sm:$0xff]  ;;  %v3780_v29 = vld [vmem:[#allocation3 + $0x1e] sm:$0xff] }
 0x27d   : > { %v3207_v26 = vsel %vm3167_vm9, %v7997_v58, %v3187_v54  ;;  %v9170_v43 = vld [vmem:[#allocation3 + $0x44] sm:$0xff]  ;;  %v9172_v59 = vld [vmem:[#allocation3 + $0x4c] sm:$0xff] }
 0x27e   : > { %v3517_v44 = vld [vmem:[#allocation3 + $0x45] sm:$0xff]  ;;  %v8001_v22 = vpop.eup %8000  ;;  %3227 = vst.msk [vmem:[#allocation3 + $0x68] sm:$0xff] %vm357_vm1, %v3207_v26  ;;  %v3210_v25 = vsel %vm3170_vm10, %v7999_v45, %v3190_v6  ;;  %7592 = vmatprep.mubr.msk.f32.mxu1 %vm357_vm1, %v9170_v43  ;;  %v3518_v16 = vld [vmem:[#allocation3 + $0x4d] sm:$0xff]  ;;  %v9251_v45 = vld [vmem:[%s9909_s5 + $0x68] sm:$0xff] }
 0x27f   : > { %7626 = vmatprep.mubr.msk.f32.mxu0 %vm357_vm1, %v3517_v44  ;;  %3230 = vst.msk [vmem:[#allocation3 + $0x80] sm:$0xff] %vm357_vm1, %v3210_v25  ;;  %vm3169_vm11 = vcmp.ge.f32.partialorder %v8001_v22, 0.0  ;;  %v3189_v61 = vmul.f32 0.01, %v8001_v22  ;;  %7593 = vmatmul.mubr.msk.f32.gmra.mxu1 %vm357_vm1, %v9172_v59  ;;  %v4048_v58 = vld [vmem:[#allocation3 + $0x1f] sm:$0xff]  ;;  %v4049_v56 = vld [vmem:[#allocation3 + $0x27] sm:$0xff] }
 0x280   : > { %7627 = vmatmul.mubr.msk.f32.gmra.mxu0 %vm357_vm1, %v3518_v16  ;;  %v8003_v1 = vpop.eup %8002  ;;  %v9182_v3 = vld [vmem:[#allocation3 + $0x54] sm:$0xff]  ;;  %v9184_v46 = vld [vmem:[#allocation3 + $0x5c] sm:$0xff]  ;;  %v9261_v6 = vld [vmem:[%s9909_s5 + $0x78] sm:$0xff] }
 0x281   : > { %v3519_v8 = vld [vmem:[#allocation3 + $0x55] sm:$0xff]  ;;  %v8005_v37 = vpop.eup %8004  ;;  %v3209_v40 = vsel %vm3169_vm11, %v8001_v22, %v3189_v61  ;;  %vm3172_vm12 = vcmp.ge.f32.partialorder %v8003_v1, 0.0  ;;  %v3192_v38 = vmul.f32 0.01, %v8003_v1  ;;  %7595 = vmatprep.mubr.msk.f32.mxu1 %vm357_vm1, %v9182_v3  ;;  %v3520_v49 = vld [vmem:[#allocation3 + $0x5d] sm:$0xff]  ;;  %v3785_v16 = vld [vmem:[#allocation3 + $0x46] sm:$0xff] }
 0x282   : > { %7629 = vmatprep.mubr.msk.f32.mxu0 %vm357_vm1, %v3519_v8  ;;  %3229 = vst.msk [vmem:[#allocation3 + $0x78] sm:$0xff] %vm357_vm1, %v3209_v40  ;;  %vm3171_vm13 = vcmp.ge.f32.partialorder %v8005_v37, 0.0  ;;  %v3191_v4 = vmul.f32 0.01, %v8005_v37  ;;  %v3782_v54 = vld [vmem:[#allocation3 + $0x2e] sm:$0xff]  ;;  %v3783_v26 = vld [vmem:[#allocation3 + $0x36] sm:$0xff] }
 0x283   : > { %v8007_v17 = vpop.eup %8006  ;;  %v3212_v23 = vsel %vm3172_vm12, %v8003_v1, %v3192_v38  ;;  %7596 = vmatmul.mubr.msk.f32.gmra.mxu1 %vm357_vm1, %v9184_v46  ;;  %v4051_v44 = vld [vmem:[#allocation3 + $0x37] sm:$0xff]  ;;  %v4052_v25 = vld [vmem:[#allocation3 + $0x3f] sm:$0xff]  ;;  %v4053_v61 = vld [vmem:[#allocation3 + $0x47] sm:$0xff] }
 0x284   : > { %7630 = vmatmul.mubr.msk.f32.gmra.mxu0 %vm357_vm1, %v3520_v49  ;;  %3232 = vst.msk [vmem:[#allocation3 + $0x90] sm:$0xff] %vm357_vm1, %v3212_v23  ;;  %v3211_v21 = vsel %vm3171_vm13, %v8005_v37, %v3191_v4  ;;  %vm3174_vm14 = vcmp.ge.f32.partialorder %v8007_v17, 0.0  ;;  %v3194_v31 = vmul.f32 0.01, %v8007_v17  ;;  %v3784_v22 = vld [vmem:[#allocation3 + $0x3e] sm:$0xff]  ;;  %v3786_v1 = vld [vmem:[#allocation3 + $0x4e] sm:$0xff] }
 0x285   : > { %v8009_v50 = vpop.eup %8008  ;;  %3231 = vst.msk [vmem:[#allocation3 + $0x88] sm:$0xff] %vm357_vm1, %v3211_v21  ;;  %v9195_v47 = vld [vmem:[#allocation3 + $0x64] sm:$0xff]  ;;  %v9197_v0 = vld [vmem:[#allocation3 + $0x6c] sm:$0xff]  ;;  %v3787_v37 = vld [vmem:[#allocation3 + $0x56] sm:$0xff] }
 0x286   : > { %v3521_v14 = vld [vmem:[#allocation3 + $0x65] sm:$0xff]  ;;  %v3214_v35 = vsel %vm3174_vm14, %v8007_v17, %v3194_v31  ;;  %vm3173_vm15 = vcmp.ge.f32.partialorder %v8009_v50, 0.0  ;;  %v3193_v63 = vmul.f32 0.01, %v8009_v50  ;;  %7598 = vmatprep.mubr.msk.f32.mxu1 %vm357_vm1, %v9195_v47  ;;  %v3522_v20 = vld [vmem:[#allocation3 + $0x6d] sm:$0xff]  ;;  %v4055_v40 = vld [vmem:[#allocation3 + $0x57] sm:$0xff] }
 0x287   : > { %7632 = vmatprep.mubr.msk.f32.mxu0 %vm357_vm1, %v3521_v14  ;;  %3234 = vst.msk [vmem:[#allocation3 + $0xa0] sm:$0x3f] %vm379_vm3, %v3214_v35  ;;  %7599 = vmatmul.mubr.msk.f32.gmra.mxu1 %vm357_vm1, %v9197_v0  ;;  %v4054_v8 = vld [vmem:[#allocation3 + $0x4f] sm:$0xff]  ;;  %v3788_v38 = vld [vmem:[#allocation3 + $0x5e] sm:$0xff]  ;;  %v3789_v4 = vld [vmem:[#allocation3 + $0x66] sm:$0xff]  ;;  %vm5762_vm3 = vcmask 1046528  }
 0x288   : > { %7633 = vmatmul.mubr.msk.f32.gmra.mxu0 %vm357_vm1, %v3522_v20  ;;  %v3213_v33 = vsel %vm3173_vm15, %v8009_v50, %v3193_v63  ;;  %v4056_v49 = vld [vmem:[#allocation3 + $0x5f] sm:$0xff]  ;;  %v4057_v17 = vld [vmem:[#allocation3 + $0x67] sm:$0xff]  ;;  %v4058_v21 = vld [vmem:[#allocation3 + $0x6f] sm:$0xff] }
 0x289   : > { %3233 = vst.msk [vmem:[#allocation3 + $0x98] sm:$0xff] %vm357_vm1, %v3213_v33  ;;  %v9207_v15 = vld [vmem:[#allocation3 + $0x74] sm:$0xff]  ;;  %v9209_v11 = vld [vmem:[#allocation3 + $0x7c] sm:$0xff] }
 0x28a   : > { %v3523_v60 = vld [vmem:[#allocation3 + $0x75] sm:$0xff]  ;;  %7601 = vmatprep.mubr.msk.f32.mxu1 %vm357_vm1, %v9207_v15  ;;  %v3524_v12 = vld [vmem:[#allocation3 + $0x7d] sm:$0xff] }
 0x28b   : > { %7635 = vmatprep.mubr.msk.f32.mxu0 %vm357_vm1, %v3523_v60  ;;  %7602 = vmatmul.mubr.msk.f32.gmra.mxu1 %vm357_vm1, %v9209_v11  ;;  %v3790_v23 = vld [vmem:[#allocation3 + $0x6e] sm:$0xff]  ;;  %v3791_v31 = vld [vmem:[#allocation3 + $0x76] sm:$0xff]  ;;  %v3792_v14 = vld [vmem:[#allocation3 + $0x7e] sm:$0xff] }
 0x28c   : > { %7636 = vmatmul.mubr.msk.f32.gmra.mxu0 %vm357_vm1, %v3524_v12  ;;  %v9217_v57 = vld [vmem:[#allocation3 + $0x84] sm:$0xff]  ;;  %v9219_v62 = vld [vmem:[#allocation3 + $0x8c] sm:$0xff]  ;;  %v4059_v50 = vld [vmem:[#allocation3 + $0x77] sm:$0xff] }
 0x28d   : > { %v3525_v19 = vld [vmem:[#allocation3 + $0x85] sm:$0xff]  ;;  %7604 = vmatprep.mubr.msk.f32.mxu1 %vm357_vm1, %v9217_v57  ;;  %v3526_v5 = vld [vmem:[#allocation3 + $0x8d] sm:$0xff] }
 0x28e   : > { %7638 = vmatprep.mubr.msk.f32.mxu0 %vm357_vm1, %v3525_v19  ;;  %v4060_v35 = vld [vmem:[#allocation3 + $0x7f] sm:$0xff]  ;;  %v4061_v20 = vld [vmem:[#allocation3 + $0x87] sm:$0xff]  ;;  %v4062_v60 = vld [vmem:[#allocation3 + $0x8f] sm:$0xff] }
 0x28f   : > { %7605 = vmatmul.mubr.msk.f32.gmra.mxu1 %vm357_vm1, %v9219_v62  ;;  %v3793_v63 = vld [vmem:[#allocation3 + $0x86] sm:$0xff]  ;;  %v3794_v33 = vld [vmem:[#allocation3 + $0x8e] sm:$0xff] }
 0x290   : > { %7639 = vmatmul.mubr.msk.f32.gmra.mxu0 %vm357_vm1, %v3526_v5  ;;  %v9227_v9 = vld [vmem:[#allocation3 + $0x94] sm:$0xff]  ;;  %v3255_v51 = vld [vmem:[#allocation3 + $0x9c] sm:$0x3f] }
 0x291   : > { %v3527_v13 = vld [vmem:[#allocation3 + $0x95] sm:$0xff]  ;;  %7607 = vmatprep.mubr.msk.f32.mxu1 %vm357_vm1, %v9227_v9  ;;  %v3528_v48 = vld [vmem:[#allocation3 + $0x9d] sm:$0x3f] }
 0x292   : > { %7641 = vmatprep.mubr.msk.f32.mxu0 %vm357_vm1, %v3527_v13  ;;  %v3795_v12 = vld [vmem:[#allocation3 + $0x96] sm:$0xff]  ;;  %v3796_v5 = vld [vmem:[#allocation3 + $0x9e] sm:$0x3f] }
 0x293   : > { %7608 = vmatmul.mubr.msk.f32.gmra.mxu1 %vm357_vm1, %v3255_v51  ;;  %v4063_v19 = vld [vmem:[#allocation3 + $0x97] sm:$0xff]  ;;  %v4064_v13 = vld [vmem:[#allocation3 + $0x9f] sm:$0x3f]  ;;  %v4313_v51 = vld [vmem:[#allocation3 + $0x8] sm:$0xff] }
 0x294   : > { %7642 = vmatmul.mubr.msk.f32.gmra.mxu0 %vm357_vm1, %v3528_v48  ;;  %7648 = vmatprep.mubr.msk.f32.mxu1 %vm357_vm1, %v3777_v24  ;;  %v4581_v48 = vld [vmem:[#allocation3 + $0x9] sm:$0xff] }
 0x295   : > { %7682 = vmatprep.mubr.msk.f32.mxu0 %vm357_vm1, %v4045_v32  ;;  %v4314_v24 = vld [vmem:[#allocation3 + $0x10] sm:$0xff] }
 0x296   : > { %v4582_v32 = vld [vmem:[#allocation3 + $0x11] sm:$0xff] }
 0x297   : > { %7649 = vmatmul.mubr.msk.f32.vlgmr.msra.gmra.mxu1 %vm357_vm1, %v3778_v10  ;;  %v6666_v10 = vld [vmem:[%s9909_s5 + $0x60] sm:$0xff] }
 0x298   : > { %7683 = vmatmul.mubr.msk.f32.vlgmr.msra.gmra.mxu0 %vm357_vm1, %v4046_v41  ;;  %7713 = vmatpush3.msra.mxu1 %v9131_v52  ;;  %v3781_v52 = vld [vmem:[#allocation3 + $0x26] sm:$0xff]  ;;  %v4315_v41 = vld [vmem:[#allocation3 + $0x18] sm:$0xff] }
 0x299   : > { %7651 = vmatprep.mubr.msk.f32.mxu1 %vm357_vm1, %v3779_v53  ;;  %7685 = vmatprep.mubr.msk.f32.mxu0 %vm357_vm1, %v4047_v55  ;;  %v6688_v53 = vld [vmem:[%s9909_s5 + $0x70] sm:$0xff] }
 0x29a   : > { %7714 = vmatprep.subr.mxu1 %v6622_v7  ;;  %7747 = vmatpush3.msra.mxu0 %v9136_v36  ;;  %v4050_v36 = vld [vmem:[#allocation3 + $0x2f] sm:$0xff]  ;;  %v4316_v55 = vld [vmem:[#allocation3 + $0x20] sm:$0xff] }
 0x29b   : > { %7715 = vmatpush3.msra.mxu1 %v6622_v7  ;;  %7748 = vmatprep.subr.mxu0 %v6644_v27  ;;  %v4583_v7 = vld [vmem:[#allocation3 + $0x19] sm:$0xff] }
 0x29c   : > { %7652 = vmatmul.mubr.msk.f32.gmra.mxu1 %vm357_vm1, %v3780_v29  ;;  %7686 = vmatmul.mubr.msk.f32.gmra.mxu0 %vm357_vm1, %v4048_v58  ;;  %v9311_v29 = vld [vmem:[%s9909_s5 + $0x88] sm:$0xff]  ;;  %v4317_v58 = vld [vmem:[#allocation3 + $0x28] sm:$0xff] }
 0x29d   : > { %7654 = vmatprep.mubr.msk.f32.mxu1 %vm357_vm1, %v3781_v52  ;;  %7688 = vmatprep.mubr.msk.f32.mxu0 %vm357_vm1, %v4049_v56  ;;  %v4318_v52 = vld [vmem:[#allocation3 + $0x30] sm:$0xff] }
 0x29e   : > { %7780 = vmatprep.subr.mxu1 %v9251_v45  ;;  %7749 = vmatpush3.msra.mxu0 %v6644_v27  ;;  %v4584_v27 = vld [vmem:[#allocation3 + $0x21] sm:$0xff]  ;;  %v4586_v56 = vld [vmem:[#allocation3 + $0x31] sm:$0xff] }
 0x29f   : > { %7814 = vmatprep.subr.mxu0 %v9261_v6 }
 0x2a0   : > { %7655 = vmatmul.mubr.msk.f32.gmra.mxu1 %vm357_vm1, %v3782_v54  ;;  %7689 = vmatmul.mubr.msk.f32.gmra.mxu0 %vm357_vm1, %v4050_v36  ;;  %v4319_v54 = vld [vmem:[#allocation3 + $0x38] sm:$0xff] }
 0x2a1   : > { %7657 = vmatprep.mubr.msk.f32.mxu1 %vm357_vm1, %v3783_v26  ;;  %7691 = vmatprep.mubr.msk.f32.mxu0 %vm357_vm1, %v4051_v44  ;;  %v4587_v36 = vld [vmem:[#allocation3 + $0x39] sm:$0xff]  ;;  %v4588_v26 = vld [vmem:[#allocation3 + $0x41] sm:$0xff] }
 0x2a2   : > { %v4321_v44 = vld [vmem:[#allocation3 + $0x48] sm:$0xff] }
 0x2a4   : > { %7658 = vmatmul.mubr.msk.f32.gmra.mxu1 %vm357_vm1, %v3784_v22  ;;  %7692 = vmatmul.mubr.msk.f32.gmra.mxu0 %vm357_vm1, %v4052_v25  ;;  %v4589_v22 = vld [vmem:[#allocation3 + $0x49] sm:$0xff] }
 0x2a5   : > { %7660 = vmatprep.mubr.msk.f32.mxu1 %vm357_vm1, %v3785_v16  ;;  %7694 = vmatprep.mubr.msk.f32.mxu0 %vm357_vm1, %v4053_v61  ;;  %v4322_v25 = vld [vmem:[#allocation3 + $0x50] sm:$0xff]  ;;  %v4323_v61 = vld [vmem:[#allocation3 + $0x58] sm:$0xff] }
 0x2a6   : > { %v4590_v16 = vld [vmem:[#allocation3 + $0x51] sm:$0xff] }
 0x2a8   : > { %7661 = vmatmul.mubr.msk.f32.gmra.mxu1 %vm357_vm1, %v3786_v1  ;;  %7695 = vmatmul.mubr.msk.f32.gmra.mxu0 %vm357_vm1, %v4054_v8  ;;  %v4591_v1 = vld [vmem:[#allocation3 + $0x59] sm:$0xff] }
 0x2a9   : > { %7663 = vmatprep.mubr.msk.f32.mxu1 %vm357_vm1, %v3787_v37  ;;  %7697 = vmatprep.mubr.msk.f32.mxu0 %vm357_vm1, %v4055_v40  ;;  %v4324_v8 = vld [vmem:[#allocation3 + $0x60] sm:$0xff]  ;;  %v4325_v40 = vld [vmem:[#allocation3 + $0x68] sm:$0xff] }
 0x2aa   : > { %v4592_v37 = vld [vmem:[#allocation3 + $0x61] sm:$0xff] }
 0x2ac   : > { %7664 = vmatmul.mubr.msk.f32.gmra.mxu1 %vm357_vm1, %v3788_v38  ;;  %7698 = vmatmul.mubr.msk.f32.gmra.mxu0 %vm357_vm1, %v4056_v49  ;;  %v4593_v38 = vld [vmem:[#allocation3 + $0x69] sm:$0xff] }
 0x2ad   : > { %7666 = vmatprep.mubr.msk.f32.mxu1 %vm357_vm1, %v3789_v4  ;;  %7700 = vmatprep.mubr.msk.f32.mxu0 %vm357_vm1, %v4057_v17  ;;  %v4326_v49 = vld [vmem:[#allocation3 + $0x70] sm:$0xff]  ;;  %v4327_v17 = vld [vmem:[#allocation3 + $0x78] sm:$0xff] }
 0x2ae   : > { %v4594_v4 = vld [vmem:[#allocation3 + $0x71] sm:$0xff] }
 0x2b0   : > { %7667 = vmatmul.mubr.msk.f32.gmra.mxu1 %vm357_vm1, %v3790_v23  ;;  %7701 = vmatmul.mubr.msk.f32.gmra.mxu0 %vm357_vm1, %v4058_v21  ;;  %v4595_v23 = vld [vmem:[#allocation3 + $0x79] sm:$0xff] }
 0x2b1   : > { %7669 = vmatprep.mubr.msk.f32.mxu1 %vm357_vm1, %v3791_v31  ;;  %7703 = vmatprep.mubr.msk.f32.mxu0 %vm357_vm1, %v4059_v50  ;;  %v4328_v21 = vld [vmem:[#allocation3 + $0x80] sm:$0xff]  ;;  %v4329_v50 = vld [vmem:[#allocation3 + $0x88] sm:$0xff] }
 0x2b2   : > { %v4596_v31 = vld [vmem:[#allocation3 + $0x81] sm:$0xff] }
 0x2b4   : > { %7670 = vmatmul.mubr.msk.f32.gmra.mxu1 %vm357_vm1, %v3792_v14  ;;  %7704 = vmatmul.mubr.msk.f32.gmra.mxu0 %vm357_vm1, %v4060_v35  ;;  %v4597_v14 = vld [vmem:[#allocation3 + $0x89] sm:$0xff] }
 0x2b5   : > { %7672 = vmatprep.mubr.msk.f32.mxu1 %vm357_vm1, %v3793_v63  ;;  %7706 = vmatprep.mubr.msk.f32.mxu0 %vm357_vm1, %v4061_v20  ;;  %v4330_v35 = vld [vmem:[#allocation3 + $0x90] sm:$0xff]  ;;  %v4331_v20 = vld [vmem:[#allocation3 + $0x98] sm:$0xff] }
 0x2b6   : > { %v4598_v63 = vld [vmem:[#allocation3 + $0x91] sm:$0xff] }
 0x2b8   : > { %7673 = vmatmul.mubr.msk.f32.gmra.mxu1 %vm357_vm1, %v3794_v33  ;;  %7707 = vmatmul.mubr.msk.f32.gmra.mxu0 %vm357_vm1, %v4062_v60  ;;  %v4599_v33 = vld [vmem:[#allocation3 + $0x99] sm:$0xff] }
 0x2b9   : > { %7675 = vmatprep.mubr.msk.f32.mxu1 %vm357_vm1, %v3795_v12  ;;  %7709 = vmatprep.mubr.msk.f32.mxu0 %vm357_vm1, %v4063_v19  ;;  %v4332_v60 = vld [vmem:[#allocation3 + $0xa0] sm:$0x3f]  ;;  %v4849_v19 = vld [vmem:[#allocation3 + $0xa] sm:$0xff] }
 0x2ba   : > { %v4600_v12 = vld [vmem:[#allocation3 + $0xa1] sm:$0x3f] }
 0x2bc   : > { %7676 = vmatmul.mubr.msk.f32.gmra.mxu1 %vm357_vm1, %v3796_v5  ;;  %7710 = vmatmul.mubr.msk.f32.gmra.mxu0 %vm357_vm1, %v4064_v13  ;;  %v5117_v5 = vld [vmem:[#allocation3 + $0xb] sm:$0xff] }
 0x2bd   : > { %7716 = vmatprep.mubr.msk.f32.mxu1 %vm357_vm1, %v4313_v51  ;;  %7750 = vmatprep.mubr.msk.f32.mxu0 %vm357_vm1, %v4581_v48  ;;  %v4850_v13 = vld [vmem:[#allocation3 + $0x12] sm:$0xff] }
 0x2be   : > { %v5118_v51 = vld [vmem:[#allocation3 + $0x13] sm:$0xff] }
 0x2bf   : > { %v6710_v48 = vld [vmem:[%s9909_s5 + $0x80] sm:$0xff] }
 0x2c0   : > { %7717 = vmatmul.mubr.msk.f32.vlgmr.msra.gmra.mxu1 %vm357_vm1, %v4314_v24  ;;  %7751 = vmatmul.mubr.msk.f32.vlgmr.msra.gmra.mxu0 %vm357_vm1, %v4582_v32  ;;  %v4851_v24 = vld [vmem:[#allocation3 + $0x1a] sm:$0xff] }
 0x2c1   : > { %7781 = vmatpush3.msra.mxu1 %v9251_v45  ;;  %7719 = vmatprep.mubr.msk.f32.mxu1 %vm357_vm1, %v4315_v41  ;;  %v4585_v45 = vld [vmem:[#allocation3 + $0x29] sm:$0xff]  ;;  %v5119_v32 = vld [vmem:[#allocation3 + $0x1b] sm:$0xff] }
 0x2c2   : > { %7753 = vmatprep.mubr.msk.f32.mxu0 %vm357_vm1, %v4583_v7  ;;  %7782 = vmatprep.subr.mxu1 %v6666_v10  ;;  %v5120_v41 = vld [vmem:[#allocation3 + $0x23] sm:$0xff] }
 0x2c3   : > { %7783 = vmatpush3.msra.mxu1 %v6666_v10  ;;  %7815 = vmatpush3.msra.mxu0 %v9261_v6  ;;  %v4320_v6 = vld [vmem:[#allocation3 + $0x40] sm:$0xff]  ;;  %v4853_v7 = vld [vmem:[#allocation3 + $0x2a] sm:$0xff] }
 0x2c4   : > { %7720 = vmatmul.mubr.msk.f32.gmra.mxu1 %vm357_vm1, %v4316_v55  ;;  %7754 = vmatmul.mubr.msk.f32.gmra.mxu0 %vm357_vm1, %v4584_v27  ;;  %v4852_v10 = vld [vmem:[#allocation3 + $0x22] sm:$0xff]  ;;  %v4854_v55 = vld [vmem:[#allocation3 + $0x32] sm:$0xff] }
 0x2c5   : > { %7722 = vmatprep.mubr.msk.f32.mxu1 %vm357_vm1, %v4317_v58  ;;  %7756 = vmatprep.mubr.msk.f32.mxu0 %vm357_vm1, %v4585_v45  ;;  %v5122_v27 = vld [vmem:[#allocation3 + $0x33] sm:$0xff]  ;;  %v5123_v58 = vld [vmem:[#allocation3 + $0x3b] sm:$0xff] }
 0x2c6   : > { %7816 = vmatprep.subr.mxu0 %v6688_v53  ;;  %7848 = vmatprep.subr.mxu1 %v9311_v29  ;;  %v4856_v45 = vld [vmem:[#allocation3 + $0x42] sm:$0xff] }
 0x2c7   : > { %7817 = vmatpush3.msra.mxu0 %v6688_v53  ;;  %v5121_v53 = vld [vmem:[#allocation3 + $0x2b] sm:$0xff] }
 0x2c8   : > { %7723 = vmatmul.mubr.msk.f32.gmra.mxu1 %vm357_vm1, %v4318_v52  ;;  %7757 = vmatmul.mubr.msk.f32.gmra.mxu0 %vm357_vm1, %v4586_v56  ;;  %v5124_v52 = vld [vmem:[#allocation3 + $0x43] sm:$0xff] }
 0x2c9   : > { %7725 = vmatprep.mubr.msk.f32.mxu1 %vm357_vm1, %v4319_v54  ;;  %7759 = vmatprep.mubr.msk.f32.mxu0 %vm357_vm1, %v4587_v36  ;;  %v4857_v56 = vld [vmem:[#allocation3 + $0x4a] sm:$0xff]  ;;  %v4858_v36 = vld [vmem:[#allocation3 + $0x52] sm:$0xff] }
 0x2ca   : > { %v5125_v54 = vld [vmem:[#allocation3 + $0x4b] sm:$0xff] }
 0x2cc   : > { %7726 = vmatmul.mubr.msk.f32.gmra.mxu1 %vm357_vm1, %v4320_v6  ;;  %7760 = vmatmul.mubr.msk.f32.gmra.mxu0 %vm357_vm1, %v4588_v26  ;;  %v5126_v6 = vld [vmem:[#allocation3 + $0x53] sm:$0xff] }
 0x2cd   : > { %7728 = vmatprep.mubr.msk.f32.mxu1 %vm357_vm1, %v4321_v44  ;;  %7762 = vmatprep.mubr.msk.f32.mxu0 %vm357_vm1, %v4589_v22  ;;  %v4859_v26 = vld [vmem:[#allocation3 + $0x5a] sm:$0xff]  ;;  %v4860_v22 = vld [vmem:[#allocation3 + $0x62] sm:$0xff] }
 0x2ce   : > { %v5127_v44 = vld [vmem:[#allocation3 + $0x5b] sm:$0xff] }
 0x2d0   : > { %7729 = vmatmul.mubr.msk.f32.gmra.mxu1 %vm357_vm1, %v4322_v25  ;;  %7763 = vmatmul.mubr.msk.f32.gmra.mxu0 %vm357_vm1, %v4590_v16  ;;  %v5128_v25 = vld [vmem:[#allocation3 + $0x63] sm:$0xff] }
 0x2d1   : > { %7731 = vmatprep.mubr.msk.f32.mxu1 %vm357_vm1, %v4323_v61  ;;  %7765 = vmatprep.mubr.msk.f32.mxu0 %vm357_vm1, %v4591_v1  ;;  %v4861_v16 = vld [vmem:[#allocation3 + $0x6a] sm:$0xff]  ;;  %v4862_v1 = vld [vmem:[#allocation3 + $0x72] sm:$0xff] }
 0x2d2   : > { %v5129_v61 = vld [vmem:[#allocation3 + $0x6b] sm:$0xff] }
 0x2d4   : > { %7732 = vmatmul.mubr.msk.f32.gmra.mxu1 %vm357_vm1, %v4324_v8  ;;  %7766 = vmatmul.mubr.msk.f32.gmra.mxu0 %vm357_vm1, %v4592_v37  ;;  %v5130_v8 = vld [vmem:[#allocation3 + $0x73] sm:$0xff] }
 0x2d5   : > { %7734 = vmatprep.mubr.msk.f32.mxu1 %vm357_vm1, %v4325_v40  ;;  %7768 = vmatprep.mubr.msk.f32.mxu0 %vm357_vm1, %v4593_v38  ;;  %v4863_v37 = vld [vmem:[#allocation3 + $0x7a] sm:$0xff]  ;;  %v4864_v38 = vld [vmem:[#allocation3 + $0x82] sm:$0xff] }
 0x2d6   : > { %v5131_v40 = vld [vmem:[#allocation3 + $0x7b] sm:$0xff] }
 0x2d8   : > { %7735 = vmatmul.mubr.msk.f32.gmra.mxu1 %vm357_vm1, %v4326_v49  ;;  %7769 = vmatmul.mubr.msk.f32.gmra.mxu0 %vm357_vm1, %v4594_v4  ;;  %v5132_v49 = vld [vmem:[#allocation3 + $0x83] sm:$0xff] }
 0x2d9   : > { %7737 = vmatprep.mubr.msk.f32.mxu1 %vm357_vm1, %v4327_v17  ;;  %7771 = vmatprep.mubr.msk.f32.mxu0 %vm357_vm1, %v4595_v23  ;;  %v4865_v4 = vld [vmem:[#allocation3 + $0x8a] sm:$0xff]  ;;  %v4866_v23 = vld [vmem:[#allocation3 + $0x92] sm:$0xff] }
 0x2da   : > { %v5133_v17 = vld [vmem:[#allocation3 + $0x8b] sm:$0xff] }
 0x2dc   : > { %7738 = vmatmul.mubr.msk.f32.gmra.mxu1 %vm357_vm1, %v4328_v21  ;;  %7772 = vmatmul.mubr.msk.f32.gmra.mxu0 %vm357_vm1, %v4596_v31  ;;  %v5134_v21 = vld [vmem:[#allocation3 + $0x93] sm:$0xff] }
 0x2dd   : > { %7740 = vmatprep.mubr.msk.f32.mxu1 %vm357_vm1, %v4329_v50  ;;  %7774 = vmatprep.mubr.msk.f32.mxu0 %vm357_vm1, %v4597_v14  ;;  %v4867_v31 = vld [vmem:[#allocation3 + $0x9a] sm:$0xff]  ;;  %v4868_v14 = vld [vmem:[#allocation3 + $0xa2] sm:$0x3f] }
 0x2de   : > { %v5135_v50 = vld [vmem:[#allocation3 + $0x9b] sm:$0xff] }
 0x2e0   : > { %7741 = vmatmul.mubr.msk.f32.gmra.mxu1 %vm357_vm1, %v4330_v35  ;;  %7775 = vmatmul.mubr.msk.f32.gmra.mxu0 %vm357_vm1, %v4598_v63  ;;  %v5136_v35 = vld [vmem:[#allocation3 + $0xa3] sm:$0x3f] }
 0x2e1   : > { %7743 = vmatprep.mubr.msk.f32.mxu1 %vm357_vm1, %v4331_v20  ;;  %7777 = vmatprep.mubr.msk.f32.mxu0 %vm357_vm1, %v4599_v33 }
 0x2e4   : > { %7744 = vmatmul.mubr.msk.f32.gmra.mxu1 %vm357_vm1, %v4332_v60  ;;  %7778 = vmatmul.mubr.msk.f32.gmra.mxu0 %vm357_vm1, %v4600_v12 }
 0x2e5   : > { %7784 = vmatprep.mubr.msk.f32.mxu1 %vm357_vm1, %v4849_v19  ;;  %7818 = vmatprep.mubr.msk.f32.mxu0 %vm357_vm1, %v5117_v5 }
 0x2e8   : > { %7785 = vmatmul.mubr.msk.f32.vlgmr.msra.gmra.mxu1 %vm357_vm1, %v4850_v13  ;;  %7819 = vmatmul.mubr.msk.f32.vlgmr.msra.gmra.mxu0 %vm357_vm1, %v5118_v51 }
 0x2e9   : > { %7849 = vmatpush3.msra.mxu1 %v9311_v29  ;;  %7787 = vmatprep.mubr.msk.f32.mxu1 %vm357_vm1, %v4851_v24  ;;  %v4855_v29 = vld [vmem:[#allocation3 + $0x3a] sm:$0xff] }
 0x2ea   : > { %7821 = vmatprep.mubr.msk.f32.mxu0 %vm357_vm1, %v5119_v32  ;;  %7850 = vmatprep.subr.mxu1 %v6710_v48 }
 0x2eb   : > { %7851 = vmatpush3.msra.mxu1 %v6710_v48 }
 0x2ec   : > { %7788 = vmatmul.mubr.msk.f32.gmra.mxu1 %vm357_vm1, %v4852_v10  ;;  %7822 = vmatmul.mubr.msk.f32.gmra.mxu0 %vm357_vm1, %v5120_v41 }
 0x2ed   : > { %7790 = vmatprep.mubr.msk.f32.mxu1 %vm357_vm1, %v4853_v7  ;;  %7824 = vmatprep.mubr.msk.f32.mxu0 %vm357_vm1, %v5121_v53 }
 0x2f0   : > { %7791 = vmatmul.mubr.msk.f32.gmra.mxu1 %vm357_vm1, %v4854_v55  ;;  %7825 = vmatmul.mubr.msk.f32.gmra.mxu0 %vm357_vm1, %v5122_v27 }
 0x2f1   : > { %7793 = vmatprep.mubr.msk.f32.mxu1 %vm357_vm1, %v4855_v29  ;;  %7827 = vmatprep.mubr.msk.f32.mxu0 %vm357_vm1, %v5123_v58 }
 0x2f4   : > { %7794 = vmatmul.mubr.msk.f32.gmra.mxu1 %vm357_vm1, %v4856_v45  ;;  %7828 = vmatmul.mubr.msk.f32.gmra.mxu0 %vm357_vm1, %v5124_v52 }
 0x2f5   : > { %7796 = vmatprep.mubr.msk.f32.mxu1 %vm357_vm1, %v4857_v56  ;;  %7830 = vmatprep.mubr.msk.f32.mxu0 %vm357_vm1, %v5125_v54 }
 0x2f8   : > { %7797 = vmatmul.mubr.msk.f32.gmra.mxu1 %vm357_vm1, %v4858_v36  ;;  %7831 = vmatmul.mubr.msk.f32.gmra.mxu0 %vm357_vm1, %v5126_v6  ;;  %v6735_v36 = vld [vmem:[%s9911_s7 + $0x38] sm:$0xff] }
 0x2f9   : > { %7799 = vmatprep.mubr.msk.f32.mxu1 %vm357_vm1, %v4859_v26  ;;  %7833 = vmatprep.mubr.msk.f32.mxu0 %vm357_vm1, %v5127_v44  ;;  %v5736_v6 = vld [vmem:[%s9911_s7 + $0x18] sm:$0xff] }
 0x2fa   : > { %7882 = vmatprep.subr.mxu0 %v6735_v36  ;;  %7920 = vmatprep.subr.mxu1 %v5736_v6 }
 0x2fb   : > { %7883 = vmatpush3.msra.mxu0 %v6735_v36 }
 0x2fc   : > { %7800 = vmatmul.mubr.msk.f32.gmra.mxu1 %vm357_vm1, %v4860_v22  ;;  %7834 = vmatmul.mubr.msk.f32.gmra.mxu0 %vm357_vm1, %v5128_v25 }
 0x2fd   : > { %7802 = vmatprep.mubr.msk.f32.mxu1 %vm357_vm1, %v4861_v16  ;;  %7836 = vmatprep.mubr.msk.f32.mxu0 %vm357_vm1, %v5129_v61 }
 0x300   : > { %7803 = vmatmul.mubr.msk.f32.gmra.mxu1 %vm357_vm1, %v4862_v1  ;;  %7837 = vmatmul.mubr.msk.f32.gmra.mxu0 %vm357_vm1, %v5130_v8 }
 0x301   : > { %7805 = vmatprep.mubr.msk.f32.mxu1 %vm357_vm1, %v4863_v37  ;;  %7839 = vmatprep.mubr.msk.f32.mxu0 %vm357_vm1, %v5131_v40 }
 0x304   : > { %7806 = vmatmul.mubr.msk.f32.gmra.mxu1 %vm357_vm1, %v4864_v38  ;;  %7840 = vmatmul.mubr.msk.f32.gmra.mxu0 %vm357_vm1, %v5132_v49 }
 0x305   : > { %7808 = vmatprep.mubr.msk.f32.mxu1 %vm357_vm1, %v4865_v4  ;;  %7842 = vmatprep.mubr.msk.f32.mxu0 %vm357_vm1, %v5133_v17 }
 0x308   : > { %7809 = vmatmul.mubr.msk.f32.gmra.mxu1 %vm357_vm1, %v4866_v23  ;;  %7843 = vmatmul.mubr.msk.f32.gmra.mxu0 %vm357_vm1, %v5134_v21 }
 0x309   : > { %7811 = vmatprep.mubr.msk.f32.mxu1 %vm357_vm1, %v4867_v31  ;;  %7845 = vmatprep.mubr.msk.f32.mxu0 %vm357_vm1, %v5135_v50 }
 0x30c   : > { %7812 = vmatmul.mubr.msk.f32.gmra.mxu1 %vm357_vm1, %v4868_v14  ;;  %7846 = vmatmul.mubr.msk.f32.gmra.mxu0 %vm357_vm1, %v5136_v35 }
 0x30d   : > { %7852 = vmatprep.mubr.msk.f32.mxu1 %vm357_vm1, %v9095_v39  ;;  %v9429_v39 = vld [vmem:[%s9910_s6] ss:$0 sm:$0xff] }
 0x310   : > { %7853 = vmatmul.mubr.msk.f32.vlgmr.msra.gmra.mxu1 %vm357_vm1, %v9118_v34 }
 0x311   : > { %7855 = vmatprep.mubr.msk.f32.mxu1 %vm357_vm1, %v9120_v18  ;;  %7921 = vmatpush3.msra.mxu1 %v5736_v6 }
 0x314   : > { %7856 = vmatmul.mubr.msk.f32.gmra.mxu1 %vm357_vm1, %v9143_v42 }
 0x315   : > { %7858 = vmatprep.mubr.msk.f32.mxu1 %vm357_vm1, %v9145_v30  ;;  %v5403_v30 = vld [vmem:[#allocation3 + $0x9c] sm:$0xff] }
 0x318   : > { %7859 = vmatmul.mubr.msk.f32.gmra.mxu1 %vm357_vm1, %v9158_v28 }
 0x319   : > { %7861 = vmatprep.mubr.msk.f32.mxu1 %vm357_vm1, %v9160_v2 }
 0x31c   : > { %7862 = vmatmul.mubr.msk.f32.gmra.mxu1 %vm357_vm1, %v9170_v43 }
 0x31d   : > { %7864 = vmatprep.mubr.msk.f32.mxu1 %vm357_vm1, %v9172_v59 }
 0x320   : > { %7865 = vmatmul.mubr.msk.f32.gmra.mxu1 %vm357_vm1, %v9182_v3 }
 0x321   : > { %7867 = vmatprep.mubr.msk.f32.mxu1 %vm357_vm1, %v9184_v46  ;;  %v5404_v46 = vld [vmem:[#allocation3 + $0xa4] sm:$0x3f] }
 0x324   : > { %7868 = vmatmul.mubr.msk.f32.gmra.mxu1 %vm357_vm1, %v9195_v47 }
 0x325   : > { %7870 = vmatprep.mubr.msk.f32.mxu1 %vm357_vm1, %v9197_v0 }
 0x328   : > { %7871 = vmatmul.mubr.msk.f32.gmra.mxu1 %vm357_vm1, %v9207_v15 }
 0x329   : > { %7873 = vmatprep.mubr.msk.f32.mxu1 %vm357_vm1, %v9209_v11 }
 0x32c   : > { %7874 = vmatmul.mubr.msk.f32.gmra.mxu1 %vm357_vm1, %v9217_v57 }
 0x32d   : > { %7876 = vmatprep.mubr.msk.f32.mxu1 %vm357_vm1, %v9219_v62 }
 0x32e   : > { %v7582_v34 = vpop.f32.mrf.mxu1 }
 0x32f   : > { %v7616_v18 = vpop.f32.mrf.mxu0  ;;  %v3490_v42 = vadd.f32 %v7582_v34, %v9429_v39  ;;  %v6734_v34 = vld [vmem:[%s9911_s7 + $0x30] sm:$0xff] }
 0x330   : > { %7877 = vmatmul.mubr.msk.f32.gmra.mxu1 %vm357_vm1, %v9227_v9  ;;  %v9435_v28 = vpop.f32.mrf.mxu1  ;;  %7884 = vmatprep.subr.mxu0 %v6734_v34 }
 0x331   : > { %7879 = vmatprep.mubr.msk.f32.mxu1 %vm357_vm1, %v5403_v30  ;;  %v9437_v2 = vpop.f32.mrf.mxu0  ;;  %v9439_v43 = vadd.f32 %v7616_v18, %v3490_v42  ;;  %v5735_v18 = vld [vmem:[%s9911_s7 + $0x10] sm:$0xff]  ;;  %7885 = vmatpush3.msra.mxu0 %v6734_v34 }
 0x332   : > { %v7585_v59 = vpop.f32.mrf.mxu1  ;;  %7922 = vmatprep.subr.mxu1 %v5735_v18 }
 0x333   : > { %v7619_v3 = vpop.f32.mrf.mxu0  ;;  %v3492_v47 = vadd.f32 %v7585_v59, %v9429_v39  ;;  %7923 = vmatpush3.msra.mxu1 %v5735_v18 }
 0x334   : > { %7880 = vmatmul.mubr.msk.f32.gmra.mxu1 %vm357_vm1, %v5404_v46  ;;  %v9443_v0 = vpop.f32.mrf.mxu1  ;;  %vm5802_vm1 = vcmask 261120  }
 0x335   : > { %v9445_v15 = vpop.f32.mrf.mxu0  ;;  %v9447_v11 = vadd.f32 %v7619_v3, %v3492_v47 }
 0x336   : > { %v7588_v57 = vpop.f32.mrf.mxu1 }
 0x337   : > { %v7622_v62 = vpop.f32.mrf.mxu0  ;;  %v3494_v9 = vadd.f32 %v7588_v57, %v9429_v39  ;;  %v3489_v57 = vadd.f32 %v9429_v39, %v9435_v28 }
 0x338   : > { %v9450_v63 = vpop.f32.mrf.mxu1 }
 0x339   : > { %v9452_v20 = vpop.f32.mrf.mxu0  ;;  %v9454_v33 = vadd.f32 %v7622_v62, %v3494_v9 }
 0x33a   : > { %v7591_v60 = vpop.f32.mrf.mxu1 }
 0x33b   : > { %v7625_v12 = vpop.f32.mrf.mxu0  ;;  %v3496_v19 = vadd.f32 %v7591_v60, %v9429_v39 }
 0x33c   : > { %v9457_v5 = vpop.f32.mrf.mxu1 }
 0x33d   : > { %v9459_v13 = vpop.f32.mrf.mxu0  ;;  %v9461_v51 = vadd.f32 %v7625_v12, %v3496_v19 }
 0x33f   : > { %v7594_v48 = vpop.f32.mrf.mxu1 }
 0x340   : > { %v7628_v24 = vpop.f32.mrf.mxu0  ;;  %v3498_v32 = vadd.f32 %v7594_v48, %v9429_v39 }
 0x341   : > { %v3424_v10 = vpop.f32.mrf.mxu1 }
 0x342   : > { %v3698_v41 = vpop.f32.mrf.mxu0  ;;  %v9464_v7 = vadd.f32 %v7628_v24, %v3498_v32  ;;  %v3497_v53 = vadd.f32 %v9429_v39, %v3424_v10  ;;  %v3491_v24 = vadd.f32 %v9429_v39, %v9443_v0  ;;  %v5734_v0 = vld [vmem:[%s9911_s7 + $0x8] sm:$0xff] }
 0x343   : > { %v7597_v55 = vpop.f32.mrf.mxu1  ;;  %7924 = vmatprep.subr.mxu1 %v5734_v0 }
 0x344   : > { %v7631_v27 = vpop.f32.mrf.mxu0  ;;  %v9467_v29 = vadd.f32 %v3698_v41, %v3497_v53  ;;  %v3500_v58 = vadd.f32 %v7597_v55, %v9429_v39  ;;  %v3757_v41 = vadd.f32 %v9437_v2, %v3489_v57  ;;  %7925 = vmatpush3.msra.mxu1 %v5734_v0 }
 0x345   : > { %v3434_v45 = vpop.f32.mrf.mxu1 }
 0x346   : > { %v3708_v52 = vpop.f32.mrf.mxu0  ;;  %v9470_v56 = vadd.f32 %v7631_v27, %v3500_v58  ;;  %v3499_v54 = vadd.f32 %v9429_v39, %v3434_v45 }
 0x347   : > { %v7600_v26 = vpop.f32.mrf.mxu1 }
 0x348   : > { %v7634_v44 = vpop.f32.mrf.mxu0  ;;  %v9479_v22 = vadd.f32 %v3708_v52, %v3499_v54  ;;  %v3502_v25 = vadd.f32 %v7600_v26, %v9429_v39  ;;  %v6733_v52 = vld [vmem:[%s9911_s7 + $0x28] sm:$0xff]  ;;  %v3759_v54 = vadd.f32 %v9445_v15, %v3491_v24 }
 0x349   : > { %v3444_v16 = vpop.f32.mrf.mxu1  ;;  %7886 = vmatprep.subr.mxu0 %v6733_v52 }
 0x34a   : > { %v3718_v61 = vpop.f32.mrf.mxu0  ;;  %v9482_v1 = vadd.f32 %v7634_v44, %v3502_v25  ;;  %v3501_v8 = vadd.f32 %v9429_v39, %v3444_v16  ;;  %7887 = vmatpush3.msra.mxu0 %v6733_v52 }
 0x34b   : > { %v7603_v37 = vpop.f32.mrf.mxu1 }
 0x34c   : > { %v7637_v40 = vpop.f32.mrf.mxu0  ;;  %v9485_v38 = vadd.f32 %v3718_v61, %v3501_v8  ;;  %v3504_v49 = vadd.f32 %v7603_v37, %v9429_v39 }
 0x34d   : > { %v3454_v4 = vpop.f32.mrf.mxu1 }
 0x34e   : > { %v3728_v17 = vpop.f32.mrf.mxu0  ;;  %v9488_v23 = vadd.f32 %v7637_v40, %v3504_v49  ;;  %v3503_v21 = vadd.f32 %v9429_v39, %v3454_v4  ;;  %v3495_v40 = vadd.f32 %v9429_v39, %v9457_v5 }
 0x34f   : > { %v7606_v31 = vpop.f32.mrf.mxu1 }
 0x350   : > { %v7640_v50 = vpop.f32.mrf.mxu0  ;;  %v9491_v14 = vadd.f32 %v3728_v17, %v3503_v21  ;;  %v3506_v35 = vadd.f32 %v7606_v31, %v9429_v39 }
 0x351   : > { %v3464_v42 = vpop.f32.mrf.mxu1 }
 0x352   : > { %v3738_v30 = vpop.f32.mrf.mxu0  ;;  %v9500_v59 = vadd.f32 %v7640_v50, %v3506_v35  ;;  %v3505_v3 = vadd.f32 %v9429_v39, %v3464_v42  ;;  %v3763_v35 = vadd.f32 %v9459_v13, %v3495_v40 }
 0x353   : > { %v7609_v46 = vpop.f32.mrf.mxu1 }
 0x354   : > { %v7643_v47 = vpop.f32.mrf.mxu0  ;;  %v9505_v62 = vadd.f32 %v3738_v30, %v3505_v3  ;;  %v3508_v9 = vadd.f32 %v7609_v46, %v9429_v39 }
 0x355   : > { %v3474_v60 = vpop.f32.mrf.mxu1 }
 0x356   : > { %v3748_v12 = vpop.f32.mrf.mxu0  ;;  %v9508_v19 = vadd.f32 %v7643_v47, %v3508_v9  ;;  %v3507_v48 = vadd.f32 %v9429_v39, %v3474_v60 }
 0x357   : > { %v7650_v32 = vpop.f32.mrf.mxu1 }
 0x358   : > { %v7684_v10 = vpop.f32.mrf.mxu0  ;;  %v9514_v53 = vadd.f32 %v3748_v12, %v3507_v48  ;;  %v4026_v28 = vadd.f32 %v7650_v32, %v9439_v43  ;;  %v3493_v43 = vadd.f32 %v9429_v39, %v9450_v63  ;;  %v6732_v39 = vld [vmem:[%s9911_s7 + $0x20] sm:$0xff] }
 0x359   : > { %v3926_v55 = vpop.f32.mrf.mxu1  ;;  %7888 = vmatprep.subr.mxu0 %v6732_v39 }
 0x35a   : > { %v4194_v27 = vpop.f32.mrf.mxu0  ;;  %v9517_v58 = vadd.f32 %v7684_v10, %v4026_v28  ;;  %v4025_v45 = vadd.f32 %v3926_v55, %v3757_v41  ;;  %v3761_v37 = vadd.f32 %v9452_v20, %v3493_v43  ;;  %7889 = vmatpush3.msra.mxu0 %v6732_v39 }
 0x35c   : > { %v7653_v2 = vpop.f32.mrf.mxu1  ;;  %v7687_v36 = vpop.f32.mrf.mxu0  ;;  %v9528_v6 = vadd.f32 %v4194_v27, %v4025_v45 }
 0x35d   : > { %v4028_v26 = vadd.f32 %v7653_v2, %v9447_v11 }
 0x35e   : > { %v3936_v44 = vpop.f32.mrf.mxu1  ;;  %v4204_v25 = vpop.f32.mrf.mxu0 }
 0x35f   : > { %v9531_v16 = vadd.f32 %v7687_v36, %v4028_v26  ;;  %v4027_v61 = vadd.f32 %v3936_v44, %v3759_v54 }
 0x360   : > { %v7656_v8 = vpop.f32.mrf.mxu1  ;;  %v7690_v15 = vpop.f32.mrf.mxu0 }
 0x361   : > { %v9536_v49 = vadd.f32 %v4204_v25, %v4027_v61  ;;  %v4030_v63 = vadd.f32 %v7656_v8, %v9454_v33  ;;  %v5733_v33 = vld [vmem:[%s9911_s7] sm:$0xff] }
 0x362   : > { %v3946_v4 = vpop.f32.mrf.mxu1  ;;  %v4214_v11 = vpop.f32.mrf.mxu0  ;;  %7926 = vmatprep.subr.mxu1 %v5733_v33 }
 0x363   : > { %v9539_v17 = vadd.f32 %v7690_v15, %v4030_v63  ;;  %v4029_v21 = vadd.f32 %v3946_v4, %v3761_v37  ;;  %7927 = vmatpush3.msra.mxu1 %v5733_v33 }
 0x364   : > { %v7659_v31 = vpop.f32.mrf.mxu1  ;;  %v7693_v50 = vpop.f32.mrf.mxu0 }
 0x365   : > { %v9542_v34 = vadd.f32 %v4214_v11, %v4029_v21  ;;  %v4032_v20 = vadd.f32 %v7659_v31, %v9461_v51 }
 0x366   : > { %v3956_v5 = vpop.f32.mrf.mxu1  ;;  %v4224_v18 = vpop.f32.mrf.mxu0 }
 0x367   : > { %v9551_v42 = vadd.f32 %v7693_v50, %v4032_v20  ;;  %v4031_v30 = vadd.f32 %v3956_v5, %v3763_v35 }
 0x368   : > { %v7662_v13 = vpop.f32.mrf.mxu1  ;;  %v7696_v3 = vpop.f32.mrf.mxu0 }
 0x369   : > { %v9553_v51 = vadd.f32 %v4224_v18, %v4031_v30  ;;  %v4034_v46 = vadd.f32 %v7662_v13, %v9464_v7 }
 0x36a   : > { %v3966_v47 = vpop.f32.mrf.mxu1  ;;  %v4234_v57 = vpop.f32.mrf.mxu0 }
 0x36b   : > { %v9556_v9 = vadd.f32 %v7696_v3, %v4034_v46  ;;  %v4033_v60 = vadd.f32 %v3966_v47, %v9467_v29 }
 0x36c   : > { %v7665_v12 = vpop.f32.mrf.mxu1  ;;  %v7699_v48 = vpop.f32.mrf.mxu0 }
 0x36d   : > { %v9559_v24 = vadd.f32 %v4234_v57, %v4033_v60  ;;  %v4036_v32 = vadd.f32 %v7665_v12, %v9470_v56 }
 0x36e   : > { %v3976_v10 = vpop.f32.mrf.mxu1  ;;  %v4244_v41 = vpop.f32.mrf.mxu0 }
 0x36f   : > { %v9562_v28 = vadd.f32 %v7699_v48, %v4036_v32  ;;  %v4035_v55 = vadd.f32 %v3976_v10, %v9479_v22 }
 0x370   : > { %v7668_v27 = vpop.f32.mrf.mxu1  ;;  %v7702_v7 = vpop.f32.mrf.mxu0 }
 0x371   : > { %v9565_v45 = vadd.f32 %v4244_v41, %v4035_v55  ;;  %v4038_v52 = vadd.f32 %v7668_v27, %v9482_v1 }
 0x372   : > { %v3986_v0 = vpop.f32.mrf.mxu1  ;;  %v4254_v29 = vpop.f32.mrf.mxu0 }
 0x373   : > { %v9568_v54 = vadd.f32 %v7702_v7, %v4038_v52  ;;  %v4037_v2 = vadd.f32 %v3986_v0, %v9485_v38 }
 0x374   : > { %v7671_v36 = vpop.f32.mrf.mxu1  ;;  %v7705_v56 = vpop.f32.mrf.mxu0 }
 0x375   : > { %v9571_v43 = vadd.f32 %v4254_v29, %v4037_v2  ;;  %v4040_v26 = vadd.f32 %v7671_v36, %v9488_v23 }
 0x376   : > { %v3996_v44 = vpop.f32.mrf.mxu1  ;;  %v4264_v22 = vpop.f32.mrf.mxu0 }
 0x377   : > { %v9574_v25 = vadd.f32 %v7705_v56, %v4040_v26  ;;  %v4039_v61 = vadd.f32 %v3996_v44, %v9491_v14 }
 0x378   : > { %v7674_v8 = vpop.f32.mrf.mxu1  ;;  %v7708_v1 = vpop.f32.mrf.mxu0 }
 0x379   : > { %v4307_v15 = vadd.f32 %v4264_v22, %v4039_v61  ;;  %v4042_v37 = vadd.f32 %v7674_v8, %v9500_v59 }
 0x37a   : > { %v4006_v40 = vpop.f32.mrf.mxu1  ;;  %v4274_v63 = vpop.f32.mrf.mxu0 }
 0x37b   : > { %v4310_v38 = vadd.f32 %v7708_v1, %v4042_v37  ;;  %v4041_v4 = vadd.f32 %v4006_v40, %v9505_v62 }
 0x37c   : > { %v7677_v11 = vpop.f32.mrf.mxu1  ;;  %v7711_v21 = vpop.f32.mrf.mxu0 }
 0x37d   : > { %v4309_v31 = vadd.f32 %v4274_v63, %v4041_v4  ;;  %v4044_v23 = vadd.f32 %v7677_v11, %v9508_v19 }
 0x37e   : > { %v4016_v50 = vpop.f32.mrf.mxu1  ;;  %v4284_v35 = vpop.f32.mrf.mxu0 }
 0x37f   : > { %v4312_v20 = vadd.f32 %v7711_v21, %v4044_v23  ;;  %v4043_v14 = vadd.f32 %v4016_v50, %v9514_v53 }
 0x380   : > { %v7718_v39 = vpop.f32.mrf.mxu1  ;;  %v9581_v33 = vpop.f32.mrf.mxu0 }
 0x381   : > { %v4311_v5 = vadd.f32 %v4284_v35, %v4043_v14  ;;  %v9584_v59 = vadd.f32 %v7718_v39, %v9517_v58 }
 0x382   : > { %v4462_v18 = vpop.f32.mrf.mxu1  ;;  %v9586_v30 = vpop.f32.mrf.mxu0 }
 0x383   : > { %v9589_v62 = vadd.f32 %v4462_v18, %v9528_v6 }
 0x384   : > { %v7721_v13 = vpop.f32.mrf.mxu1  ;;  %v9591_v19 = vpop.f32.mrf.mxu0 }
 0x385   : > { %v9594_v3 = vadd.f32 %v7721_v13, %v9531_v16 }
 0x386   : > { %v4472_v53 = vpop.f32.mrf.mxu1  ;;  %v9596_v46 = vpop.f32.mrf.mxu0 }
 0x387   : > { %v9599_v47 = vadd.f32 %v4472_v53, %v9536_v49 }
 0x388   : > { %v7724_v58 = vpop.f32.mrf.mxu1  ;;  %v9601_v57 = vpop.f32.mrf.mxu0 }
 0x389   : > { %v9604_v60 = vadd.f32 %v7724_v58, %v9539_v17 }
 0x38a   : > { %v4482_v6 = vpop.f32.mrf.mxu1  ;;  %v9606_v12 = vpop.f32.mrf.mxu0 }
 0x38b   : > { %v9609_v48 = vadd.f32 %v4482_v6, %v9542_v34 }
 0x38c   : > { %v7727_v16 = vpop.f32.mrf.mxu1  ;;  %v9611_v32 = vpop.f32.mrf.mxu0 }
 0x38d   : > { %v9614_v10 = vadd.f32 %v7727_v16, %v9551_v42 }
 0x38e   : > { %v4492_v49 = vpop.f32.mrf.mxu1  ;;  %v9616_v41 = vpop.f32.mrf.mxu0 }
 0x38f   : > { %v9619_v55 = vadd.f32 %v4492_v49, %v9553_v51 }
 0x390   : > { %v7730_v17 = vpop.f32.mrf.mxu1  ;;  %v9621_v27 = vpop.f32.mrf.mxu0 }
 0x391   : > { %v9624_v7 = vadd.f32 %v7730_v17, %v9556_v9 }
 0x392   : > { %v4502_v34 = vpop.f32.mrf.mxu1  ;;  %v9626_v52 = vpop.f32.mrf.mxu0 }
 0x393   : > { %v9629_v0 = vadd.f32 %v4502_v34, %v9559_v24 }
 0x394   : > { %v7733_v42 = vpop.f32.mrf.mxu1  ;;  %v9631_v29 = vpop.f32.mrf.mxu0 }
 0x395   : > { %v9634_v2 = vadd.f32 %v7733_v42, %v9562_v28 }
 0x396   : > { %v4512_v51 = vpop.f32.mrf.mxu1  ;;  %v9636_v36 = vpop.f32.mrf.mxu0 }
 0x397   : > { %v9639_v56 = vadd.f32 %v4512_v51, %v9565_v45 }
 0x398   : > { %v7736_v9 = vpop.f32.mrf.mxu1  ;;  %v9641_v26 = vpop.f32.mrf.mxu0 }
 0x399   : > { %v9644_v44 = vadd.f32 %v7736_v9, %v9568_v54 }
 0x39a   : > { %v4522_v24 = vpop.f32.mrf.mxu1  ;;  %v9646_v22 = vpop.f32.mrf.mxu0 }
 0x39b   : > { %v9649_v61 = vadd.f32 %v4522_v24, %v9571_v43 }
 0x39c   : > { %v7739_v28 = vpop.f32.mrf.mxu1  ;;  %v9651_v8 = vpop.f32.mrf.mxu0 }
 0x39d   : > { %v9654_v1 = vadd.f32 %v7739_v28, %v9574_v25 }
 0x39e   : > { %v4532_v45 = vpop.f32.mrf.mxu1  ;;  %v9656_v37 = vpop.f32.mrf.mxu0 }
 0x39f   : > { %v9658_v40 = vadd.f32 %v4532_v45, %v4307_v15 }
 0x3a0   : > { %v7742_v63 = vpop.f32.mrf.mxu1  ;;  %v9660_v54 = vpop.f32.mrf.mxu0 }
 0x3a1   : > { %v9662_v4 = vadd.f32 %v7742_v63, %v4310_v38 }
 0x3a2   : > { %v4542_v11 = vpop.f32.mrf.mxu1  ;;  %v9664_v21 = vpop.f32.mrf.mxu0 }
 0x3a3   : > { %10016 = vst [vmem:[#allocation10_spill] sm:$0xff] %v9664_v21  ;;  %v9666_v43 = vadd.f32 %v4542_v11, %v4309_v31  ;;  %v4829_v21 = vadd.f32 %v9586_v30, %v9589_v62  ;;  %v4834_v30 = vadd.f32 %v9601_v57, %v9604_v60  ;;  %v4835_v60 = vadd.f32 %v9616_v41, %v9619_v55 }
 0x3a4   : > { %v7745_v23 = vpop.f32.mrf.mxu1  ;;  %v9668_v50 = vpop.f32.mrf.mxu0  ;;  %v4840_v41 = vadd.f32 %v9631_v29, %v9634_v2  ;;  %v4839_v55 = vadd.f32 %v9636_v36, %v9639_v56  ;;  %v4843_v2 = vadd.f32 %v9656_v37, %v9658_v40 }
 0x3a5   : > { %10017 = vst [vmem:[#allocation16_spill] sm:$0xff] %v9666_v43  ;;  %10018 = vst [vmem:[#allocation4_spill] sm:$0xff] %v9668_v50  ;;  %v9670_v25 = vadd.f32 %v7745_v23, %v4312_v20  ;;  %v4830_v50 = vadd.f32 %v9581_v33, %v9584_v59 }
 0x3a6   : > { %v4552_v35 = vpop.f32.mrf.mxu1  ;;  %v9672_v14 = vpop.f32.mrf.mxu0 }
 0x3a7   : > { %10019 = vst [vmem:[#allocation19_spill] sm:$0xff] %v9670_v25  ;;  %10020 = vst [vmem:[#allocation46_spill] sm:$0xff] %v9672_v14  ;;  %v9674_v15 = vadd.f32 %v4552_v35, %v4311_v5 }
 0x3a8   : > { %v7786_v39 = vpop.f32.mrf.mxu1  ;;  %v7820_v18 = vpop.f32.mrf.mxu0 }
 0x3a9   : > { %10021 = vst [vmem:[#allocation18_spill] sm:$0xff] %v9674_v15  ;;  %v5098_v43 = vadd.f32 %v7786_v39, %v4830_v50 }
 0x3aa   : > { %v4998_v13 = vpop.f32.mrf.mxu1  ;;  %v5266_v38 = vpop.f32.mrf.mxu0 }
 0x3ab   : > { %v5366_v33 = vadd.f32 %v7820_v18, %v5098_v43 }
 0x3ac   : > { %v7789_v53 = vpop.f32.mrf.mxu1  ;;  %v7823_v6 = vpop.f32.mrf.mxu0 }
 0x3ae   : > { %v5008_v58 = vpop.f32.mrf.mxu1  ;;  %v5276_v49 = vpop.f32.mrf.mxu0 }
 0x3b0   : > { %v7792_v16 = vpop.f32.mrf.mxu1  ;;  %v7826_v42 = vpop.f32.mrf.mxu0 }
 0x3b2   : > { %v5018_v31 = vpop.f32.mrf.mxu1  ;;  %v5286_v9 = vpop.f32.mrf.mxu0 }
 0x3b4   : > { %v7795_v17 = vpop.f32.mrf.mxu1  ;;  %v7829_v28 = vpop.f32.mrf.mxu0 }
 0x3b6   : > { %v5028_v34 = vpop.f32.mrf.mxu1  ;;  %v9686_v11 = vpop.f32.mrf.mxu0 }
 0x3b8   : > { %v7798_v20 = vpop.f32.mrf.mxu1  ;;  %v9692_v14 = vpop.f32.mrf.mxu0 }
 0x3b9   : > { %10027 = vst [vmem:[#allocation48_spill] sm:$0xff] %v9692_v14 }
 0x3ba   : > { %v9676_v51 = vpop.f32.mrf.mxu1 }
 0x3bc   : > { %v9678_v24 = vpop.f32.mrf.mxu1 }
 0x3be   : > { %v9680_v5 = vpop.f32.mrf.mxu1 }
 0x3bf   : > { %10022 = vst [vmem:[#allocation5_spill] sm:$0xff] %v9680_v5 }
 0x3c0   : > { %v9682_v45 = vpop.f32.mrf.mxu1 }
 0x3c1   : > { %10023 = vst [vmem:[#allocation6_spill] sm:$0xff] %v9682_v45 }
 0x3c2   : > { %v9684_v63 = vpop.f32.mrf.mxu1 }
 0x3c3   : > { %10024 = vst [vmem:[#allocation22_spill] sm:$0xff] %v9684_v63  ;;  %v9702_v63 = vpop.f32.mrf.mxu0 }
 0x3c4   : > { %v9688_v23 = vpop.f32.mrf.mxu1 }
 0x3c5   : > { %10025 = vst [vmem:[#allocation17_spill] sm:$0xff] %v9688_v23  ;;  %v5097_v23 = vadd.f32 %v4998_v13, %v4829_v21  ;;  %v5102_v13 = vadd.f32 %v7792_v16, %v4834_v30  ;;  %v10037_v30 = vld [vmem:[#allocation4_spill] sm:$0xff] }
 0x3c6   : > { %v9690_v35 = vpop.f32.mrf.mxu1 }
 0x3c7   : > { %10026 = vst [vmem:[#allocation44_spill] sm:$0xff] %v9690_v35  ;;  %v4832_v35 = vadd.f32 %v9591_v19, %v9594_v3  ;;  %v5365_v62 = vadd.f32 %v5266_v38, %v5097_v23  ;;  %v4833_v19 = vadd.f32 %v9606_v12, %v9609_v48  ;;  %v5370_v12 = vadd.f32 %v7826_v42, %v5102_v13 }
 0x3c8   : > { %v9694_v15 = vpop.f32.mrf.mxu1 }
 0x3c9   : > { %10028 = vst [vmem:[#allocation23_spill] sm:$0xff] %v9694_v15  ;;  %v4831_v15 = vadd.f32 %v9596_v46, %v9599_v47  ;;  %v5100_v59 = vadd.f32 %v7789_v53, %v4832_v35  ;;  %v4836_v47 = vadd.f32 %v9611_v32, %v9614_v10  ;;  %v5101_v53 = vadd.f32 %v5018_v31, %v4833_v19  ;;  %v10035_v35 = vld [vmem:[#allocation48_spill] sm:$0xff] }
 0x3ca   : > { %v9698_v25 = vpop.f32.mrf.mxu1  ;;  %v5103_v32 = vadd.f32 %v5028_v34, %v4835_v60  ;;  %v4837_v31 = vadd.f32 %v9626_v52, %v9629_v0  ;;  %v4841_v34 = vadd.f32 %v9646_v22, %v9649_v61  ;;  %v4844_v52 = vadd.f32 %v9651_v8, %v9654_v1  ;;  %v10031_v22 = vld [vmem:[#allocation5_spill] sm:$0xff] }
 0x3cb   : > { %10029 = vst [vmem:[#allocation27_spill] sm:$0xff] %v9698_v25  ;;  %v9712_v25 = vpop.f32.mrf.mxu0  ;;  %v5099_v50 = vadd.f32 %v5008_v58, %v4831_v15  ;;  %v5368_v21 = vadd.f32 %v7823_v6, %v5100_v59  ;;  %v5104_v48 = vadd.f32 %v7795_v17, %v4836_v47  ;;  %v4838_v6 = vadd.f32 %v9621_v27, %v9624_v7  ;;  %v10036_v59 = vld [vmem:[#allocation19_spill] sm:$0xff]  ;;  %v10041_v47 = vld [vmem:[#allocation46_spill] sm:$0xff] }
 0x3cc   : > { %v9704_v45 = vpop.f32.mrf.mxu1  ;;  %v4842_v7 = vadd.f32 %v9641_v26, %v9644_v44  ;;  %v5105_v0 = vadd.f32 %v9676_v51, %v4837_v31  ;;  %v5371_v36 = vadd.f32 %v9686_v11, %v5103_v32  ;;  %v4846_v26 = vadd.f32 %v9660_v54, %v9662_v4  ;;  %v10033_v51 = vld [vmem:[#allocation16_spill] sm:$0xff]  ;;  %v10038_v4 = vld [vmem:[#allocation22_spill] sm:$0xff] }
 0x3cd   : > { %v5367_v18 = vadd.f32 %v5276_v49, %v5099_v50  ;;  %v5372_v17 = vadd.f32 %v7829_v28, %v5104_v48  ;;  %v5106_v42 = vadd.f32 %v7798_v20, %v4838_v6  ;;  %v5108_v44 = vadd.f32 %v9678_v24, %v4840_v41  ;;  %v10032_v20 = vld [vmem:[#allocation6_spill] sm:$0xff]  ;;  %v10039_v50 = vld [vmem:[#allocation17_spill] sm:$0xff] }
 0x3ce   : > { %v9708_v14 = vpop.f32.mrf.mxu1  ;;  %v5107_v61 = vadd.f32 %v10031_v22, %v4839_v55  ;;  %v5110_v8 = vadd.f32 %v10032_v20, %v4842_v7  ;;  %v5373_v54 = vadd.f32 %v9702_v63, %v5105_v0  ;;  %v5109_v24 = vadd.f32 %v10038_v4, %v4841_v34  ;;  %v10042_v6 = vld [vmem:[#allocation44_spill] sm:$0xff] }
 0x3cf   : > { %10030 = vst [vmem:[#allocation7_spill] sm:$0xff] %v9708_v14  ;;  %v9718_v14 = vpop.f32.mrf.mxu0  ;;  %v5374_v37 = vadd.f32 %v10035_v35, %v5106_v42 }
 0x3d0   : > { %v7854_v5 = vpop.f32.mrf.mxu1 }
 0x3d1   : > { %v5634_v39 = vadd.f32 %v7854_v5, %v5366_v33  ;;  %v7838_v38 = vpop.f32.mrf.mxu0  ;;  %v5369_v5 = vadd.f32 %v5286_v9, %v5101_v53  ;;  %v10034_v9 = vld [vmem:[#allocation10_spill] sm:$0xff]  ;;  %v5375_v53 = vadd.f32 %v9718_v14, %v5107_v61 }
 0x3d2   : > { %v5534_v3 = vpop.f32.mrf.mxu1  ;;  %v4845_v28 = vadd.f32 %v10034_v9, %v10033_v51 }
 0x3d3   : > { %8010 = vtanh.f32 %v5634_v39  ;;  %v5633_v46 = vadd.f32 %v5534_v3, %v5365_v62  ;;  %v5326_v23 = vpop.f32.mrf.mxu0  ;;  %v9752_v62 = vadd.f32 %v10037_v30, %v10036_v59  ;;  %v5112_v39 = vadd.f32 %v10039_v50, %v4844_v52 }
 0x3d4   : > { %v7857_v43 = vpop.f32.mrf.mxu1 }
 0x3d5   : > { %8012 = vtanh.f32 %v5633_v46  ;;  %v5636_v57 = vadd.f32 %v7857_v43, %v5368_v21  ;;  %v7841_v40 = vpop.f32.mrf.mxu0  ;;  %v10040_v46 = vld [vmem:[#allocation18_spill] sm:$0xff] }
 0x3d6   : > { %v5544_v15 = vpop.f32.mrf.mxu1  ;;  %v9759_v43 = vadd.f32 %v10041_v47, %v10040_v46  ;;  %v5380_v41 = vadd.f32 %v7841_v40, %v5112_v39  ;;  %v5116_v40 = vadd.f32 %v9704_v45, %v9752_v62 }
 0x3d7   : > { %8014 = vtanh.f32 %v5636_v57  ;;  %v5635_v58 = vadd.f32 %v5544_v15, %v5367_v18  ;;  %v5376_v18 = vadd.f32 %v9712_v25, %v5108_v44  ;;  %v5378_v57 = vadd.f32 %v7838_v38, %v5110_v8  ;;  %v5336_v60 = vpop.f32.mrf.mxu0 }
 0x3d8   : > { %v7860_v16 = vpop.f32.mrf.mxu1 }
 0x3d9   : > { %8016 = vtanh.f32 %v5635_v58  ;;  %v5638_v10 = vadd.f32 %v7860_v16, %v5370_v12  ;;  %v5377_v58 = vadd.f32 %v5326_v23, %v5109_v24  ;;  %v5111_v16 = vadd.f32 %v10042_v6, %v4843_v2  ;;  %v7844_v23 = vpop.f32.mrf.mxu0 }
 0x3da   : > { %v5554_v49 = vpop.f32.mrf.mxu1 }
 0x3db   : > { %8018 = vtanh.f32 %v5638_v10  ;;  %v5637_v27 = vadd.f32 %v5554_v49, %v5369_v5  ;;  %v10043_v5 = vld [vmem:[#allocation23_spill] sm:$0xff]  ;;  %v5379_v52 = vadd.f32 %v5336_v60, %v5111_v16  ;;  %v5346_v9 = vpop.f32.mrf.mxu0 }
 0x3dc   : > { %v7863_v29 = vpop.f32.mrf.mxu1  ;;  %v5114_v32 = vadd.f32 %v10043_v5, %v4846_v26  ;;  %v10045_v60 = vld [vmem:[#allocation7_spill] sm:$0xff] }
 0x3dd   : > { %8020 = vtanh.f32 %v5637_v27  ;;  %v5640_v56 = vadd.f32 %v7863_v29, %v5372_v17 }
 0x3de   : > { %v5564_v1 = vpop.f32.mrf.mxu1  ;;  %v5382_v0 = vadd.f32 %v7844_v23, %v5114_v32 }
 0x3df   : > { %8022 = vtanh.f32 %v5640_v56  ;;  %v5639_v11 = vadd.f32 %v5564_v1, %v5371_v36  ;;  %v10044_v56 = vld [vmem:[#allocation27_spill] sm:$0xff] }
 0x3e0   : > { %v8011_v33 = vpop.eup %8010  ;;  %v7866_v19 = vpop.f32.mrf.mxu1  ;;  %v5113_v26 = vadd.f32 %v10044_v56, %v4845_v28 }
 0x3e1   : > { %8024 = vtanh.f32 %v5639_v11  ;;  %v5642_v3 = vadd.f32 %v7866_v19, %v5374_v37  ;;  %vm5674_vm0 = vcmp.ge.f32.partialorder %v8011_v33, 0.0  ;;  %v5694_v21 = vmul.f32 0.01, %v8011_v33 }
 0x3e2   : > { %v8013_v13 = vpop.eup %8012  ;;  %v5574_v63 = vpop.f32.mrf.mxu1 }
 0x3e3   : > { %8026 = vtanh.f32 %v5642_v3  ;;  %v5641_v15 = vadd.f32 %v5574_v63, %v5373_v54  ;;  %vm5673_vm2 = vcmp.ge.f32.partialorder %v8013_v13, 0.0  ;;  %v5693_v12 = vmul.f32 0.01, %v8013_v13  ;;  %v7847_v3 = vpop.f32.mrf.mxu0 }
 0x3e4   : > { %v8015_v48 = vpop.eup %8014  ;;  %v7869_v10 = vpop.f32.mrf.mxu1  ;;  %v5714_v31 = vsel %vm5674_vm0, %v8011_v33, %v5694_v21  ;;  %v5381_v54 = vadd.f32 %v5346_v9, %v5113_v26  ;;  %v5384_v47 = vadd.f32 %v7847_v3, %v5116_v40 }
 0x3e5   : > { %8028 = vtanh.f32 %v5641_v15  ;;  %v5644_v25 = vadd.f32 %v7869_v10, %v5376_v18  ;;  %v5713_v14 = vsel %vm5673_vm2, %v8013_v13, %v5693_v12  ;;  %v5764_v17 = vrot.slane %v5714_v31, 1 }
 0x3e6   : > { %v8017_v38 = vpop.eup %8016  ;;  %v5584_v55 = vpop.f32.mrf.mxu1  ;;  %v5763_v49 = vrot.slane %v5713_v14, 1  ;;  %7928 = vmatprep.mubr.msk.f32.mxu1 %vm5802_vm1, %v5713_v14  ;;  %vm5676_vm4 = vcmp.ge.f32.partialorder %v8015_v48, 0.0  ;;  %v5696_v42 = vmul.f32 0.01, %v8015_v48  ;;  %v5115_v15 = vadd.f32 %v10045_v60, %v9759_v43 }
 0x3e7   : > { %8030 = vtanh.f32 %v5644_v25  ;;  %v5643_v27 = vadd.f32 %v5584_v55, %v5375_v53  ;;  %7929 = vmatmul.mubr.msk.f32.vlgmr.msra.gmra.mxu1 %vm5802_vm1, %v5714_v31  ;;  %vm5675_vm5 = vcmp.ge.f32.partialorder %v8017_v38, 0.0  ;;  %v5695_v7 = vmul.f32 0.01, %v8017_v38 }
 0x3e8   : > { %v8019_v34 = vpop.eup %8018  ;;  %v7872_v29 = vpop.f32.mrf.mxu1  ;;  %v5765_v2 = vsel %vm5762_vm3, %v5763_v49, %v5764_v17  ;;  %v5716_v36 = vsel %vm5676_vm4, %v8015_v48, %v5696_v42 }
 0x3e9   : > { %8032 = vtanh.f32 %v5643_v27  ;;  %v5646_v44 = vadd.f32 %v7872_v29, %v5378_v57  ;;  %7890 = vmatprep.mubr.msk.f32.mxu0 %vm5802_vm1, %v5765_v2  ;;  %v5715_v22 = vsel %vm5675_vm5, %v8017_v38, %v5695_v7  ;;  %v5768_v1 = vrot.slane %v5716_v36, 1 }
 0x3ea   : > { %v8021_v61 = vpop.eup %8020  ;;  %v5594_v20 = vpop.f32.mrf.mxu1  ;;  %v5766_v8 = vrot.slane %v5715_v22, 1  ;;  %7931 = vmatprep.mubr.msk.f32.mxu1 %vm5802_vm1, %v5715_v22  ;;  %vm5678_vm6 = vcmp.ge.f32.partialorder %v8019_v34, 0.0  ;;  %v5698_v51 = vmul.f32 0.01, %v8019_v34 }
 0x3eb   : > { %8034 = vtanh.f32 %v5646_v44  ;;  %v5645_v35 = vadd.f32 %v5594_v20, %v5377_v58  ;;  %7932 = vmatmul.mubr.msk.f32.gmra.mxu1 %vm5802_vm1, %v5716_v36  ;;  %vm5677_vm7 = vcmp.ge.f32.partialorder %v8021_v61, 0.0  ;;  %v5697_v28 = vmul.f32 0.01, %v8021_v61 }
 0x3ec   : > { %v8023_v37 = vpop.eup %8022  ;;  %v5767_v11 = vsel %vm5762_vm3, %v5764_v17, %v5766_v8  ;;  %v7875_v33 = vpop.f32.mrf.mxu1  ;;  %v5769_v59 = vsel %vm5762_vm3, %v5766_v8, %v5768_v1  ;;  %v5718_v30 = vsel %vm5678_vm6, %v8019_v34, %v5698_v51 }
 0x3ed   : > { %8036 = vtanh.f32 %v5645_v35  ;;  %v5648_v4 = vadd.f32 %v7875_v33, %v5380_v41  ;;  %7891 = vmatmul.mubr.msk.f32.vlgmr.msra.gmra.mxu0 %vm5802_vm1, %v5767_v11  ;;  %v5717_v24 = vsel %vm5677_vm7, %v8021_v61, %v5697_v28  ;;  %v5772_v45 = vrot.slane %v5718_v30, 1  ;;  %v5356_v41 = vpop.f32.mrf.mxu0 }
 0x3ee   : > { %v8025_v50 = vpop.eup %8024  ;;  %v5604_v39 = vpop.f32.mrf.mxu1  ;;  %7893 = vmatprep.mubr.msk.f32.mxu0 %vm5802_vm1, %v5769_v59  ;;  %v5770_v19 = vrot.slane %v5717_v24, 1  ;;  %7934 = vmatprep.mubr.msk.f32.mxu1 %vm5802_vm1, %v5717_v24  ;;  %vm5680_vm8 = vcmp.ge.f32.partialorder %v8023_v37, 0.0  ;;  %v5700_v62 = vmul.f32 0.01, %v8023_v37  ;;  %v5383_v49 = vadd.f32 %v5356_v41, %v5115_v15 }
 0x3ef   : > { %8038 = vtanh.f32 %v5648_v4  ;;  %v5647_v21 = vadd.f32 %v5604_v39, %v5379_v52  ;;  %7935 = vmatmul.mubr.msk.f32.gmra.mxu1 %vm5802_vm1, %v5718_v30  ;;  %vm5679_vm9 = vcmp.ge.f32.partialorder %v8025_v50, 0.0  ;;  %v5699_v13 = vmul.f32 0.01, %v8025_v50 }
 0x3f0   : > { %v8027_v46 = vpop.eup %8026  ;;  %v7878_v18 = vpop.f32.mrf.mxu1  ;;  %v5771_v53 = vsel %vm5762_vm3, %v5768_v1, %v5770_v19  ;;  %v5773_v57 = vsel %vm5762_vm3, %v5770_v19, %v5772_v45  ;;  %v5720_v63 = vsel %vm5680_vm8, %v8023_v37, %v5700_v62 }
 0x3f1   : > { %8040 = vtanh.f32 %v5647_v21  ;;  %v5650_v12 = vadd.f32 %v7878_v18, %v5382_v0  ;;  %7894 = vmatmul.mubr.msk.f32.gmra.mxu0 %vm5802_vm1, %v5771_v53  ;;  %v5719_v48 = vsel %vm5679_vm9, %v8025_v50, %v5699_v13  ;;  %v5776_v5 = vrot.slane %v5720_v63, 1 }
 0x3f2   : > { %v8029_v58 = vpop.eup %8028  ;;  %v5614_v6 = vpop.f32.mrf.mxu1  ;;  %7896 = vmatprep.mubr.msk.f32.mxu0 %vm5802_vm1, %v5773_v57  ;;  %v5774_v16 = vrot.slane %v5719_v48, 1  ;;  %7937 = vmatprep.mubr.msk.f32.mxu1 %vm5802_vm1, %v5719_v48  ;;  %vm5682_vm10 = vcmp.ge.f32.partialorder %v8027_v46, 0.0  ;;  %v5702_v32 = vmul.f32 0.01, %v8027_v46 }
 0x3f3   : > { %8042 = vtanh.f32 %v5650_v12  ;;  %v5649_v10 = vadd.f32 %v5614_v6, %v5381_v54  ;;  %7938 = vmatmul.mubr.msk.f32.gmra.mxu1 %vm5802_vm1, %v5720_v63  ;;  %vm5681_vm11 = vcmp.ge.f32.partialorder %v8029_v58, 0.0  ;;  %v5701_v43 = vmul.f32 0.01, %v8029_v58 }
 0x3f4   : > { %v8031_v31 = vpop.eup %8030  ;;  %v7881_v25 = vpop.f32.mrf.mxu1  ;;  %v5775_v14 = vsel %vm5762_vm3, %v5772_v45, %v5774_v16  ;;  %v5777_v38 = vsel %vm5762_vm3, %v5774_v16, %v5776_v5  ;;  %v5722_v55 = vsel %vm5682_vm10, %v8027_v46, %v5702_v32 }
 0x3f5   : > { %8044 = vtanh.f32 %v5649_v10  ;;  %v5652_v17 = vadd.f32 %v7881_v25, %v5384_v47  ;;  %7897 = vmatmul.mubr.msk.f32.gmra.mxu0 %vm5802_vm1, %v5775_v14  ;;  %v5721_v42 = vsel %vm5681_vm11, %v8029_v58, %v5701_v43  ;;  %v5780_v34 = vrot.slane %v5722_v55, 1 }
 0x3f6   : > { %v8033_v23 = vpop.eup %8032  ;;  %v5624_v27 = vpop.f32.mrf.mxu1  ;;  %7899 = vmatprep.mubr.msk.f32.mxu0 %vm5802_vm1, %v5777_v38  ;;  %v5778_v7 = vrot.slane %v5721_v42, 1  ;;  %7940 = vmatprep.mubr.msk.f32.mxu1 %vm5802_vm1, %v5721_v42  ;;  %vm5684_vm12 = vcmp.ge.f32.partialorder %v8031_v31, 0.0  ;;  %v5704_v52 = vmul.f32 0.01, %v8031_v31  ;;  %v9833_v38 = vld [vmem:[%s9912_s8] ss:$0 sm:$0xff] }
 0x3f7   : > { %8046 = vtanh.f32 %v5652_v17  ;;  %v5651_v0 = vadd.f32 %v5624_v27, %v5383_v49  ;;  %7941 = vmatmul.mubr.msk.f32.gmra.mxu1 %vm5802_vm1, %v5722_v55  ;;  %vm5683_vm13 = vcmp.ge.f32.partialorder %v8033_v23, 0.0  ;;  %v5703_v29 = vmul.f32 0.01, %v8033_v23 }
 0x3f8   : > { %v8035_v2 = vpop.eup %8034  ;;  %v5779_v36 = vsel %vm5762_vm3, %v5776_v5, %v5778_v7  ;;  %v5781_v56 = vsel %vm5762_vm3, %v5778_v7, %v5780_v34  ;;  %v5724_v26 = vsel %vm5684_vm12, %v8031_v31, %v5704_v52 }
 0x3f9   : > { %8048 = vtanh.f32 %v5651_v0  ;;  %7900 = vmatmul.mubr.msk.f32.gmra.mxu0 %vm5802_vm1, %v5779_v36  ;;  %v5723_v44 = vsel %vm5683_vm13, %v8033_v23, %v5703_v29  ;;  %vm5686_vm14 = vcmp.ge.f32.partialorder %v8035_v2, 0.0  ;;  %v5784_v20 = vrot.slane %v5724_v26, 1 }
 0x3fa   : > { %v8037_v22 = vpop.eup %8036  ;;  %7902 = vmatprep.mubr.msk.f32.mxu0 %vm5802_vm1, %v5781_v56  ;;  %v5782_v61 = vrot.slane %v5723_v44, 1  ;;  %7943 = vmatprep.mubr.msk.f32.mxu1 %vm5802_vm1, %v5723_v44  ;;  %v5706_v8 = vmul.f32 0.01, %v8035_v2 }
 0x3fb   : > { %7944 = vmatmul.mubr.msk.f32.gmra.mxu1 %vm5802_vm1, %v5724_v26  ;;  %vm5685_vm15 = vcmp.ge.f32.partialorder %v8037_v22, 0.0  ;;  %v5705_v1 = vmul.f32 0.01, %v8037_v22 }
 0x3fc   : > { %v8039_v51 = vpop.eup %8038  ;;  %v5783_v9 = vsel %vm5762_vm3, %v5780_v34, %v5782_v61  ;;  %v5785_v35 = vsel %vm5762_vm3, %v5782_v61, %v5784_v20  ;;  %v5726_v28 = vsel %vm5686_vm14, %v8035_v2, %v5706_v8 }
 0x3fd   : > { %7903 = vmatmul.mubr.msk.f32.gmra.mxu0 %vm5802_vm1, %v5783_v9  ;;  %v5725_v37 = vsel %vm5685_vm15, %v8037_v22, %v5705_v1  ;;  %vm5688_vm0 = vcmp.ge.f32.partialorder %v8039_v51, 0.0  ;;  %v5708_v40 = vmul.f32 0.01, %v8039_v51  ;;  %v5788_v59 = vrot.slane %v5726_v28, 1 }
 0x3fe   : > { %v8041_v11 = vpop.eup %8040  ;;  %7905 = vmatprep.mubr.msk.f32.mxu0 %vm5802_vm1, %v5785_v35  ;;  %v5786_v33 = vrot.slane %v5725_v37, 1  ;;  %7946 = vmatprep.mubr.msk.f32.mxu1 %vm5802_vm1, %v5725_v37 }
 0x3ff   : > { %7947 = vmatmul.mubr.msk.f32.gmra.mxu1 %vm5802_vm1, %v5726_v28  ;;  %vm5687_vm2 = vcmp.ge.f32.partialorder %v8041_v11, 0.0  ;;  %v5707_v30 = vmul.f32 0.01, %v8041_v11  ;;  %v5728_v54 = vsel %vm5688_vm0, %v8039_v51, %v5708_v40 }
 0x400   : > { %v8043_v4 = vpop.eup %8042  ;;  %v5787_v24 = vsel %vm5762_vm3, %v5784_v20, %v5786_v33  ;;  %v5789_v50 = vsel %vm5762_vm3, %v5786_v33, %v5788_v59  ;;  %v5792_v3 = vrot.slane %v5728_v54, 1 }
 0x401   : > { %7906 = vmatmul.mubr.msk.f32.gmra.mxu0 %vm5802_vm1, %v5787_v24  ;;  %v5727_v39 = vsel %vm5687_vm2, %v8041_v11, %v5707_v30  ;;  %vm5690_vm4 = vcmp.ge.f32.partialorder %v8043_v4, 0.0  ;;  %v5710_v19 = vmul.f32 0.01, %v8043_v4 }
 0x402   : > { %v8045_v45 = vpop.eup %8044  ;;  %7908 = vmatprep.mubr.msk.f32.mxu0 %vm5802_vm1, %v5789_v50  ;;  %v5790_v62 = vrot.slane %v5727_v39, 1  ;;  %7949 = vmatprep.mubr.msk.f32.mxu1 %vm5802_vm1, %v5727_v39 }
 0x403   : > { %7950 = vmatmul.mubr.msk.f32.gmra.mxu1 %vm5802_vm1, %v5728_v54  ;;  %vm5689_vm5 = vcmp.ge.f32.partialorder %v8045_v45, 0.0  ;;  %v5709_v21 = vmul.f32 0.01, %v8045_v45  ;;  %v5730_v13 = vsel %vm5690_vm4, %v8043_v4, %v5710_v19 }
 0x404   : > { %v8047_v46 = vpop.eup %8046  ;;  %v5791_v47 = vsel %vm5762_vm3, %v5788_v59, %v5790_v62  ;;  %v5793_v18 = vsel %vm5762_vm3, %v5790_v62, %v5792_v3  ;;  %v5796_v15 = vrot.slane %v5730_v13, 1 }
 0x405   : > { %7909 = vmatmul.mubr.msk.f32.gmra.mxu0 %vm5802_vm1, %v5791_v47  ;;  %v5729_v53 = vsel %vm5689_vm5, %v8045_v45, %v5709_v21  ;;  %vm5692_vm6 = vcmp.ge.f32.partialorder %v8047_v46, 0.0  ;;  %v5712_v57 = vmul.f32 0.01, %v8047_v46 }
 0x406   : > { %v8049_v63 = vpop.eup %8048  ;;  %7911 = vmatprep.mubr.msk.f32.mxu0 %vm5802_vm1, %v5793_v18  ;;  %v5794_v60 = vrot.slane %v5729_v53, 1  ;;  %7952 = vmatprep.mubr.msk.f32.mxu1 %vm5802_vm1, %v5729_v53 }
 0x407   : > { %7953 = vmatmul.mubr.msk.f32.gmra.mxu1 %vm5802_vm1, %v5730_v13  ;;  %vm5691_vm7 = vcmp.ge.f32.partialorder %v8049_v63, 0.0  ;;  %v5711_v12 = vmul.f32 0.01, %v8049_v63  ;;  %v5732_v48 = vsel %vm5692_vm6, %v8047_v46, %v5712_v57 }
 0x408   : > { %v5795_v58 = vsel %vm5762_vm3, %v5792_v3, %v5794_v60  ;;  %v5797_v6 = vsel %vm5762_vm3, %v5794_v60, %v5796_v15  ;;  %v5800_v32 = vrot.slane %v5732_v48, 1 }
 0x409   : > { %7912 = vmatmul.mubr.msk.f32.gmra.mxu0 %vm5802_vm1, %v5795_v58  ;;  %v5731_v16 = vsel %vm5691_vm7, %v8049_v63, %v5711_v12 }
 0x40a   : > { %7914 = vmatprep.mubr.msk.f32.mxu0 %vm5802_vm1, %v5797_v6  ;;  %v5798_v5 = vrot.slane %v5731_v16, 1  ;;  %7955 = vmatprep.mubr.msk.f32.mxu1 %vm5802_vm1, %v5731_v16 }
 0x40b   : > { %7956 = vmatmul.mubr.msk.f32.gmra.mxu1 %vm5802_vm1, %v5732_v48 }
 0x40c   : > { %v5799_v10 = vsel %vm5762_vm3, %v5796_v15, %v5798_v5  ;;  %v5801_v43 = vsel %vm5762_vm3, %v5798_v5, %v5800_v32  ;;  %vm6260_vm3 = vcmask 520192  }
 0x40d   : > { %7915 = vmatmul.mubr.msk.f32.gmra.mxu0 %vm5802_vm1, %v5799_v10 }
 0x40e   : > { %7917 = vmatprep.mubr.msk.f32.mxu0 %vm5802_vm1, %v5801_v43 }
 0x411   : > { %7918 = vmatmul.mubr.msk.f32.gmra.mxu0 %vm5802_vm1, %v5800_v32  ;;  %vm6240_vm1 = vcmask 523264  }
 0x4a7   : > { %v7930_v31 = vpop.f32.mrf.mxu1 }
 0x4a9   : > { %v6114_v41 = vpop.f32.mrf.mxu1 }
 0x4ab   : > { %v7933_v25 = vpop.f32.mrf.mxu1 }
 0x4ad   : > { %v7892_v14 = vpop.f32.mrf.mxu0  ;;  %v6124_v55 = vpop.f32.mrf.mxu1 }
 0x4ae   : > { %v6120_v49 = vadd.f32 %v7930_v31, %v7892_v14 }
 0x4af   : > { %v5909_v17 = vpop.f32.mrf.mxu0  ;;  %v7936_v42 = vpop.f32.mrf.mxu1 }
 0x4b0   : > { %v6221_v23 = vadd.f32 %v9833_v38, %v6120_v49  ;;  %v6115_v27 = vadd.f32 %v6114_v41, %v5909_v17 }
 0x4b1   : > { %v7895_v7 = vpop.f32.mrf.mxu0  ;;  %v6134_v34 = vpop.f32.mrf.mxu1 }
 0x4b2   : > { %6242 = vst.msk [vmem:[%s9840_s21 + $0x8] sm:$0xff] %vm6240_vm1, %v6221_v23  ;;  %v6220_v52 = vadd.f32 %v9833_v38, %v6115_v27  ;;  %v6130_v0 = vadd.f32 %v7933_v25, %v7895_v7 }
 0x4b3   : > { %v5919_v29 = vpop.f32.mrf.mxu0  ;;  %v7939_v2 = vpop.f32.mrf.mxu1 }
 0x4b4   : > { %6241 = vst.msk [vmem:[%s9840_s21] sm:$0xff] %vm6240_vm1, %v6220_v52  ;;  %v6223_v36 = vadd.f32 %v9833_v38, %v6130_v0  ;;  %v6125_v56 = vadd.f32 %v6124_v55, %v5919_v29 }
 0x4b5   : > { %v7898_v26 = vpop.f32.mrf.mxu0  ;;  %v6144_v44 = vpop.f32.mrf.mxu1 }
 0x4b6   : > { %6244 = vst.msk [vmem:[%s9840_s21 + $0x18] sm:$0xff] %vm6240_vm1, %v6223_v36  ;;  %v6222_v22 = vadd.f32 %v9833_v38, %v6125_v56  ;;  %v6140_v61 = vadd.f32 %v7936_v42, %v7898_v26 }
 0x4b7   : > { %v5929_v20 = vpop.f32.mrf.mxu0  ;;  %v7942_v8 = vpop.f32.mrf.mxu1 }
 0x4b8   : > { %6243 = vst.msk [vmem:[%s9840_s21 + $0x10] sm:$0xff] %vm6240_vm1, %v6222_v22  ;;  %v6225_v1 = vadd.f32 %v9833_v38, %v6140_v61  ;;  %v6135_v51 = vadd.f32 %v6134_v34, %v5929_v20 }
 0x4b9   : > { %v7901_v9 = vpop.f32.mrf.mxu0  ;;  %v6154_v35 = vpop.f32.mrf.mxu1 }
 0x4ba   : > { %6246 = vst.msk [vmem:[%s9840_s21 + $0x28] sm:$0xff] %vm6240_vm1, %v6225_v1  ;;  %v6224_v28 = vadd.f32 %v9833_v38, %v6135_v51  ;;  %v6150_v37 = vadd.f32 %v7939_v2, %v7901_v9 }
 0x4bb   : > { %v5939_v40 = vpop.f32.mrf.mxu0  ;;  %v7945_v11 = vpop.f32.mrf.mxu1 }
 0x4bc   : > { %6245 = vst.msk [vmem:[%s9840_s21 + $0x20] sm:$0xff] %vm6240_vm1, %v6224_v28  ;;  %v6227_v33 = vadd.f32 %v9833_v38, %v6150_v37  ;;  %v6145_v59 = vadd.f32 %v6144_v44, %v5939_v40 }
 0x4bd   : > { %v7904_v30 = vpop.f32.mrf.mxu0  ;;  %v6164_v54 = vpop.f32.mrf.mxu1 }
 0x4be   : > { %6248 = vst.msk [vmem:[%s9840_s21 + $0x38] sm:$0xff] %vm6240_vm1, %v6227_v33  ;;  %v6226_v4 = vadd.f32 %v9833_v38, %v6145_v59  ;;  %v6160_v24 = vadd.f32 %v7942_v8, %v7904_v30 }
 0x4bf   : > { %v5949_v50 = vpop.f32.mrf.mxu0  ;;  %v7948_v39 = vpop.f32.mrf.mxu1 }
 0x4c0   : > { %6247 = vst.msk [vmem:[%s9840_s21 + $0x30] sm:$0xff] %vm6240_vm1, %v6226_v4  ;;  %v6229_v19 = vadd.f32 %v9833_v38, %v6160_v24  ;;  %v6155_v45 = vadd.f32 %v6154_v35, %v5949_v50 }
 0x4c1   : > { %v7907_v62 = vpop.f32.mrf.mxu0  ;;  %v6174_v3 = vpop.f32.mrf.mxu1 }
 0x4c2   : > { %6250 = vst.msk [vmem:[%s9840_s21 + $0x48] sm:$0xff] %vm6240_vm1, %v6229_v19  ;;  %v6228_v21 = vadd.f32 %v9833_v38, %v6155_v45  ;;  %v6170_v13 = vadd.f32 %v7945_v11, %v7907_v62 }
 0x4c3   : > { %v5959_v46 = vpop.f32.mrf.mxu0  ;;  %v7951_v47 = vpop.f32.mrf.mxu1 }
 0x4c4   : > { %6249 = vst.msk [vmem:[%s9840_s21 + $0x40] sm:$0xff] %vm6240_vm1, %v6228_v21  ;;  %v6231_v18 = vadd.f32 %v9833_v38, %v6170_v13  ;;  %v6165_v53 = vadd.f32 %v6164_v54, %v5959_v46 }
 0x4c5   : > { %v7910_v57 = vpop.f32.mrf.mxu0  ;;  %v6184_v63 = vpop.f32.mrf.mxu1 }
 0x4c6   : > { %6252 = vst.msk [vmem:[%s9840_s21 + $0x58] sm:$0xff] %vm6240_vm1, %v6231_v18  ;;  %v6230_v60 = vadd.f32 %v9833_v38, %v6165_v53  ;;  %v6180_v15 = vadd.f32 %v7948_v39, %v7910_v57 }
 0x4c7   : > { %v5969_v12 = vpop.f32.mrf.mxu0  ;;  %v7954_v48 = vpop.f32.mrf.mxu1 }
 0x4c8   : > { %6251 = vst.msk [vmem:[%s9840_s21 + $0x50] sm:$0xff] %vm6240_vm1, %v6230_v60  ;;  %v6233_v58 = vadd.f32 %v9833_v38, %v6180_v15  ;;  %v6175_v6 = vadd.f32 %v6174_v3, %v5969_v12 }
 0x4c9   : > { %v7913_v16 = vpop.f32.mrf.mxu0  ;;  %v6194_v10 = vpop.f32.mrf.mxu1 }
 0x4ca   : > { %6254 = vst.msk [vmem:[%s9840_s21 + $0x68] sm:$0xff] %vm6240_vm1, %v6233_v58  ;;  %v6232_v5 = vadd.f32 %v9833_v38, %v6175_v6  ;;  %v6190_v32 = vadd.f32 %v7951_v47, %v7913_v16 }
 0x4cb   : > { %v5979_v43 = vpop.f32.mrf.mxu0  ;;  %v7957_v49 = vpop.f32.mrf.mxu1 }
 0x4cc   : > { %6253 = vst.msk [vmem:[%s9840_s21 + $0x60] sm:$0xff] %vm6240_vm1, %v6232_v5  ;;  %v6235_v31 = vadd.f32 %v9833_v38, %v6190_v32  ;;  %v6185_v41 = vadd.f32 %v6184_v63, %v5979_v43 }
 0x4cd   : > { %v7916_v25 = vpop.f32.mrf.mxu0  ;;  %v6204_v52 = vpop.f32.mrf.mxu1 }
 0x4ce   : > { %6256 = vst.msk [vmem:[%s9840_s21 + $0x78] sm:$0xff] %vm6240_vm1, %v6235_v31  ;;  %v6234_v14 = vadd.f32 %v9833_v38, %v6185_v41  ;;  %v6200_v55 = vadd.f32 %v7954_v48, %v7916_v25 }
 0x4cf   : > { %v5989_v17 = vpop.f32.mrf.mxu0 }
 0x4d0   : > { %6255 = vst.msk [vmem:[%s9840_s21 + $0x70] sm:$0xff] %vm6240_vm1, %v6234_v14  ;;  %v6237_v42 = vadd.f32 %v9833_v38, %v6200_v55  ;;  %v6195_v23 = vadd.f32 %v6194_v10, %v5989_v17 }
 0x4d1   : > { %v7919_v27 = vpop.f32.mrf.mxu0 }
 0x4d2   : > { %6258 = vst.msk [vmem:[%s9840_s21 + $0x88] sm:$0xff] %vm6240_vm1, %v6237_v42  ;;  %v6236_v7 = vadd.f32 %v9833_v38, %v6195_v23  ;;  %v6210_v34 = vadd.f32 %v7957_v49, %v7919_v27 }
 0x4d3   : > { %v5999_v0 = vpop.f32.mrf.mxu0 }
 0x4d4   : > { %6257 = vst.msk [vmem:[%s9840_s21 + $0x80] sm:$0xff] %vm6240_vm1, %v6236_v7  ;;  %v6239_v29 = vadd.f32 %v9833_v38, %v6210_v34  ;;  %v6205_v2 = vadd.f32 %v6204_v52, %v5999_v0 }
 0x4d6   : > { %6261 = vst.msk [vmem:[%s9840_s21 + $0x98] sm:$0x1f] %vm6260_vm3, %v6239_v29  ;;  %v6238_v36 = vadd.f32 %v9833_v38, %v6205_v2 }
 0x4d8   : > { %6259 = vst.msk [vmem:[%s9840_s21 + $0x90] sm:$0xff] %vm6240_vm1, %v6238_v36 }
 0x4d9 PF: > { %s19_s30 = sadd.s32 1, %s8056_s30  }
 0x4da   : > { %p16_p4 = scmp.ge.s32.totalorder %s19_s30, 4  }
 0x4dc   :  { %18 = sbr.rel (!%p16_p4) target bundleno = 1 (0x1), region = 103 }

// kernel: forward.3
= control target key start
LH: loop header
LB: loop body
LE: loop exit
PB: predicated region body
PF: predicated region fallthrough
CT: control target
= control target key end

     0   :  { %v394_v3 = vlaneseq  ;;  %v3952_v7 = vmov 1983009808   ;;  %s5100_s0 = inlined_call_operand.vmem [shape: f32[2,10048], index: 0, kind: input, shape index: {}]   ;;  %s5101_s1 = inlined_call_operand.vmem [shape: f32[32,10048], index: 1, kind: input, shape index: {}]   ;;  %s5102_s2 = inlined_call_operand.vmem [shape: f32[1,32], index: 2, kind: input, shape index: {}]   ;;  %s5103_s3 = inlined_call_operand.vmem [shape: f32[32,16], index: 3, kind: input, shape index: {}]   ;;  %s5104_s4 = inlined_call_operand.vmem [shape: f32[1,16], index: 4, kind: input, shape index: {}]   ;;  %s5105_s5 = inlined_call_operand.vmem [shape: f32[16,16], index: 5, kind: input, shape index: {}]   ;;  %s5106_s6 = inlined_call_operand.vmem [shape: f32[1,16], index: 6, kind: input, shape index: {}]   ;;  %s5107_s7 = inlined_call_operand.hbm [shape: f32[2,4], index: 7, kind: output, shape index: {}]  }
   0x1   :  { %v285_v0 = vld [vmem:[%s5101_s1 + $0x770] sm:$0xff]  ;;  %v287_v1 = vld [vmem:[%s5101_s1 + $0x780] sm:$0xff]  ;;  %v284_v2 = vld [vmem:[%s5101_s1 + $0x768] sm:$0xff]  ;;  %v392_v8 = vunpack.c.l.s4 %v3952_v7 }
   0x2   :  { %846 = vmatprep.subr.mxu0 %v285_v0  ;;  %916 = vmatprep.subr.mxu1 %v287_v1  ;;  %v286_v4 = vld [vmem:[%s5101_s1 + $0x778] sm:$0xff]  ;;  %v208_v6 = vld [vmem:[%s5101_s1 + $0x508] sm:$0xff]  ;;  %v395_v9 = vshrl.u32 %v394_v3, 7  ;;  %v205_v10 = vld [vmem:[%s5101_s1 + $0x4f0] sm:$0xff] }
   0x3   :  { %v206_v5 = vld [vmem:[%s5101_s1 + $0x4f8] sm:$0xff]  ;;  %847 = vmatpush1.xpose.msra.mxu0 %v284_v2  ;;  %917 = vmatpush1.xpose.msra.mxu1 %v286_v4  ;;  %v207_v11 = vld [vmem:[%s5101_s1 + $0x500] sm:$0xff]  ;;  %v393_v12 = vunpack.c.0.s8 %v392_v8  ;;  %v129_v14 = vld [vmem:[%s5101_s1 + $0x290] sm:$0xff] }
   0x4   :  { %848 = vmatprep.subr.mxu0 %v206_v5  ;;  %918 = vmatprep.subr.mxu1 %v208_v6  ;;  %v127_v13 = vld [vmem:[%s5101_s1 + $0x280] sm:$0xff]  ;;  %v126_v18 = vld [vmem:[%s5101_s1 + $0x278] sm:$0xff]  ;;  %v128_v19 = vld [vmem:[%s5101_s1 + $0x288] sm:$0xff] }
   0x5   :  { %v27_v15 = vld [vmem:[%s5100_s0] sm:$0xff]  ;;  %v4032_v16 = vsub.s32 %v393_v12, %v395_v9  ;;  %v48_v21 = vld [vmem:[%s5101_s1 + $0x8] sm:$0xff]  ;;  %v50_v22 = vld [vmem:[%s5101_s1 + $0x18] sm:$0xff] }
   0x6   :  { %v390_v17 = vcombine.high %v27_v15, %v27_v15  ;;  %v47_v26 = vld [vmem:[%s5101_s1] sm:$0xff]  ;;  %v49_v27 = vld [vmem:[%s5101_s1 + $0x10] sm:$0xff]  ;;  %v28_v28 = vld [vmem:[%s5100_s0 + $0x8] sm:$0xff] }
   0x7   :  { %849 = vmatpush1.xpose.msra.mxu0 %v205_v10  ;;  %919 = vmatpush1.xpose.msra.mxu1 %v207_v11  ;;  %v397_v20 = vrot.slane %v27_v15, %v4032_v16  ;;  %v289_v29 = vld [vmem:[%s5101_s1 + $0x790] sm:$0xff]  ;;  %v291_v30 = vld [vmem:[%s5101_s1 + $0x7a0] sm:$0xff]  ;;  %v414_v31 = vrot.slane %v28_v28, %v4032_v16  ;;  %v407_v32 = vcombine.high %v28_v28, %v28_v28  ;;  %v288_v34 = vld [vmem:[%s5101_s1 + $0x788] sm:$0xff] }
   0x8   :  { %850 = vmatprep.subr.mxu0 %v127_v13  ;;  %920 = vmatprep.subr.mxu1 %v129_v14  ;;  %v404_v23 = vrot.slane %v390_v17, %v4032_v16  ;;  %v290_v35 = vld [vmem:[%s5101_s1 + $0x798] sm:$0xff]  ;;  %v212_v37 = vld [vmem:[%s5101_s1 + $0x528] sm:$0xff]  ;;  %v209_v40 = vld [vmem:[%s5101_s1 + $0x510] sm:$0xff] }
   0x9   :  { %v405_v24 = vcombine.high %v397_v20, %v397_v20  ;;  %v421_v33 = vrot.slane %v407_v32, %v4032_v16  ;;  %v210_v36 = vld [vmem:[%s5101_s1 + $0x518] sm:$0xff]  ;;  %v422_v38 = vcombine.high %v414_v31, %v414_v31  ;;  %v211_v41 = vld [vmem:[%s5101_s1 + $0x520] sm:$0xff]  ;;  %v133_v43 = vld [vmem:[%s5101_s1 + $0x2b0] sm:$0xff] }
   0xa   :  { %v406_v25 = vcombine.high %v404_v23, %v404_v23  ;;  %v131_v42 = vld [vmem:[%s5101_s1 + $0x2a0] sm:$0xff]  ;;  %v29_v44 = vld [vmem:[%s5100_s0 + $0x10] sm:$0xff]  ;;  %v130_v45 = vld [vmem:[%s5101_s1 + $0x298] sm:$0xff] }
   0xb   :  { %851 = vmatpush1.xpose.msra.mxu0 %v126_v18  ;;  %921 = vmatpush1.xpose.msra.mxu1 %v128_v19  ;;  %v423_v39 = vcombine.high %v421_v33, %v421_v33  ;;  %v132_v46 = vld [vmem:[%s5101_s1 + $0x2a8] sm:$0xff]  ;;  %v54_v48 = vld [vmem:[%s5101_s1 + $0x38] sm:$0xff]  ;;  %v424_v49 = vcombine.high %v29_v44, %v29_v44  ;;  %v51_v50 = vld [vmem:[%s5101_s1 + $0x20] sm:$0xff]  ;;  %v431_v54 = vrot.slane %v29_v44, %v4032_v16 }
   0xc   :  { %852 = vmatprep.subr.mxu0 %v48_v21  ;;  %922 = vmatprep.subr.mxu1 %v50_v22  ;;  %v52_v47 = vld [vmem:[%s5101_s1 + $0x28] sm:$0xff]  ;;  %v53_v51 = vld [vmem:[%s5101_s1 + $0x30] sm:$0xff]  ;;  %v295_v53 = vld [vmem:[%s5101_s1 + $0x7c0] sm:$0xff] }
   0xd   :  { %886 = vmatprep.mubr.f32.mxu0 %v405_v24  ;;  %956 = vmatprep.mubr.f32.mxu1 %v406_v25  ;;  %v293_v52 = vld [vmem:[%s5101_s1 + $0x7b0] sm:$0xff]  ;;  %v438_v55 = vrot.slane %v424_v49, %v4032_v16  ;;  %v292_v56 = vld [vmem:[%s5101_s1 + $0x7a8] sm:$0xff]  ;;  %v294_v57 = vld [vmem:[%s5101_s1 + $0x7b8] sm:$0xff]  ;;  %v439_v60 = vcombine.high %v431_v54, %v431_v54 }
   0xe   :  { %v214_v58 = vld [vmem:[%s5101_s1 + $0x538] sm:$0xff]  ;;  %v216_v59 = vld [vmem:[%s5101_s1 + $0x548] sm:$0xff]  ;;  %v213_v62 = vld [vmem:[%s5101_s1 + $0x530] sm:$0xff] }
   0xf   :  { %853 = vmatpush1.xpose.msra.mxu0 %v47_v26  ;;  %923 = vmatpush1.xpose.msra.mxu1 %v49_v27  ;;  %v440_v61 = vcombine.high %v438_v55, %v438_v55  ;;  %v215_v63 = vld [vmem:[%s5101_s1 + $0x540] sm:$0xff]  ;;  %v137_v1 = vld [vmem:[%s5101_s1 + $0x2d0] sm:$0xff]  ;;  %v30_v2 = vld [vmem:[%s5100_s0 + $0x18] sm:$0xff] }
  0x10   :  { %986 = vmatprep.subr.mxu0 %v289_v29  ;;  %1056 = vmatprep.subr.mxu1 %v291_v30  ;;  %v135_v0 = vld [vmem:[%s5101_s1 + $0x2c0] sm:$0xff]  ;;  %v134_v3 = vld [vmem:[%s5101_s1 + $0x2b8] sm:$0xff]  ;;  %v136_v4 = vld [vmem:[%s5101_s1 + $0x2c8] sm:$0xff]  ;;  %v441_v7 = vcombine.high %v30_v2, %v30_v2  ;;  %v448_v12 = vrot.slane %v30_v2, %v4032_v16 }
  0x11   :  { %v56_v5 = vld [vmem:[%s5101_s1 + $0x48] sm:$0xff]  ;;  %v58_v6 = vld [vmem:[%s5101_s1 + $0x58] sm:$0xff]  ;;  %v55_v8 = vld [vmem:[%s5101_s1 + $0x40] sm:$0xff] }
  0x12   :  { %887 = vmatmul.mubr.f32.vlgmr.msra.gmra.mxu0 %v397_v20  ;;  %957 = vmatmul.mubr.f32.vlgmr.msra.gmra.mxu1 %v404_v23  ;;  %v57_v9 = vld [vmem:[%s5101_s1 + $0x50] sm:$0xff]  ;;  %v299_v11 = vld [vmem:[%s5101_s1 + $0x7e0] sm:$0xff]  ;;  %v455_v13 = vrot.slane %v441_v7, %v4032_v16  ;;  %v296_v14 = vld [vmem:[%s5101_s1 + $0x7c8] sm:$0xff]  ;;  %v456_v19 = vcombine.high %v448_v12, %v448_v12 }
  0x13   :  { %987 = vmatpush1.xpose.msra.mxu0 %v288_v34  ;;  %1057 = vmatpush1.xpose.msra.mxu1 %v290_v35  ;;  %v297_v10 = vld [vmem:[%s5101_s1 + $0x7d0] sm:$0xff]  ;;  %v298_v15 = vld [vmem:[%s5101_s1 + $0x7d8] sm:$0xff]  ;;  %v220_v18 = vld [vmem:[%s5101_s1 + $0x568] sm:$0xff] }
  0x14   :  { %988 = vmatprep.subr.mxu0 %v210_v36  ;;  %1058 = vmatprep.subr.mxu1 %v212_v37  ;;  %v218_v17 = vld [vmem:[%s5101_s1 + $0x558] sm:$0xff]  ;;  %v457_v20 = vcombine.high %v455_v13, %v455_v13  ;;  %v217_v21 = vld [vmem:[%s5101_s1 + $0x550] sm:$0xff]  ;;  %v219_v22 = vld [vmem:[%s5101_s1 + $0x560] sm:$0xff] }
  0x15   :  { %1026 = vmatprep.mubr.f32.mxu0 %v422_v38  ;;  %1096 = vmatprep.mubr.f32.mxu1 %v423_v39  ;;  %v139_v23 = vld [vmem:[%s5101_s1 + $0x2e0] sm:$0xff]  ;;  %v141_v24 = vld [vmem:[%s5101_s1 + $0x2f0] sm:$0xff]  ;;  %v138_v26 = vld [vmem:[%s5101_s1 + $0x2d8] sm:$0xff] }
  0x16   :  { %v31_v25 = vld [vmem:[%s5100_s0 + $0x20] sm:$0xff]  ;;  %v140_v27 = vld [vmem:[%s5101_s1 + $0x2e8] sm:$0xff]  ;;  %v62_v29 = vld [vmem:[%s5101_s1 + $0x78] sm:$0xff] }
  0x17   :  { %989 = vmatpush1.xpose.msra.mxu0 %v209_v40  ;;  %1059 = vmatpush1.xpose.msra.mxu1 %v211_v41  ;;  %v60_v28 = vld [vmem:[%s5101_s1 + $0x68] sm:$0xff]  ;;  %v458_v30 = vcombine.high %v31_v25, %v31_v25  ;;  %v61_v32 = vld [vmem:[%s5101_s1 + $0x70] sm:$0xff]  ;;  %v303_v34 = vld [vmem:[%s5101_s1 + $0x800] sm:$0xff]  ;;  %v465_v35 = vrot.slane %v31_v25, %v4032_v16 }
  0x18   :  { %990 = vmatprep.subr.mxu0 %v131_v42  ;;  %1060 = vmatprep.subr.mxu1 %v133_v43  ;;  %v300_v37 = vld [vmem:[%s5101_s1 + $0x7e8] sm:$0xff]  ;;  %v302_v38 = vld [vmem:[%s5101_s1 + $0x7f8] sm:$0xff]  ;;  %v221_v43 = vld [vmem:[%s5101_s1 + $0x570] sm:$0xff] }
  0x19   :  { %v472_v36 = vrot.slane %v458_v30, %v4032_v16  ;;  %v222_v39 = vld [vmem:[%s5101_s1 + $0x578] sm:$0xff]  ;;  %v224_v40 = vld [vmem:[%s5101_s1 + $0x588] sm:$0xff]  ;;  %v473_v41 = vcombine.high %v465_v35, %v465_v35  ;;  %v223_v44 = vld [vmem:[%s5101_s1 + $0x580] sm:$0xff] }
  0x1a   :  { %v144_v49 = vld [vmem:[%s5101_s1 + $0x308] sm:$0xff] }
  0x1b   :  { %991 = vmatpush1.xpose.msra.mxu0 %v130_v45  ;;  %1061 = vmatpush1.xpose.msra.mxu1 %v132_v46  ;;  %v474_v42 = vcombine.high %v472_v36, %v472_v36  ;;  %v143_v45 = vld [vmem:[%s5101_s1 + $0x300] sm:$0xff]  ;;  %v145_v46 = vld [vmem:[%s5101_s1 + $0x310] sm:$0xff] }
  0x1c   :  { %992 = vmatprep.subr.mxu0 %v52_v47  ;;  %1062 = vmatprep.subr.mxu1 %v54_v48  ;;  %v32_v47 = vld [vmem:[%s5100_s0 + $0x28] sm:$0xff]  ;;  %v142_v48 = vld [vmem:[%s5101_s1 + $0x2f8] sm:$0xff] }
  0x1f   :  { %993 = vmatpush1.xpose.msra.mxu0 %v51_v50  ;;  %1063 = vmatpush1.xpose.msra.mxu1 %v53_v51 }
  0x20   :  { %1126 = vmatprep.subr.mxu0 %v293_v52  ;;  %1196 = vmatprep.subr.mxu1 %v295_v53 }
  0x22   :  { %1027 = vmatmul.mubr.f32.vlgmr.msra.gmra.mxu0 %v414_v31  ;;  %1097 = vmatmul.mubr.f32.vlgmr.msra.gmra.mxu1 %v421_v33  ;;  %v59_v31 = vld [vmem:[%s5101_s1 + $0x60] sm:$0xff]  ;;  %v301_v33 = vld [vmem:[%s5101_s1 + $0x7f0] sm:$0xff] }
  0x23   :  { %1127 = vmatpush1.xpose.msra.mxu0 %v292_v56  ;;  %1197 = vmatpush1.xpose.msra.mxu1 %v294_v57 }
  0x24   :  { %1128 = vmatprep.subr.mxu0 %v214_v58  ;;  %1198 = vmatprep.subr.mxu1 %v216_v59 }
  0x25   :  { %1166 = vmatprep.mubr.f32.mxu0 %v439_v60  ;;  %1236 = vmatprep.mubr.f32.mxu1 %v440_v61 }
  0x27   :  { %1129 = vmatpush1.xpose.msra.mxu0 %v213_v62  ;;  %1199 = vmatpush1.xpose.msra.mxu1 %v215_v63 }
  0x28   :  { %1130 = vmatprep.subr.mxu0 %v135_v0  ;;  %1200 = vmatprep.subr.mxu1 %v137_v1 }
  0x2b   :  { %1131 = vmatpush1.xpose.msra.mxu0 %v134_v3  ;;  %1201 = vmatpush1.xpose.msra.mxu1 %v136_v4 }
  0x2c   :  { %1132 = vmatprep.subr.mxu0 %v56_v5  ;;  %1202 = vmatprep.subr.mxu1 %v58_v6 }
  0x2f   :  { %1133 = vmatpush1.xpose.msra.mxu0 %v55_v8  ;;  %1203 = vmatpush1.xpose.msra.mxu1 %v57_v9 }
  0x30   :  { %1266 = vmatprep.subr.mxu0 %v297_v10  ;;  %1336 = vmatprep.subr.mxu1 %v299_v11 }
  0x32   :  { %1167 = vmatmul.mubr.f32.vlgmr.msra.gmra.mxu0 %v431_v54  ;;  %1237 = vmatmul.mubr.f32.vlgmr.msra.gmra.mxu1 %v438_v55 }
  0x33   :  { %1267 = vmatpush1.xpose.msra.mxu0 %v296_v14  ;;  %1337 = vmatpush1.xpose.msra.mxu1 %v298_v15 }
  0x34   :  { %1268 = vmatprep.subr.mxu0 %v218_v17  ;;  %1338 = vmatprep.subr.mxu1 %v220_v18 }
  0x35   :  { %1306 = vmatprep.mubr.f32.mxu0 %v456_v19  ;;  %1376 = vmatprep.mubr.f32.mxu1 %v457_v20 }
  0x37   :  { %1269 = vmatpush1.xpose.msra.mxu0 %v217_v21  ;;  %1339 = vmatpush1.xpose.msra.mxu1 %v219_v22 }
  0x38   :  { %1270 = vmatprep.subr.mxu0 %v139_v23  ;;  %1340 = vmatprep.subr.mxu1 %v141_v24 }
  0x3b   :  { %1271 = vmatpush1.xpose.msra.mxu0 %v138_v26  ;;  %1341 = vmatpush1.xpose.msra.mxu1 %v140_v27 }
  0x3c   :  { %1272 = vmatprep.subr.mxu0 %v60_v28  ;;  %1342 = vmatprep.subr.mxu1 %v62_v29 }
  0x3f   :  { %1273 = vmatpush1.xpose.msra.mxu0 %v59_v31  ;;  %1343 = vmatpush1.xpose.msra.mxu1 %v61_v32 }
  0x40   :  { %1406 = vmatprep.subr.mxu0 %v301_v33  ;;  %1476 = vmatprep.subr.mxu1 %v303_v34 }
  0x42   :  { %1307 = vmatmul.mubr.f32.vlgmr.msra.gmra.mxu0 %v448_v12  ;;  %1377 = vmatmul.mubr.f32.vlgmr.msra.gmra.mxu1 %v455_v13 }
  0x43   :  { %1407 = vmatpush1.xpose.msra.mxu0 %v300_v37  ;;  %1477 = vmatpush1.xpose.msra.mxu1 %v302_v38 }
  0x44   :  { %1408 = vmatprep.subr.mxu0 %v222_v39  ;;  %1478 = vmatprep.subr.mxu1 %v224_v40 }
  0x45   :  { %1446 = vmatprep.mubr.f32.mxu0 %v473_v41  ;;  %1516 = vmatprep.mubr.f32.mxu1 %v474_v42 }
  0x47   :  { %1409 = vmatpush1.xpose.msra.mxu0 %v221_v43  ;;  %1479 = vmatpush1.xpose.msra.mxu1 %v223_v44 }
  0x48   :  { %1410 = vmatprep.subr.mxu0 %v143_v45  ;;  %1480 = vmatprep.subr.mxu1 %v145_v46 }
  0x49   :  { %12 = vsyncpa [#allocation3], 0  ;;  %v64_v50 = vld [vmem:[%s5101_s1 + $0x88] sm:$0xff]  ;;  %v66_v51 = vld [vmem:[%s5101_s1 + $0x98] sm:$0xff]  ;;  %v475_v52 = vcombine.high %v32_v47, %v32_v47  ;;  %v482_v57 = vrot.slane %v32_v47, %v4032_v16  ;;  %vm807_vm0 = vcmask 523264   ;;  %vm3954_vm1 = vmmov 0  }
  0x4a   :  { %v63_v53 = vld [vmem:[%s5101_s1 + $0x80] sm:$0xff]  ;;  %v65_v54 = vld [vmem:[%s5101_s1 + $0x90] sm:$0xff]  ;;  %v304_v59 = vld [vmem:[%s5101_s1 + $0x808] sm:$0xff]  ;;  %vm3637_vm3 = vcmask 261120   ;;  %vm3724_vm5 = vcmask 130048   ;;  %s3955_s9 = smov 8  }
  0x4b   :  { %1411 = vmatpush1.xpose.msra.mxu0 %v142_v48  ;;  %1481 = vmatpush1.xpose.msra.mxu1 %v144_v49  ;;  %v305_v55 = vld [vmem:[%s5101_s1 + $0x810] sm:$0xff]  ;;  %v307_v56 = vld [vmem:[%s5101_s1 + $0x820] sm:$0xff]  ;;  %v489_v58 = vrot.slane %v475_v52, %v4032_v16  ;;  %v306_v60 = vld [vmem:[%s5101_s1 + $0x818] sm:$0xff]  ;;  %v490_v63 = vcombine.high %v482_v57, %v482_v57  ;;  %s3958_s10 = smov [#allocation2]   ;;  %vm3826_vm6 = vcmask 25600  }
  0x4c   :  { %1412 = vmatprep.subr.mxu0 %v64_v50  ;;  %1482 = vmatprep.subr.mxu1 %v66_v51  ;;  %v226_v61 = vld [vmem:[%s5101_s1 + $0x598] sm:$0xff]  ;;  %v228_v62 = vld [vmem:[%s5101_s1 + $0x5a8] sm:$0xff]  ;;  %v225_v1 = vld [vmem:[%s5101_s1 + $0x590] sm:$0xff]  ;;  %s3834_s11 = sshll.u32 %s3958_s10, 4  ;;  %s3835_s11 = int_to_ptr.vmem [resolvable:$true] %s3834_s11 }
  0x4d   :  { %v491_v0 = vcombine.high %v489_v58, %v489_v58  ;;  %v227_v2 = vld [vmem:[%s5101_s1 + $0x5a0] sm:$0xff]  ;;  %v149_v4 = vld [vmem:[%s5101_s1 + $0x330] sm:$0xff]  ;;  %v146_v6 = vld [vmem:[%s5101_s1 + $0x318] sm:$0xff]  ;;  %s3930_s12 = scalar_lea.vmem %s3835_s11, 32  ;;  %p3935_p1 = scmp.lt.s32.totalorder %s3835_s11, %s3835_s11 }
  0x4e   :  { %v147_v3 = vld [vmem:[%s5101_s1 + $0x320] sm:$0xff]  ;;  %v33_v5 = vld [vmem:[%s5100_s0 + $0x30] sm:$0xff]  ;;  %v148_v7 = vld [vmem:[%s5101_s1 + $0x328] sm:$0xff]  ;;  %p3931_p0 = scmp.ne.s32.totalorder %s3835_s11, %s3930_s12  ;;  %p3936_p2 = scmp.lt.s32.totalorder %s3930_s12, %s3930_s12 }
  0x4f   :  { %1413 = vmatpush1.xpose.msra.mxu0 %v63_v53  ;;  %1483 = vmatpush1.xpose.msra.mxu1 %v65_v54  ;;  %v68_v8 = vld [vmem:[%s5101_s1 + $0xa8] sm:$0xff]  ;;  %v70_v9 = vld [vmem:[%s5101_s1 + $0xb8] sm:$0xff]  ;;  %v492_v10 = vcombine.high %v33_v5, %v33_v5  ;;  %v67_v11 = vld [vmem:[%s5101_s1 + $0xa0] sm:$0xff]  ;;  %v499_v15 = vrot.slane %v33_v5, %v4032_v16 }
  0x50   :  { %1546 = vmatprep.subr.mxu0 %v305_v55  ;;  %1616 = vmatprep.subr.mxu1 %v307_v56  ;;  %v69_v12 = vld [vmem:[%s5101_s1 + $0xb0] sm:$0xff]  ;;  %v311_v14 = vld [vmem:[%s5101_s1 + $0x840] sm:$0xff]  ;;  %v308_v18 = vld [vmem:[%s5101_s1 + $0x828] sm:$0xff]  ;;  %p3937_p3 = por %p3936_p2, %p3935_p1 }
  0x51   :  { %v309_v13 = vld [vmem:[%s5101_s1 + $0x830] sm:$0xff]  ;;  %v506_v17 = vrot.slane %v492_v10, %v4032_v16  ;;  %v310_v19 = vld [vmem:[%s5101_s1 + $0x838] sm:$0xff]  ;;  %v232_v21 = vld [vmem:[%s5101_s1 + $0x5c8] sm:$0xff]  ;;  %v507_v22 = vcombine.high %v499_v15, %v499_v15 }
  0x52   :  { %1447 = vmatmul.mubr.f32.vlgmr.msra.gmra.mxu0 %v465_v35  ;;  %1517 = vmatmul.mubr.f32.vlgmr.msra.gmra.mxu1 %v472_v36  ;;  %v230_v20 = vld [vmem:[%s5101_s1 + $0x5b8] sm:$0xff]  ;;  %v229_v24 = vld [vmem:[%s5101_s1 + $0x5b0] sm:$0xff]  ;;  %v231_v25 = vld [vmem:[%s5101_s1 + $0x5c0] sm:$0xff]  ;;  %p3938_p4 = pnand %p3937_p3, %p3931_p0 }
  0x53   :  { %1547 = vmatpush1.xpose.msra.mxu0 %v304_v59  ;;  %1617 = vmatpush1.xpose.msra.mxu1 %v306_v60  ;;  %v508_v23 = vcombine.high %v506_v17, %v506_v17  ;;  %v151_v26 = vld [vmem:[%s5101_s1 + $0x340] sm:$0xff]  ;;  %v153_v27 = vld [vmem:[%s5101_s1 + $0x350] sm:$0xff]  ;;  %v34_v28 = vld [vmem:[%s5100_s0 + $0x38] sm:$0xff] }
  0x54   :  { %1548 = vmatprep.subr.mxu0 %v226_v61  ;;  %1618 = vmatprep.subr.mxu1 %v228_v62  ;;  %v150_v29 = vld [vmem:[%s5101_s1 + $0x338] sm:$0xff]  ;;  %v152_v30 = vld [vmem:[%s5101_s1 + $0x348] sm:$0xff]  ;;  %v509_v33 = vcombine.high %v34_v28, %v34_v28  ;;  %v71_v34 = vld [vmem:[%s5101_s1 + $0xc0] sm:$0xff]  ;;  %v516_v38 = vrot.slane %v34_v28, %v4032_v16 }
  0x55   :  { %1586 = vmatprep.mubr.f32.mxu0 %v490_v63  ;;  %1656 = vmatprep.mubr.f32.mxu1 %v491_v0  ;;  %v72_v31 = vld [vmem:[%s5101_s1 + $0xc8] sm:$0xff]  ;;  %v74_v32 = vld [vmem:[%s5101_s1 + $0xd8] sm:$0xff]  ;;  %v73_v35 = vld [vmem:[%s5101_s1 + $0xd0] sm:$0xff] }
  0x56   :  { %v313_v36 = vld [vmem:[%s5101_s1 + $0x850] sm:$0xff]  ;;  %v315_v37 = vld [vmem:[%s5101_s1 + $0x860] sm:$0xff]  ;;  %v523_v39 = vrot.slane %v509_v33, %v4032_v16  ;;  %v312_v40 = vld [vmem:[%s5101_s1 + $0x848] sm:$0xff]  ;;  %v524_v44 = vcombine.high %v516_v38, %v516_v38 }
  0x57   :  { %1549 = vmatpush1.xpose.msra.mxu0 %v225_v1  ;;  %1619 = vmatpush1.xpose.msra.mxu1 %v227_v2  ;;  %v314_v41 = vld [vmem:[%s5101_s1 + $0x858] sm:$0xff]  ;;  %v236_v43 = vld [vmem:[%s5101_s1 + $0x5e8] sm:$0xff]  ;;  %v233_v46 = vld [vmem:[%s5101_s1 + $0x5d0] sm:$0xff] }
  0x58   :  { %1550 = vmatprep.subr.mxu0 %v147_v3  ;;  %1620 = vmatprep.subr.mxu1 %v149_v4  ;;  %v234_v42 = vld [vmem:[%s5101_s1 + $0x5d8] sm:$0xff]  ;;  %v525_v45 = vcombine.high %v523_v39, %v523_v39  ;;  %v235_v47 = vld [vmem:[%s5101_s1 + $0x5e0] sm:$0xff]  ;;  %v157_v49 = vld [vmem:[%s5101_s1 + $0x370] sm:$0xff] }
  0x59   :  { %v155_v48 = vld [vmem:[%s5101_s1 + $0x360] sm:$0xff]  ;;  %v154_v51 = vld [vmem:[%s5101_s1 + $0x358] sm:$0xff]  ;;  %v156_v52 = vld [vmem:[%s5101_s1 + $0x368] sm:$0xff] }
  0x5a   :  { %v35_v50 = vld [vmem:[%s5100_s0 + $0x40] sm:$0xff]  ;;  %v76_v53 = vld [vmem:[%s5101_s1 + $0xe8] sm:$0xff]  ;;  %v78_v54 = vld [vmem:[%s5101_s1 + $0xf8] sm:$0xff] }
  0x5b   :  { %1551 = vmatpush1.xpose.msra.mxu0 %v146_v6  ;;  %1621 = vmatpush1.xpose.msra.mxu1 %v148_v7  ;;  %v526_v55 = vcombine.high %v35_v50, %v35_v50  ;;  %v75_v56 = vld [vmem:[%s5101_s1 + $0xe0] sm:$0xff]  ;;  %v533_v60 = vrot.slane %v35_v50, %v4032_v16  ;;  %v316_v62 = vld [vmem:[%s5101_s1 + $0x868] sm:$0xff]  ;;  %v318_v63 = vld [vmem:[%s5101_s1 + $0x878] sm:$0xff] }
  0x5c   :  { %1552 = vmatprep.subr.mxu0 %v68_v8  ;;  %1622 = vmatprep.subr.mxu1 %v70_v9  ;;  %v319_v59 = vld [vmem:[%s5101_s1 + $0x880] sm:$0xff]  ;;  %v238_v0 = vld [vmem:[%s5101_s1 + $0x5f8] sm:$0xff]  ;;  %v240_v1 = vld [vmem:[%s5101_s1 + $0x608] sm:$0xff] }
  0x5d   :  { %v540_v61 = vrot.slane %v526_v55, %v4032_v16  ;;  %v541_v2 = vcombine.high %v533_v60, %v533_v60  ;;  %v237_v4 = vld [vmem:[%s5101_s1 + $0x5f0] sm:$0xff]  ;;  %v239_v5 = vld [vmem:[%s5101_s1 + $0x600] sm:$0xff]  ;;  %v36_v8 = vld [vmem:[%s5100_s0 + $0x48] sm:$0xff] }
  0x5e   :  { %v159_v6 = vld [vmem:[%s5101_s1 + $0x380] sm:$0xff]  ;;  %v161_v7 = vld [vmem:[%s5101_s1 + $0x390] sm:$0xff]  ;;  %v158_v9 = vld [vmem:[%s5101_s1 + $0x378] sm:$0xff] }
  0x5f   :  { %1553 = vmatpush1.xpose.msra.mxu0 %v67_v11  ;;  %1623 = vmatpush1.xpose.msra.mxu1 %v69_v12  ;;  %v542_v3 = vcombine.high %v540_v61, %v540_v61  ;;  %v160_v10 = vld [vmem:[%s5101_s1 + $0x388] sm:$0xff]  ;;  %v82_v12 = vld [vmem:[%s5101_s1 + $0x118] sm:$0xff]  ;;  %v243_v28 = vld [vmem:[%s5101_s1 + $0x620] sm:$0xff] }
  0x60   :  { %1686 = vmatprep.subr.mxu0 %v309_v13  ;;  %1756 = vmatprep.subr.mxu1 %v311_v14  ;;  %v80_v11 = vld [vmem:[%s5101_s1 + $0x108] sm:$0xff]  ;;  %v543_v13 = vcombine.high %v36_v8, %v36_v8  ;;  %v79_v14 = vld [vmem:[%s5101_s1 + $0x100] sm:$0xff] }
  0x61   :  { %v164_v33 = vld [vmem:[%s5101_s1 + $0x3a8] sm:$0xff]  ;;  %v247_v50 = vld [vmem:[%s5101_s1 + $0x640] sm:$0xff] }
  0x62   :  { %1587 = vmatmul.mubr.f32.vlgmr.msra.gmra.mxu0 %v482_v57  ;;  %1657 = vmatmul.mubr.f32.vlgmr.msra.gmra.mxu1 %v489_v58  ;;  %v77_v57 = vld [vmem:[%s5101_s1 + $0xf0] sm:$0xff]  ;;  %v168_v55 = vld [vmem:[%s5101_s1 + $0x3c8] sm:$0xff] }
  0x63   :  { %1687 = vmatpush1.xpose.msra.mxu0 %v308_v18  ;;  %1757 = vmatpush1.xpose.msra.mxu1 %v310_v19  ;;  %v317_v58 = vld [vmem:[%s5101_s1 + $0x870] sm:$0xff]  ;;  %v323_v18 = vld [vmem:[%s5101_s1 + $0x8a0] sm:$0xff]  ;;  %v550_v19 = vrot.slane %v36_v8, %v4032_v16 }
  0x64   :  { %1688 = vmatprep.subr.mxu0 %v230_v20  ;;  %1758 = vmatprep.subr.mxu1 %v232_v21  ;;  %v557_v20 = vrot.slane %v543_v13, %v4032_v16  ;;  %v320_v21 = vld [vmem:[%s5101_s1 + $0x888] sm:$0xff]  ;;  %v251_v8 = vld [vmem:[%s5101_s1 + $0x660] sm:$0xff] }
  0x65   :  { %1726 = vmatprep.mubr.f32.mxu0 %v507_v22  ;;  %1796 = vmatprep.mubr.f32.mxu1 %v508_v23  ;;  %v322_v22 = vld [vmem:[%s5101_s1 + $0x898] sm:$0xff]  ;;  %v172_v13 = vld [vmem:[%s5101_s1 + $0x3e8] sm:$0xff] }
  0x66   :  { %v242_v23 = vld [vmem:[%s5101_s1 + $0x618] sm:$0xff] }
  0x67   :  { %1689 = vmatpush1.xpose.msra.mxu0 %v229_v24  ;;  %1759 = vmatpush1.xpose.msra.mxu1 %v231_v25  ;;  %v244_v24 = vld [vmem:[%s5101_s1 + $0x628] sm:$0xff]  ;;  %v558_v25 = vcombine.high %v550_v19, %v550_v19 }
  0x68   :  { %1690 = vmatprep.subr.mxu0 %v151_v26  ;;  %1760 = vmatprep.subr.mxu1 %v153_v27  ;;  %v559_v26 = vcombine.high %v557_v20, %v557_v20  ;;  %v241_v27 = vld [vmem:[%s5101_s1 + $0x610] sm:$0xff] }
  0x6b   :  { %1691 = vmatpush1.xpose.msra.mxu0 %v150_v29  ;;  %1761 = vmatpush1.xpose.msra.mxu1 %v152_v30  ;;  %v163_v29 = vld [vmem:[%s5101_s1 + $0x3a0] sm:$0xff]  ;;  %v165_v30 = vld [vmem:[%s5101_s1 + $0x3b0] sm:$0xff] }
  0x6c   :  { %1692 = vmatprep.subr.mxu0 %v72_v31  ;;  %1762 = vmatprep.subr.mxu1 %v74_v32  ;;  %v37_v31 = vld [vmem:[%s5100_s0 + $0x50] sm:$0xff]  ;;  %v162_v32 = vld [vmem:[%s5101_s1 + $0x398] sm:$0xff] }
  0x6f   :  { %1693 = vmatpush1.xpose.msra.mxu0 %v71_v34  ;;  %1763 = vmatpush1.xpose.msra.mxu1 %v73_v35  ;;  %v84_v34 = vld [vmem:[%s5101_s1 + $0x128] sm:$0xff]  ;;  %v86_v35 = vld [vmem:[%s5101_s1 + $0x138] sm:$0xff] }
  0x70   :  { %1826 = vmatprep.subr.mxu0 %v313_v36  ;;  %1896 = vmatprep.subr.mxu1 %v315_v37  ;;  %v560_v36 = vcombine.high %v37_v31, %v37_v31  ;;  %v83_v37 = vld [vmem:[%s5101_s1 + $0x120] sm:$0xff] }
  0x72   :  { %1727 = vmatmul.mubr.f32.vlgmr.msra.gmra.mxu0 %v499_v15  ;;  %1797 = vmatmul.mubr.f32.vlgmr.msra.gmra.mxu1 %v506_v17  ;;  %v81_v15 = vld [vmem:[%s5101_s1 + $0x110] sm:$0xff] }
  0x73   :  { %1827 = vmatpush1.xpose.msra.mxu0 %v312_v40  ;;  %1897 = vmatpush1.xpose.msra.mxu1 %v314_v41  ;;  %v321_v17 = vld [vmem:[%s5101_s1 + $0x890] sm:$0xff]  ;;  %v327_v40 = vld [vmem:[%s5101_s1 + $0x8c0] sm:$0xff]  ;;  %v567_v41 = vrot.slane %v37_v31, %v4032_v16 }
  0x74   :  { %1828 = vmatprep.subr.mxu0 %v234_v42  ;;  %1898 = vmatprep.subr.mxu1 %v236_v43  ;;  %v574_v42 = vrot.slane %v560_v36, %v4032_v16  ;;  %v324_v43 = vld [vmem:[%s5101_s1 + $0x8a8] sm:$0xff]  ;;  %v255_v31 = vld [vmem:[%s5101_s1 + $0x680] sm:$0xff] }
  0x75   :  { %1866 = vmatprep.mubr.f32.mxu0 %v524_v44  ;;  %1936 = vmatprep.mubr.f32.mxu1 %v525_v45  ;;  %v326_v44 = vld [vmem:[%s5101_s1 + $0x8b8] sm:$0xff]  ;;  %v176_v36 = vld [vmem:[%s5101_s1 + $0x408] sm:$0xff] }
  0x76   :  { %v246_v45 = vld [vmem:[%s5101_s1 + $0x638] sm:$0xff] }
  0x77   :  { %1829 = vmatpush1.xpose.msra.mxu0 %v233_v46  ;;  %1899 = vmatpush1.xpose.msra.mxu1 %v235_v47  ;;  %v248_v46 = vld [vmem:[%s5101_s1 + $0x648] sm:$0xff]  ;;  %v575_v47 = vcombine.high %v567_v41, %v567_v41 }
  0x78   :  { %1830 = vmatprep.subr.mxu0 %v155_v48  ;;  %1900 = vmatprep.subr.mxu1 %v157_v49  ;;  %v576_v48 = vcombine.high %v574_v42, %v574_v42  ;;  %v245_v49 = vld [vmem:[%s5101_s1 + $0x630] sm:$0xff] }
  0x7b   :  { %1831 = vmatpush1.xpose.msra.mxu0 %v154_v51  ;;  %1901 = vmatpush1.xpose.msra.mxu1 %v156_v52  ;;  %v167_v51 = vld [vmem:[%s5101_s1 + $0x3c0] sm:$0xff]  ;;  %v169_v52 = vld [vmem:[%s5101_s1 + $0x3d0] sm:$0xff] }
  0x7c   :  { %1832 = vmatprep.subr.mxu0 %v76_v53  ;;  %1902 = vmatprep.subr.mxu1 %v78_v54  ;;  %v38_v53 = vld [vmem:[%s5100_s0 + $0x58] sm:$0xff] }
  0x7d   :  { %v166_v54 = vld [vmem:[%s5101_s1 + $0x3b8] sm:$0xff] }
  0x7f   :  { %1833 = vmatpush1.xpose.msra.mxu0 %v75_v56  ;;  %1903 = vmatpush1.xpose.msra.mxu1 %v77_v57  ;;  %v88_v56 = vld [vmem:[%s5101_s1 + $0x148] sm:$0xff]  ;;  %v90_v57 = vld [vmem:[%s5101_s1 + $0x158] sm:$0xff] }
  0x80   :  { %1966 = vmatprep.subr.mxu0 %v317_v58  ;;  %2036 = vmatprep.subr.mxu1 %v319_v59  ;;  %v577_v58 = vcombine.high %v38_v53, %v38_v53  ;;  %v87_v59 = vld [vmem:[%s5101_s1 + $0x140] sm:$0xff] }
  0x82   :  { %1867 = vmatmul.mubr.f32.vlgmr.msra.gmra.mxu0 %v516_v38  ;;  %1937 = vmatmul.mubr.f32.vlgmr.msra.gmra.mxu1 %v523_v39  ;;  %v85_v38 = vld [vmem:[%s5101_s1 + $0x130] sm:$0xff] }
  0x83   :  { %1967 = vmatpush1.xpose.msra.mxu0 %v316_v62  ;;  %2037 = vmatpush1.xpose.msra.mxu1 %v318_v63  ;;  %v325_v39 = vld [vmem:[%s5101_s1 + $0x8b0] sm:$0xff]  ;;  %v331_v62 = vld [vmem:[%s5101_s1 + $0x8e0] sm:$0xff]  ;;  %v584_v63 = vrot.slane %v38_v53, %v4032_v16 }
  0x84   :  { %1968 = vmatprep.subr.mxu0 %v238_v0  ;;  %2038 = vmatprep.subr.mxu1 %v240_v1  ;;  %v591_v0 = vrot.slane %v577_v58, %v4032_v16  ;;  %v328_v1 = vld [vmem:[%s5101_s1 + $0x8c8] sm:$0xff]  ;;  %v257_v58 = vld [vmem:[%s5101_s1 + $0x690] sm:$0xff] }
  0x85   :  { %2006 = vmatprep.mubr.f32.mxu0 %v541_v2  ;;  %2076 = vmatprep.mubr.f32.mxu1 %v542_v3  ;;  %v330_v2 = vld [vmem:[%s5101_s1 + $0x8d8] sm:$0xff] }
  0x86   :  { %v250_v3 = vld [vmem:[%s5101_s1 + $0x658] sm:$0xff] }
  0x87   :  { %1969 = vmatpush1.xpose.msra.mxu0 %v237_v4  ;;  %2039 = vmatpush1.xpose.msra.mxu1 %v239_v5  ;;  %v252_v4 = vld [vmem:[%s5101_s1 + $0x668] sm:$0xff]  ;;  %v592_v5 = vcombine.high %v584_v63, %v584_v63 }
  0x88   :  { %1970 = vmatprep.subr.mxu0 %v159_v6  ;;  %2040 = vmatprep.subr.mxu1 %v161_v7  ;;  %v593_v6 = vcombine.high %v591_v0, %v591_v0  ;;  %v249_v7 = vld [vmem:[%s5101_s1 + $0x650] sm:$0xff] }
  0x8b   :  { %1971 = vmatpush1.xpose.msra.mxu0 %v158_v9  ;;  %2041 = vmatpush1.xpose.msra.mxu1 %v160_v10  ;;  %v171_v9 = vld [vmem:[%s5101_s1 + $0x3e0] sm:$0xff]  ;;  %v173_v10 = vld [vmem:[%s5101_s1 + $0x3f0] sm:$0xff] }
  0x8c   :  { %1972 = vmatprep.subr.mxu0 %v80_v11  ;;  %2042 = vmatprep.subr.mxu1 %v82_v12  ;;  %v39_v11 = vld [vmem:[%s5100_s0 + $0x60] sm:$0xff]  ;;  %v170_v12 = vld [vmem:[%s5101_s1 + $0x3d8] sm:$0xff] }
  0x8f   :  { %1973 = vmatpush1.xpose.msra.mxu0 %v79_v14  ;;  %2043 = vmatpush1.xpose.msra.mxu1 %v81_v15  ;;  %v92_v14 = vld [vmem:[%s5101_s1 + $0x168] sm:$0xff]  ;;  %v94_v15 = vld [vmem:[%s5101_s1 + $0x178] sm:$0xff] }
  0x90   :  { %2106 = vmatprep.subr.mxu0 %v321_v17  ;;  %2176 = vmatprep.subr.mxu1 %v323_v18  ;;  %v594_v17 = vcombine.high %v39_v11, %v39_v11  ;;  %v91_v18 = vld [vmem:[%s5101_s1 + $0x160] sm:$0xff] }
  0x92   :  { %2007 = vmatmul.mubr.f32.vlgmr.msra.gmra.mxu0 %v533_v60  ;;  %2077 = vmatmul.mubr.f32.vlgmr.msra.gmra.mxu1 %v540_v61  ;;  %v89_v60 = vld [vmem:[%s5101_s1 + $0x150] sm:$0xff] }
  0x93   :  { %2107 = vmatpush1.xpose.msra.mxu0 %v320_v21  ;;  %2177 = vmatpush1.xpose.msra.mxu1 %v322_v22  ;;  %v329_v61 = vld [vmem:[%s5101_s1 + $0x8d0] sm:$0xff]  ;;  %v335_v21 = vld [vmem:[%s5101_s1 + $0x900] sm:$0xff]  ;;  %v601_v22 = vrot.slane %v39_v11, %v4032_v16  ;;  %v340_v11 = vld [vmem:[%s5101_s1 + $0x928] sm:$0xff] }
  0x94   :  { %2108 = vmatprep.subr.mxu0 %v242_v23  ;;  %2178 = vmatprep.subr.mxu1 %v244_v24  ;;  %v608_v23 = vrot.slane %v594_v17, %v4032_v16  ;;  %v332_v24 = vld [vmem:[%s5101_s1 + $0x8e8] sm:$0xff] }
  0x95   :  { %2146 = vmatprep.mubr.f32.mxu0 %v558_v25  ;;  %2216 = vmatprep.mubr.f32.mxu1 %v559_v26  ;;  %v334_v25 = vld [vmem:[%s5101_s1 + $0x8f8] sm:$0xff] }
  0x96   :  { %v254_v26 = vld [vmem:[%s5101_s1 + $0x678] sm:$0xff] }
  0x97   :  { %2109 = vmatpush1.xpose.msra.mxu0 %v241_v27  ;;  %2179 = vmatpush1.xpose.msra.mxu1 %v243_v28  ;;  %v256_v27 = vld [vmem:[%s5101_s1 + $0x688] sm:$0xff]  ;;  %v609_v28 = vcombine.high %v601_v22, %v601_v22 }
  0x98   :  { %2110 = vmatprep.subr.mxu0 %v163_v29  ;;  %2180 = vmatprep.subr.mxu1 %v165_v30  ;;  %v610_v29 = vcombine.high %v608_v23, %v608_v23  ;;  %v253_v30 = vld [vmem:[%s5101_s1 + $0x670] sm:$0xff] }
  0x9b   :  { %2111 = vmatpush1.xpose.msra.mxu0 %v162_v32  ;;  %2181 = vmatpush1.xpose.msra.mxu1 %v164_v33  ;;  %v175_v32 = vld [vmem:[%s5101_s1 + $0x400] sm:$0xff]  ;;  %v177_v33 = vld [vmem:[%s5101_s1 + $0x410] sm:$0xff] }
  0x9c   :  { %2112 = vmatprep.subr.mxu0 %v84_v34  ;;  %2182 = vmatprep.subr.mxu1 %v86_v35  ;;  %v40_v34 = vld [vmem:[%s5100_s0 + $0x68] sm:$0xff]  ;;  %v174_v35 = vld [vmem:[%s5101_s1 + $0x3f8] sm:$0xff] }
  0x9f   :  { %2113 = vmatpush1.xpose.msra.mxu0 %v83_v37  ;;  %2183 = vmatpush1.xpose.msra.mxu1 %v85_v38  ;;  %v96_v37 = vld [vmem:[%s5101_s1 + $0x188] sm:$0xff]  ;;  %v98_v38 = vld [vmem:[%s5101_s1 + $0x198] sm:$0xff] }
  0xa0   :  { %2246 = vmatprep.subr.mxu0 %v325_v39  ;;  %2316 = vmatprep.subr.mxu1 %v327_v40  ;;  %v611_v39 = vcombine.high %v40_v34, %v40_v34  ;;  %v95_v40 = vld [vmem:[%s5101_s1 + $0x180] sm:$0xff] }
  0xa2   :  { %2147 = vmatmul.mubr.f32.vlgmr.msra.gmra.mxu0 %v550_v19  ;;  %2217 = vmatmul.mubr.f32.vlgmr.msra.gmra.mxu1 %v557_v20  ;;  %v93_v19 = vld [vmem:[%s5101_s1 + $0x170] sm:$0xff] }
  0xa3   :  { %2247 = vmatpush1.xpose.msra.mxu0 %v324_v43  ;;  %2317 = vmatpush1.xpose.msra.mxu1 %v326_v44  ;;  %v333_v20 = vld [vmem:[%s5101_s1 + $0x8f0] sm:$0xff]  ;;  %v339_v43 = vld [vmem:[%s5101_s1 + $0x920] sm:$0xff]  ;;  %v618_v44 = vrot.slane %v40_v34, %v4032_v16 }
  0xa4   :  { %2248 = vmatprep.subr.mxu0 %v246_v45  ;;  %2318 = vmatprep.subr.mxu1 %v248_v46  ;;  %v625_v45 = vrot.slane %v611_v39, %v4032_v16  ;;  %v3842_v46 = vld [vmem:[%s5102_s2] ss:$0 sm:$0xff] }
  0xa5   :  { %2286 = vmatprep.mubr.f32.mxu0 %v575_v47  ;;  %2356 = vmatprep.mubr.f32.mxu1 %v576_v48  ;;  %v336_v47 = vld [vmem:[%s5101_s1 + $0x908] sm:$0xff]  ;;  %v338_v48 = vld [vmem:[%s5101_s1 + $0x918] sm:$0xff]  ;;  %v103_v34 = vld [vmem:[%s5101_s1 + $0x1c0] sm:$0xff] }
  0xa7   :  { %2249 = vmatpush1.xpose.msra.mxu0 %v245_v49  ;;  %2319 = vmatpush1.xpose.msra.mxu1 %v247_v50  ;;  %v258_v49 = vld [vmem:[%s5101_s1 + $0x698] sm:$0xff]  ;;  %v260_v50 = vld [vmem:[%s5101_s1 + $0x6a8] sm:$0xff] }
  0xa8   :  { %2250 = vmatprep.subr.mxu0 %v167_v51  ;;  %2320 = vmatprep.subr.mxu1 %v169_v52  ;;  %v626_v51 = vcombine.high %v618_v44, %v618_v44  ;;  %v627_v52 = vcombine.high %v625_v45, %v625_v45 }
  0xab   :  { %2251 = vmatpush1.xpose.msra.mxu0 %v166_v54  ;;  %2321 = vmatpush1.xpose.msra.mxu1 %v168_v55 }
  0xac   :  { %2252 = vmatprep.subr.mxu0 %v88_v56  ;;  %2322 = vmatprep.subr.mxu1 %v90_v57 }
  0xaf   :  { %2253 = vmatpush1.xpose.msra.mxu0 %v87_v59  ;;  %2323 = vmatpush1.xpose.msra.mxu1 %v89_v60  ;;  %v259_v59 = vld [vmem:[%s5101_s1 + $0x6a0] sm:$0xff] }
  0xb0   :  { %2386 = vmatprep.subr.mxu0 %v329_v61  ;;  %2456 = vmatprep.subr.mxu1 %v331_v62  ;;  %v179_v61 = vld [vmem:[%s5101_s1 + $0x420] sm:$0xff]  ;;  %v181_v62 = vld [vmem:[%s5101_s1 + $0x430] sm:$0xff] }
  0xb2   :  { %2287 = vmatmul.mubr.f32.vlgmr.msra.gmra.mxu0 %v567_v41  ;;  %2357 = vmatmul.mubr.f32.vlgmr.msra.gmra.mxu1 %v574_v42  ;;  %v97_v41 = vld [vmem:[%s5101_s1 + $0x190] sm:$0xff] }
  0xb3   :  { %2387 = vmatpush1.xpose.msra.mxu0 %v328_v1  ;;  %2457 = vmatpush1.xpose.msra.mxu1 %v330_v2  ;;  %v337_v42 = vld [vmem:[%s5101_s1 + $0x910] sm:$0xff]  ;;  %v180_v1 = vld [vmem:[%s5101_s1 + $0x428] sm:$0xff] }
  0xb4   :  { %2388 = vmatprep.subr.mxu0 %v250_v3  ;;  %2458 = vmatprep.subr.mxu1 %v252_v4  ;;  %v100_v2 = vld [vmem:[%s5101_s1 + $0x1a8] sm:$0xff]  ;;  %v102_v3 = vld [vmem:[%s5101_s1 + $0x1b8] sm:$0xff] }
  0xb5   :  { %2426 = vmatprep.mubr.f32.mxu0 %v592_v5  ;;  %2496 = vmatprep.mubr.f32.mxu1 %v593_v6  ;;  %v99_v5 = vld [vmem:[%s5101_s1 + $0x1a0] sm:$0xff]  ;;  %v101_v6 = vld [vmem:[%s5101_s1 + $0x1b0] sm:$0xff] }
  0xb7   :  { %2389 = vmatpush1.xpose.msra.mxu0 %v249_v7  ;;  %2459 = vmatpush1.xpose.msra.mxu1 %v251_v8  ;;  %v341_v7 = vld [vmem:[%s5101_s1 + $0x930] sm:$0xff]  ;;  %v343_v8 = vld [vmem:[%s5101_s1 + $0x940] sm:$0xff] }
  0xb8   :  { %2390 = vmatprep.subr.mxu0 %v171_v9  ;;  %2460 = vmatprep.subr.mxu1 %v173_v10 }
  0xbb   :  { %2391 = vmatpush1.xpose.msra.mxu0 %v170_v12  ;;  %2461 = vmatpush1.xpose.msra.mxu1 %v172_v13  ;;  %v342_v12 = vld [vmem:[%s5101_s1 + $0x938] sm:$0xff] }
  0xbc   :  { %2392 = vmatprep.subr.mxu0 %v92_v14  ;;  %2462 = vmatprep.subr.mxu1 %v94_v15  ;;  %v262_v13 = vld [vmem:[%s5101_s1 + $0x6b8] sm:$0xff]  ;;  %v264_v14 = vld [vmem:[%s5101_s1 + $0x6c8] sm:$0xff] }
  0xbf   :  { %2393 = vmatpush1.xpose.msra.mxu0 %v91_v18  ;;  %2463 = vmatpush1.xpose.msra.mxu1 %v93_v19 }
  0xc0   :  { %2526 = vmatprep.subr.mxu0 %v333_v20  ;;  %2596 = vmatprep.subr.mxu1 %v335_v21 }
  0xc2   :  { %2427 = vmatmul.mubr.f32.vlgmr.msra.gmra.mxu0 %v584_v63  ;;  %2497 = vmatmul.mubr.f32.vlgmr.msra.gmra.mxu1 %v591_v0  ;;  %v41_v63 = vld [vmem:[%s5100_s0 + $0x70] sm:$0xff]  ;;  %v178_v0 = vld [vmem:[%s5101_s1 + $0x418] sm:$0xff] }
  0xc3   :  { %2527 = vmatpush1.xpose.msra.mxu0 %v332_v24  ;;  %2597 = vmatpush1.xpose.msra.mxu1 %v334_v25  ;;  %v628_v4 = vcombine.high %v41_v63, %v41_v63  ;;  %v635_v9 = vrot.slane %v41_v63, %v4032_v16  ;;  %v263_v24 = vld [vmem:[%s5101_s1 + $0x6c0] sm:$0xff]  ;;  %v109_v63 = vld [vmem:[%s5101_s1 + $0x1f0] sm:$0xff] }
  0xc4   :  { %2528 = vmatprep.subr.mxu0 %v254_v26  ;;  %2598 = vmatprep.subr.mxu1 %v256_v27  ;;  %v183_v26 = vld [vmem:[%s5101_s1 + $0x440] sm:$0xff]  ;;  %v185_v27 = vld [vmem:[%s5101_s1 + $0x450] sm:$0xff] }
  0xc5   :  { %2566 = vmatprep.mubr.f32.mxu0 %v609_v28  ;;  %2636 = vmatprep.mubr.f32.mxu1 %v610_v29  ;;  %v642_v10 = vrot.slane %v628_v4, %v4032_v16  ;;  %v643_v15 = vcombine.high %v635_v9, %v635_v9  ;;  %v42_v28 = vld [vmem:[%s5100_s0 + $0x78] sm:$0xff]  ;;  %v348_v4 = vld [vmem:[%s5101_s1 + $0x968] sm:$0xff] }
  0xc6   :  { %v182_v29 = vld [vmem:[%s5101_s1 + $0x438] sm:$0xff] }
  0xc7   :  { %2529 = vmatpush1.xpose.msra.mxu0 %v253_v30  ;;  %2599 = vmatpush1.xpose.msra.mxu1 %v255_v31  ;;  %v644_v17 = vcombine.high %v642_v10, %v642_v10  ;;  %v184_v30 = vld [vmem:[%s5101_s1 + $0x448] sm:$0xff] }
  0xc8   :  { %2530 = vmatprep.subr.mxu0 %v175_v32  ;;  %2600 = vmatprep.subr.mxu1 %v177_v33  ;;  %v104_v31 = vld [vmem:[%s5101_s1 + $0x1c8] sm:$0xff]  ;;  %v106_v32 = vld [vmem:[%s5101_s1 + $0x1d8] sm:$0xff]  ;;  %v645_v33 = vcombine.high %v42_v28, %v42_v28 }
  0xca   :  { %v659_v39 = vrot.slane %v645_v33, %v4032_v16  ;;  %v352_v33 = vld [vmem:[%s5101_s1 + $0x988] sm:$0xff] }
  0xcb   :  { %2531 = vmatpush1.xpose.msra.mxu0 %v174_v35  ;;  %2601 = vmatpush1.xpose.msra.mxu1 %v176_v36  ;;  %v105_v35 = vld [vmem:[%s5101_s1 + $0x1d0] sm:$0xff] }
  0xcc   :  { %2532 = vmatprep.subr.mxu0 %v96_v37  ;;  %2602 = vmatprep.subr.mxu1 %v98_v38  ;;  %v345_v36 = vld [vmem:[%s5101_s1 + $0x950] sm:$0xff]  ;;  %v347_v37 = vld [vmem:[%s5101_s1 + $0x960] sm:$0xff]  ;;  %v652_v38 = vrot.slane %v42_v28, %v4032_v16 }
  0xcd   :  { %v113_v28 = vld [vmem:[%s5101_s1 + $0x210] sm:$0xff] }
  0xcf   :  { %2533 = vmatpush1.xpose.msra.mxu0 %v95_v40  ;;  %2603 = vmatpush1.xpose.msra.mxu1 %v97_v41  ;;  %v344_v40 = vld [vmem:[%s5101_s1 + $0x948] sm:$0xff]  ;;  %v346_v41 = vld [vmem:[%s5101_s1 + $0x958] sm:$0xff] }
  0xd0   :  { %2666 = vmatprep.subr.mxu0 %v337_v42  ;;  %2736 = vmatprep.subr.mxu1 %v339_v43  ;;  %v266_v42 = vld [vmem:[%s5101_s1 + $0x6d8] sm:$0xff]  ;;  %v268_v43 = vld [vmem:[%s5101_s1 + $0x6e8] sm:$0xff] }
  0xd2   :  { %v888_v53 = vpop.f32.mrf.mxu0  ;;  %2567 = vmatmul.mubr.f32.vlgmr.msra.gmra.mxu0 %v601_v22  ;;  %v958_v54 = vpop.f32.mrf.mxu1  ;;  %2637 = vmatmul.mubr.f32.vlgmr.msra.gmra.mxu1 %v608_v23  ;;  %v261_v23 = vld [vmem:[%s5101_s1 + $0x6b0] sm:$0xff] }
  0xd3   :  { %v889_v55 = vadd.f32 %v3842_v46, %v888_v53  ;;  %2667 = vmatpush1.xpose.msra.mxu0 %v336_v47  ;;  %2737 = vmatpush1.xpose.msra.mxu1 %v338_v48 }
  0xd4   :  { %v890_v56 = vpop.f32.mrf.mxu0  ;;  %v960_v57 = vpop.f32.mrf.mxu1  ;;  %2668 = vmatprep.subr.mxu0 %v258_v49  ;;  %2738 = vmatprep.subr.mxu1 %v260_v50 }
  0xd5   :  { %v959_v60 = vadd.f32 %v958_v54, %v889_v55  ;;  %2706 = vmatprep.mubr.f32.mxu0 %v626_v51  ;;  %2776 = vmatprep.mubr.f32.mxu1 %v627_v52  ;;  %v265_v51 = vld [vmem:[%s5101_s1 + $0x6d0] sm:$0xff]  ;;  %v267_v52 = vld [vmem:[%s5101_s1 + $0x6e0] sm:$0xff]  ;;  %v186_v57 = vld [vmem:[%s5101_s1 + $0x458] sm:$0xff] }
  0xd6   :  { %v187_v54 = vld [vmem:[%s5101_s1 + $0x460] sm:$0xff]  ;;  %v189_v55 = vld [vmem:[%s5101_s1 + $0x470] sm:$0xff] }
  0xd7   :  { %2669 = vmatpush1.xpose.msra.mxu0 %v257_v58  ;;  %2739 = vmatpush1.xpose.msra.mxu1 %v259_v59  ;;  %v43_v56 = vld [vmem:[%s5100_s0 + $0x80] sm:$0xff]  ;;  %v188_v58 = vld [vmem:[%s5101_s1 + $0x468] sm:$0xff] }
  0xd8   :  { %2670 = vmatprep.subr.mxu0 %v179_v61  ;;  %2740 = vmatprep.subr.mxu1 %v181_v62  ;;  %v108_v59 = vld [vmem:[%s5101_s1 + $0x1e8] sm:$0xff]  ;;  %v662_v61 = vcombine.high %v43_v56, %v43_v56  ;;  %v107_v62 = vld [vmem:[%s5101_s1 + $0x1e0] sm:$0xff] }
  0xdb   :  { %2671 = vmatpush1.xpose.msra.mxu0 %v178_v0  ;;  %2741 = vmatpush1.xpose.msra.mxu1 %v180_v1  ;;  %v349_v0 = vld [vmem:[%s5101_s1 + $0x970] sm:$0xff]  ;;  %v351_v1 = vld [vmem:[%s5101_s1 + $0x980] sm:$0xff] }
  0xdc   :  { %2672 = vmatprep.subr.mxu0 %v100_v2  ;;  %2742 = vmatprep.subr.mxu1 %v102_v3  ;;  %v669_v2 = vrot.slane %v43_v56, %v4032_v16  ;;  %v676_v3 = vrot.slane %v662_v61, %v4032_v16  ;;  %v117_v56 = vld [vmem:[%s5101_s1 + $0x230] sm:$0xff]  ;;  %v356_v61 = vld [vmem:[%s5101_s1 + $0x9a8] sm:$0xff] }
  0xdf   :  { %2673 = vmatpush1.xpose.msra.mxu0 %v99_v5  ;;  %2743 = vmatpush1.xpose.msra.mxu1 %v101_v6  ;;  %v350_v5 = vld [vmem:[%s5101_s1 + $0x978] sm:$0xff] }
  0xe0   :  { %2806 = vmatprep.subr.mxu0 %v341_v7  ;;  %2876 = vmatprep.subr.mxu1 %v343_v8  ;;  %v270_v6 = vld [vmem:[%s5101_s1 + $0x6f8] sm:$0xff]  ;;  %v272_v7 = vld [vmem:[%s5101_s1 + $0x708] sm:$0xff]  ;;  %v677_v8 = vcombine.high %v669_v2, %v669_v2 }
  0xe2   :  { %v1028_v18 = vpop.f32.mrf.mxu0  ;;  %2707 = vmatmul.mubr.f32.vlgmr.msra.gmra.mxu0 %v618_v44  ;;  %v1098_v19 = vpop.f32.mrf.mxu1  ;;  %2777 = vmatmul.mubr.f32.vlgmr.msra.gmra.mxu1 %v625_v45  ;;  %v660_v44 = vcombine.high %v652_v38, %v652_v38  ;;  %v661_v45 = vcombine.high %v659_v39, %v659_v39 }
  0xe3   :  { %v1029_v20 = vadd.f32 %v1028_v18, %v959_v60  ;;  %2807 = vmatpush1.xpose.msra.mxu0 %v340_v11  ;;  %2877 = vmatpush1.xpose.msra.mxu1 %v342_v12  ;;  %v110_v60 = vld [vmem:[%s5101_s1 + $0x1f8] sm:$0xff] }
  0xe4   :  { %v1030_v21 = vpop.f32.mrf.mxu0  ;;  %v1100_v22 = vpop.f32.mrf.mxu1  ;;  %2808 = vmatprep.subr.mxu0 %v262_v13  ;;  %2878 = vmatprep.subr.mxu1 %v264_v14 }
  0xe5   :  { %v1099_v25 = vadd.f32 %v1098_v19, %v1029_v20  ;;  %2846 = vmatprep.mubr.f32.mxu0 %v643_v15  ;;  %2916 = vmatprep.mubr.f32.mxu1 %v644_v17  ;;  %v269_v15 = vld [vmem:[%s5101_s1 + $0x6f0] sm:$0xff]  ;;  %v271_v17 = vld [vmem:[%s5101_s1 + $0x700] sm:$0xff]  ;;  %v44_v21 = vld [vmem:[%s5100_s0 + $0x88] sm:$0xff] }
  0xe6   :  { %v191_v19 = vld [vmem:[%s5101_s1 + $0x480] sm:$0xff]  ;;  %v193_v20 = vld [vmem:[%s5101_s1 + $0x490] sm:$0xff]  ;;  %v190_v22 = vld [vmem:[%s5101_s1 + $0x478] sm:$0xff] }
  0xe7   :  { %2809 = vmatpush1.xpose.msra.mxu0 %v261_v23  ;;  %2879 = vmatpush1.xpose.msra.mxu1 %v263_v24  ;;  %v192_v23 = vld [vmem:[%s5101_s1 + $0x488] sm:$0xff] }
  0xe8   :  { %2810 = vmatprep.subr.mxu0 %v183_v26  ;;  %2880 = vmatprep.subr.mxu1 %v185_v27  ;;  %v112_v24 = vld [vmem:[%s5101_s1 + $0x208] sm:$0xff]  ;;  %v679_v26 = vcombine.high %v44_v21, %v44_v21  ;;  %v111_v27 = vld [vmem:[%s5101_s1 + $0x200] sm:$0xff] }
  0xeb   :  { %2811 = vmatpush1.xpose.msra.mxu0 %v182_v29  ;;  %2881 = vmatpush1.xpose.msra.mxu1 %v184_v30  ;;  %v353_v29 = vld [vmem:[%s5101_s1 + $0x990] sm:$0xff]  ;;  %v355_v30 = vld [vmem:[%s5101_s1 + $0x9a0] sm:$0xff] }
  0xec   :  { %2812 = vmatprep.subr.mxu0 %v104_v31  ;;  %2882 = vmatprep.subr.mxu1 %v106_v32  ;;  %v686_v31 = vrot.slane %v44_v21, %v4032_v16  ;;  %v693_v32 = vrot.slane %v679_v26, %v4032_v16  ;;  %v361_v21 = vld [vmem:[%s5101_s1 + $0x9d0] sm:$0xff]  ;;  %v282_v26 = vld [vmem:[%s5101_s1 + $0x758] sm:$0xff] }
  0xef   :  { %2813 = vmatpush1.xpose.msra.mxu0 %v103_v34  ;;  %2883 = vmatpush1.xpose.msra.mxu1 %v105_v35  ;;  %v354_v34 = vld [vmem:[%s5101_s1 + $0x998] sm:$0xff] }
  0xf0   :  { %2946 = vmatprep.subr.mxu0 %v345_v36  ;;  %3016 = vmatprep.subr.mxu1 %v347_v37  ;;  %v274_v35 = vld [vmem:[%s5101_s1 + $0x718] sm:$0xff]  ;;  %v276_v36 = vld [vmem:[%s5101_s1 + $0x728] sm:$0xff]  ;;  %v694_v37 = vcombine.high %v686_v31, %v686_v31 }
  0xf2   :  { %v1168_v46 = vpop.f32.mrf.mxu0  ;;  %2847 = vmatmul.mubr.f32.vlgmr.msra.gmra.mxu0 %v635_v9  ;;  %v1238_v47 = vpop.f32.mrf.mxu1  ;;  %2917 = vmatmul.mubr.f32.vlgmr.msra.gmra.mxu1 %v642_v10  ;;  %v678_v9 = vcombine.high %v676_v3, %v676_v3 }
  0xf3   :  { %v1169_v48 = vadd.f32 %v1168_v46, %v1099_v25  ;;  %2947 = vmatpush1.xpose.msra.mxu0 %v344_v40  ;;  %3017 = vmatpush1.xpose.msra.mxu1 %v346_v41  ;;  %v114_v25 = vld [vmem:[%s5101_s1 + $0x218] sm:$0xff] }
  0xf4   :  { %v1170_v49 = vpop.f32.mrf.mxu0  ;;  %v1240_v50 = vpop.f32.mrf.mxu1  ;;  %2948 = vmatprep.subr.mxu0 %v266_v42  ;;  %3018 = vmatprep.subr.mxu1 %v268_v43 }
  0xf5   :  { %v1239_v53 = vadd.f32 %v1238_v47, %v1169_v48  ;;  %2986 = vmatprep.mubr.f32.mxu0 %v660_v44  ;;  %3056 = vmatprep.mubr.f32.mxu1 %v661_v45  ;;  %v273_v44 = vld [vmem:[%s5101_s1 + $0x710] sm:$0xff]  ;;  %v275_v45 = vld [vmem:[%s5101_s1 + $0x720] sm:$0xff]  ;;  %v194_v50 = vld [vmem:[%s5101_s1 + $0x498] sm:$0xff] }
  0xf6   :  { %v195_v47 = vld [vmem:[%s5101_s1 + $0x4a0] sm:$0xff]  ;;  %v197_v48 = vld [vmem:[%s5101_s1 + $0x4b0] sm:$0xff] }
  0xf7   :  { %2949 = vmatpush1.xpose.msra.mxu0 %v265_v51  ;;  %3019 = vmatpush1.xpose.msra.mxu1 %v267_v52  ;;  %v45_v49 = vld [vmem:[%s5100_s0 + $0x90] sm:$0xff]  ;;  %v196_v51 = vld [vmem:[%s5101_s1 + $0x4a8] sm:$0xff] }
  0xf8   :  { %2950 = vmatprep.subr.mxu0 %v187_v54  ;;  %3020 = vmatprep.subr.mxu1 %v189_v55  ;;  %v116_v52 = vld [vmem:[%s5101_s1 + $0x228] sm:$0xff]  ;;  %v696_v54 = vcombine.high %v45_v49, %v45_v49  ;;  %v115_v55 = vld [vmem:[%s5101_s1 + $0x220] sm:$0xff] }
  0xfb   :  { %2951 = vmatpush1.xpose.msra.mxu0 %v186_v57  ;;  %3021 = vmatpush1.xpose.msra.mxu1 %v188_v58  ;;  %v357_v57 = vld [vmem:[%s5101_s1 + $0x9b0] sm:$0xff]  ;;  %v359_v58 = vld [vmem:[%s5101_s1 + $0x9c0] sm:$0xff] }
  0xfc   :  { %2952 = vmatprep.subr.mxu0 %v108_v59  ;;  %3022 = vmatprep.subr.mxu1 %v110_v60  ;;  %v703_v59 = vrot.slane %v45_v49, %v4032_v16  ;;  %v710_v60 = vrot.slane %v696_v54, %v4032_v16 }
  0xff   :  { %2953 = vmatpush1.xpose.msra.mxu0 %v107_v62  ;;  %3023 = vmatpush1.xpose.msra.mxu1 %v109_v63  ;;  %v358_v62 = vld [vmem:[%s5101_s1 + $0x9b8] sm:$0xff] }
 0x100   :  { %3086 = vmatprep.subr.mxu0 %v349_v0  ;;  %3156 = vmatprep.subr.mxu1 %v351_v1  ;;  %v278_v63 = vld [vmem:[%s5101_s1 + $0x738] sm:$0xff]  ;;  %v280_v0 = vld [vmem:[%s5101_s1 + $0x748] sm:$0xff]  ;;  %v711_v1 = vcombine.high %v703_v59, %v703_v59 }
 0x102   :  { %v1308_v10 = vpop.f32.mrf.mxu0  ;;  %2987 = vmatmul.mubr.f32.vlgmr.msra.gmra.mxu0 %v652_v38  ;;  %v1378_v11 = vpop.f32.mrf.mxu1  ;;  %3057 = vmatmul.mubr.f32.vlgmr.msra.gmra.mxu1 %v659_v39  ;;  %v695_v38 = vcombine.high %v693_v32, %v693_v32 }
 0x103   :  { %v1309_v12 = vadd.f32 %v1308_v10, %v1239_v53  ;;  %3087 = vmatpush1.xpose.msra.mxu0 %v348_v4  ;;  %3157 = vmatpush1.xpose.msra.mxu1 %v350_v5  ;;  %v118_v53 = vld [vmem:[%s5101_s1 + $0x238] sm:$0xff] }
 0x104   :  { %v1310_v13 = vpop.f32.mrf.mxu0  ;;  %v1380_v14 = vpop.f32.mrf.mxu1  ;;  %3088 = vmatprep.subr.mxu0 %v270_v6  ;;  %3158 = vmatprep.subr.mxu1 %v272_v7 }
 0x105   :  { %v1379_v18 = vadd.f32 %v1378_v11, %v1309_v12  ;;  %3126 = vmatprep.mubr.f32.mxu0 %v677_v8  ;;  %3196 = vmatprep.mubr.f32.mxu1 %v678_v9  ;;  %v277_v8 = vld [vmem:[%s5101_s1 + $0x730] sm:$0xff]  ;;  %v279_v9 = vld [vmem:[%s5101_s1 + $0x740] sm:$0xff]  ;;  %v198_v13 = vld [vmem:[%s5101_s1 + $0x4b8] sm:$0xff] }
 0x106   :  { %v199_v11 = vld [vmem:[%s5101_s1 + $0x4c0] sm:$0xff]  ;;  %v201_v12 = vld [vmem:[%s5101_s1 + $0x4d0] sm:$0xff]  ;;  %v200_v14 = vld [vmem:[%s5101_s1 + $0x4c8] sm:$0xff] }
 0x107   :  { %3089 = vmatpush1.xpose.msra.mxu0 %v269_v15  ;;  %3159 = vmatpush1.xpose.msra.mxu1 %v271_v17  ;;  %v120_v15 = vld [vmem:[%s5101_s1 + $0x248] sm:$0xff]  ;;  %v122_v17 = vld [vmem:[%s5101_s1 + $0x258] sm:$0xff] }
 0x108   :  { %3090 = vmatprep.subr.mxu0 %v191_v19  ;;  %3160 = vmatprep.subr.mxu1 %v193_v20  ;;  %v119_v19 = vld [vmem:[%s5101_s1 + $0x240] sm:$0xff]  ;;  %v121_v20 = vld [vmem:[%s5101_s1 + $0x250] sm:$0xff] }
 0x10b   :  { %3091 = vmatpush1.xpose.msra.mxu0 %v190_v22  ;;  %3161 = vmatpush1.xpose.msra.mxu1 %v192_v23  ;;  %v3953_v23 = vmov 0.0  }
 0x10c   :  { %3092 = vmatprep.subr.mxu0 %v112_v24  ;;  %3162 = vmatprep.subr.mxu1 %v114_v25  ;;  %v360_v24 = vld [vmem:[%s5101_s1 + $0x9c8] sm:$0xff]  ;;  %v362_v25 = vld [vmem:[%s5101_s1 + $0x9d8] sm:$0xff] }
 0x10f   :  { %3093 = vmatpush1.xpose.msra.mxu0 %v111_v27  ;;  %3163 = vmatpush1.xpose.msra.mxu1 %v113_v28 }
 0x110   :  { %3226 = vmatprep.subr.mxu0 %v353_v29  ;;  %3296 = vmatprep.subr.mxu1 %v355_v30 }
 0x112   :  { %v1448_v39 = vpop.f32.mrf.mxu0  ;;  %3127 = vmatmul.mubr.f32.vlgmr.msra.gmra.mxu0 %v669_v2  ;;  %v1518_v40 = vpop.f32.mrf.mxu1  ;;  %3197 = vmatmul.mubr.f32.vlgmr.msra.gmra.mxu1 %v676_v3  ;;  %v712_v2 = vcombine.high %v710_v60, %v710_v60 }
 0x113   :  { %v1449_v41 = vadd.f32 %v1448_v39, %v1379_v18  ;;  %3227 = vmatpush1.xpose.msra.mxu0 %v352_v33  ;;  %3297 = vmatpush1.xpose.msra.mxu1 %v354_v34  ;;  %v46_v18 = vld [vmem:[%s5100_s0 + $0x98] sm:$0x3f]  ;;  %v281_v33 = vld [vmem:[%s5101_s1 + $0x750] sm:$0xff]  ;;  %v283_v34 = vld [vmem:[%s5101_s1 + $0x760] sm:$0xff] }
 0x114   :  { %v1450_v42 = vpop.f32.mrf.mxu0  ;;  %v1520_v43 = vpop.f32.mrf.mxu1  ;;  %3228 = vmatprep.subr.mxu0 %v274_v35  ;;  %3298 = vmatprep.subr.mxu1 %v276_v36  ;;  %v720_v22 = vrot.slane %v46_v18, %v4032_v16  ;;  %v203_v36 = vld [vmem:[%s5101_s1 + $0x4e0] sm:$0xff]  ;;  %v124_v39 = vld [vmem:[%s5101_s1 + $0x268] sm:$0xff] }
 0x115   :  { %v1519_v46 = vadd.f32 %v1518_v40, %v1449_v41  ;;  %3266 = vmatprep.mubr.f32.mxu0 %v694_v37  ;;  %3336 = vmatprep.mubr.f32.mxu1 %v695_v38  ;;  %v202_v37 = vld [vmem:[%s5101_s1 + $0x4d8] sm:$0xff]  ;;  %v204_v38 = vld [vmem:[%s5101_s1 + $0x4e8] sm:$0xff]  ;;  %v713_v40 = vcombine.high %v46_v18, %v46_v18  ;;  %v123_v41 = vld [vmem:[%s5101_s1 + $0x260] sm:$0xff] }
 0x116   :  { %v728_v27 = vcombine.high %v720_v22, %v720_v22  ;;  %v125_v42 = vld [vmem:[%s5101_s1 + $0x270] sm:$0xff] }
 0x117   :  { %3229 = vmatpush1.xpose.msra.mxu0 %v273_v44  ;;  %3299 = vmatpush1.xpose.msra.mxu1 %v275_v45  ;;  %v727_v43 = vrot.slane %v713_v40, %v4032_v16 }
 0x118   :  { %3230 = vmatprep.subr.mxu0 %v195_v47  ;;  %3300 = vmatprep.subr.mxu1 %v197_v48 }
 0x11b   :  { %3231 = vmatpush1.xpose.msra.mxu0 %v194_v50  ;;  %3301 = vmatpush1.xpose.msra.mxu1 %v196_v51 }
 0x11c   :  { %3232 = vmatprep.subr.mxu0 %v116_v52  ;;  %3302 = vmatprep.subr.mxu1 %v118_v53 }
 0x11f   :  { %3233 = vmatpush1.xpose.msra.mxu0 %v115_v55  ;;  %3303 = vmatpush1.xpose.msra.mxu1 %v117_v56 }
 0x120   :  { %3366 = vmatprep.subr.mxu0 %v357_v57  ;;  %3436 = vmatprep.subr.mxu1 %v359_v58 }
 0x122   :  { %v1588_v3 = vpop.f32.mrf.mxu0  ;;  %3267 = vmatmul.mubr.f32.vlgmr.msra.gmra.mxu0 %v686_v31  ;;  %v1658_v4 = vpop.f32.mrf.mxu1  ;;  %3337 = vmatmul.mubr.f32.vlgmr.msra.gmra.mxu1 %v693_v32 }
 0x123   :  { %v1589_v5 = vadd.f32 %v1588_v3, %v1519_v46  ;;  %3367 = vmatpush1.xpose.msra.mxu0 %v356_v61  ;;  %3437 = vmatpush1.xpose.msra.mxu1 %v358_v62 }
 0x124   :  { %v1590_v6 = vpop.f32.mrf.mxu0  ;;  %v1660_v7 = vpop.f32.mrf.mxu1  ;;  %3368 = vmatprep.subr.mxu0 %v278_v63  ;;  %3438 = vmatprep.subr.mxu1 %v280_v0 }
 0x125   :  { %v1659_v10 = vadd.f32 %v1658_v4, %v1589_v5  ;;  %3406 = vmatprep.mubr.f32.mxu0 %v711_v1  ;;  %3476 = vmatprep.mubr.f32.mxu1 %v712_v2 }
 0x127   :  { %3369 = vmatpush1.xpose.msra.mxu0 %v277_v8  ;;  %3439 = vmatpush1.xpose.msra.mxu1 %v279_v9  ;;  %v3629_v9 = vld [vmem:[%s5103_s3 + $0x18] sm:$0xff] }
 0x128   :  { %3370 = vmatprep.subr.mxu0 %v199_v11  ;;  %3440 = vmatprep.subr.mxu1 %v201_v12  ;;  %v3627_v11 = vld [vmem:[%s5103_s3 + $0x8] sm:$0xff]  ;;  %v3626_v12 = vld [vmem:[%s5103_s3] sm:$0xff] }
 0x12b   :  { %3371 = vmatpush1.xpose.msra.mxu0 %v198_v13  ;;  %3441 = vmatpush1.xpose.msra.mxu1 %v200_v14 }
 0x12c   :  { %3372 = vmatprep.subr.mxu0 %v120_v15  ;;  %3442 = vmatprep.subr.mxu1 %v122_v17 }
 0x12f   :  { %3373 = vmatpush1.xpose.msra.mxu0 %v119_v19  ;;  %3443 = vmatpush1.xpose.msra.mxu1 %v121_v20 }
 0x130   :  { %3506 = vmatprep.subr.mxu0 %v361_v21  ;;  %3866 = vmatprep.subr.mxu1 %v3953_v23 }
 0x132   :  { %v1728_v28 = vpop.f32.mrf.mxu0  ;;  %3407 = vmatmul.mubr.f32.vlgmr.msra.gmra.mxu0 %v703_v59  ;;  %v1798_v29 = vpop.f32.mrf.mxu1  ;;  %3477 = vmatmul.mubr.f32.vlgmr.msra.gmra.mxu1 %v710_v60 }
 0x133   :  { %v1729_v30 = vadd.f32 %v1728_v28, %v1659_v10  ;;  %3507 = vmatpush1.xpose.msra.mxu0 %v360_v24  ;;  %3867 = vmatpush3.xpose.msk.msra.mxu1 %vm807_vm0, %v362_v25  ;;  %v3628_v10 = vld [vmem:[%s5103_s3 + $0x10] sm:$0xff] }
 0x134   :  { %v1730_v31 = vpop.f32.mrf.mxu0  ;;  %v1800_v32 = vpop.f32.mrf.mxu1  ;;  %3508 = vmatprep.subr.mxu0 %v282_v26  ;;  %3868 = vmatprep.subr.mxu1 %v3953_v23 }
 0x135   :  { %v1799_v35 = vadd.f32 %v1798_v29, %v1729_v30  ;;  %3546 = vmatprep.mubr.f32.mxu0 %v728_v27  ;;  %3874 = vmatprep.mubr.msk.f32.mxu1 %vm3954_vm1, %v3953_v23 }
 0x137   :  { %3509 = vmatpush1.xpose.msra.mxu0 %v281_v33  ;;  %3869 = vmatpush3.xpose.msk.msra.mxu1 %vm807_vm0, %v283_v34 }
 0x138   :  { %3510 = vmatprep.subr.mxu0 %v203_v36  ;;  %3870 = vmatprep.subr.mxu1 %v3953_v23 }
 0x13b   :  { %3511 = vmatpush1.xpose.msra.mxu0 %v202_v37  ;;  %3871 = vmatpush3.xpose.msk.msra.mxu1 %vm807_vm0, %v204_v38 }
 0x13c   :  { %3512 = vmatprep.subr.mxu0 %v124_v39  ;;  %3872 = vmatprep.subr.mxu1 %v3953_v23 }
 0x13f   :  { %3513 = vmatpush1.xpose.msra.mxu0 %v123_v41  ;;  %3873 = vmatpush3.xpose.msk.msra.mxu1 %vm807_vm0, %v125_v42 }
 0x140   :  { %3877 = vmatprep.subr.mxu0 %v3953_v23  ;;  %3888 = vmatprep.subr.mxu1 %v3953_v23 }
 0x142   :  { %v1868_v44 = vpop.f32.mrf.mxu0  ;;  %3547 = vmatmul.mubr.f32.vlgmr.msra.gmra.mxu0 %v720_v22  ;;  %3875 = vmatmul.mubr.msk.f32.vlgmr.msra.gmra.mxu1 %vm807_vm0, %v727_v43  ;;  %v1938_v45 = vpop.f32.mrf.mxu1 }
 0x143   :  { %v1869_v46 = vadd.f32 %v1868_v44, %v1799_v35  ;;  %3885 = vmatprep.mubr.msk.f32.mxu0 %vm3954_vm1, %v3953_v23  ;;  %3892 = vmatprep.mubr.msk.f32.mxu1 %vm3954_vm1, %v3953_v23 }
 0x144   :  { %v1870_v16 = vpop.f32.mrf.mxu0  ;;  %v1940_v47 = vpop.f32.mrf.mxu1  ;;  %3878 = vmatpush3.msra.mxu0 %v3629_v9 }
 0x145   :  { %v1939_v48 = vadd.f32 %v1938_v45, %v1869_v46  ;;  %3879 = vmatprep.subr.mxu0 %v3953_v23 }
 0x146   :  { %3880 = vmatpush3.msra.mxu0 %v3628_v10  ;;  %v3850_v10 = vld [vmem:[%s5106_s6] ss:$0 sm:$0xff]  ;;  %s3957_s6 = smov 120  }
 0x147   :  { %3881 = vmatprep.subr.mxu0 %v3953_v23 }
 0x148   :  { %3882 = vmatpush3.msra.mxu0 %v3627_v11 }
 0x149   :  { %3883 = vmatprep.subr.mxu0 %v3953_v23 }
 0x14a   :  { %3884 = vmatpush3.msra.mxu0 %v3626_v12 }
 0x152   :  { %v2008_v49 = vpop.f32.mrf.mxu0  ;;  %v2078_v50 = vpop.f32.mrf.mxu1 }
 0x153   :  { %v2009_v51 = vadd.f32 %v2008_v49, %v1939_v48 }
 0x154   :  { %v2010_v52 = vpop.f32.mrf.mxu0  ;;  %v2080_v53 = vpop.f32.mrf.mxu1 }
 0x155   :  { %v2079_v54 = vadd.f32 %v2078_v50, %v2009_v51 }
 0x162   :  { %v2148_v55 = vpop.f32.mrf.mxu0  ;;  %v2218_v56 = vpop.f32.mrf.mxu1 }
 0x163   :  { %v2149_v57 = vadd.f32 %v2148_v55, %v2079_v54 }
 0x164   :  { %v2150_v58 = vpop.f32.mrf.mxu0  ;;  %v2220_v59 = vpop.f32.mrf.mxu1 }
 0x165   :  { %v2219_v60 = vadd.f32 %v2218_v56, %v2149_v57 }
 0x172   :  { %v2288_v61 = vpop.f32.mrf.mxu0  ;;  %v2358_v62 = vpop.f32.mrf.mxu1 }
 0x173   :  { %v2289_v63 = vadd.f32 %v2288_v61, %v2219_v60 }
 0x174   :  { %v2290_v0 = vpop.f32.mrf.mxu0  ;;  %v2360_v1 = vpop.f32.mrf.mxu1 }
 0x175   :  { %v2359_v2 = vadd.f32 %v2358_v62, %v2289_v63  ;;  %v3716_v1 = vld [vmem:[%s5105_s5 + $0x8] sm:$0xff] }
 0x176   :  { %3889 = vmatpush3.msra.mxu1 %v3716_v1 }
 0x177   :  { %3890 = vmatprep.subr.mxu1 %v3953_v23 }
 0x182   :  { %v2428_v3 = vpop.f32.mrf.mxu0  ;;  %v2498_v4 = vpop.f32.mrf.mxu1 }
 0x183   :  { %v2429_v5 = vadd.f32 %v2428_v3, %v2359_v2  ;;  %v3715_v2 = vld [vmem:[%s5105_s5] sm:$0xff] }
 0x184   :  { %v2430_v6 = vpop.f32.mrf.mxu0  ;;  %v2500_v7 = vpop.f32.mrf.mxu1  ;;  %3891 = vmatpush3.msra.mxu1 %v3715_v2  ;;  %v3848_v3 = vld [vmem:[%s5104_s4] ss:$0 sm:$0xff]  ;;  %s3956_s4 = smov 116  }
 0x185   :  { %v2499_v8 = vadd.f32 %v2498_v4, %v2429_v5 }
 0x192   :  { %v2568_v13 = vpop.f32.mrf.mxu0  ;;  %v2638_v14 = vpop.f32.mrf.mxu1 }
 0x193   :  { %v2569_v15 = vadd.f32 %v2568_v13, %v2499_v8 }
 0x194   :  { %v2570_v17 = vpop.f32.mrf.mxu0  ;;  %v2640_v18 = vpop.f32.mrf.mxu1 }
 0x195   :  { %v2639_v19 = vadd.f32 %v2638_v14, %v2569_v15 }
 0x1a2   :  { %v2708_v20 = vpop.f32.mrf.mxu0  ;;  %v2778_v21 = vpop.f32.mrf.mxu1 }
 0x1a3   :  { %v2709_v22 = vadd.f32 %v2708_v20, %v2639_v19 }
 0x1a4   :  { %v2710_v24 = vpop.f32.mrf.mxu0  ;;  %v2780_v25 = vpop.f32.mrf.mxu1 }
 0x1a5   :  { %v2779_v26 = vadd.f32 %v2778_v21, %v2709_v22 }
 0x1b2   :  { %v2848_v27 = vpop.f32.mrf.mxu0  ;;  %v2918_v28 = vpop.f32.mrf.mxu1 }
 0x1b3   :  { %v2849_v43 = vadd.f32 %v2848_v27, %v2779_v26 }
 0x1b4   :  { %v2850_v29 = vpop.f32.mrf.mxu0  ;;  %v2920_v30 = vpop.f32.mrf.mxu1 }
 0x1b5   :  { %v2919_v44 = vadd.f32 %v2918_v28, %v2849_v43 }
 0x1c2   :  { %v2988_v31 = vpop.f32.mrf.mxu0  ;;  %v3058_v32 = vpop.f32.mrf.mxu1 }
 0x1c3   :  { %v2989_v45 = vadd.f32 %v2988_v31, %v2919_v44 }
 0x1c4   :  { %v2990_v33 = vpop.f32.mrf.mxu0  ;;  %v3060_v34 = vpop.f32.mrf.mxu1 }
 0x1c5   :  { %v3059_v46 = vadd.f32 %v3058_v32, %v2989_v45 }
 0x1d2   :  { %v3128_v35 = vpop.f32.mrf.mxu0  ;;  %v3198_v36 = vpop.f32.mrf.mxu1 }
 0x1d3   :  { %v3129_v16 = vadd.f32 %v3128_v35, %v3059_v46 }
 0x1d4   :  { %v3130_v37 = vpop.f32.mrf.mxu0  ;;  %v3200_v38 = vpop.f32.mrf.mxu1 }
 0x1d5   :  { %v3199_v51 = vadd.f32 %v3198_v36, %v3129_v16 }
 0x1e2   :  { %v3268_v39 = vpop.f32.mrf.mxu0  ;;  %v3338_v40 = vpop.f32.mrf.mxu1 }
 0x1e3   :  { %v3269_v52 = vadd.f32 %v3268_v39, %v3199_v51 }
 0x1e4   :  { %v3270_v41 = vpop.f32.mrf.mxu0  ;;  %v3340_v42 = vpop.f32.mrf.mxu1 }
 0x1e5   :  { %v3339_v53 = vadd.f32 %v3338_v40, %v3269_v52 }
 0x1f2   :  { %v3408_v47 = vpop.f32.mrf.mxu0  ;;  %v3478_v48 = vpop.f32.mrf.mxu1 }
 0x1f3   :  { %v3409_v54 = vadd.f32 %v3408_v47, %v3339_v53 }
 0x1f4   :  { %v3410_v49 = vpop.f32.mrf.mxu0  ;;  %v3480_v50 = vpop.f32.mrf.mxu1 }
 0x1f5   :  { %v3479_v55 = vadd.f32 %v3478_v48, %v3409_v54 }
 0x202   :  { %v3548_v56 = vpop.f32.mrf.mxu0  ;;  %v3618_v57 = vpop.f32.mrf.mxu1 }
 0x203   :  { %v3549_v58 = vadd.f32 %v3548_v56, %v3479_v55 }
 0x204   :  { %v3550_v59 = vpop.f32.mrf.mxu0  ;;  %v3876_v60 = vpop.f32.mrf.mxu1 }
 0x205   :  { %v3619_v61 = vadd.f32 %v3618_v57, %v3549_v58 }
 0x207   :  { %3922 = vtanh.f32 %v3619_v61 }
 0x214   :  { %v3923_v62 = vpop.eup %3922 }
 0x215   :  { %vm3623_vm2 = vcmp.ge.f32.partialorder %v3923_v62, 0.0  ;;  %v3624_v63 = vmul.f32 0.01, %v3923_v62 }
 0x217   :  { %v3625_v0 = vsel %vm3623_vm2, %v3923_v62, %v3624_v63 }
 0x218   :  { %3886 = vmatmul.mubr.msk.f32.vlgmr.msra.gmra.mxu0 %vm3637_vm3, %v3625_v0 }
 0x2d8   :  { %v3707_v4 = vpop.f32.mrf.mxu0 }
 0x2d9   :  { %v3708_v5 = vadd.f32 %v3848_v3, %v3707_v4 }
 0x2da   :  { %v3887_v6 = vpop.f32.mrf.mxu0 }
 0x2db   :  { %3924 = vtanh.f32 %v3708_v5 }
 0x2e8   :  { %v3925_v7 = vpop.eup %3924 }
 0x2e9   :  { %vm3712_vm4 = vcmp.ge.f32.partialorder %v3925_v7, 0.0  ;;  %v3713_v8 = vmul.f32 0.01, %v3925_v7 }
 0x2eb   :  { %v3714_v9 = vsel %vm3712_vm4, %v3925_v7, %v3713_v8 }
 0x2ec   :  { %3893 = vmatmul.mubr.msk.f32.vlgmr.msra.gmra.mxu1 %vm3724_vm5, %v3714_v9 }
 0x3ac   :  { %v3794_v23 = vpop.f32.mrf.mxu1 }
 0x3ad   :  { %v3795_v11 = vadd.f32 %v3850_v10, %v3794_v23 }
 0x3ae   :  { %v3894_v12 = vpop.f32.mrf.mxu1 }
 0x3af   :  { %3799 = vrot.lane.b32.xlu0 %v3795_v11, %s3955_s9  ;;  %v3810_v25 = vsub.f32 1.0, %v3795_v11 }
 0x421   :  { %v3800_v13 = vpop.permute.xlu0 %3799 }
 0x422   :  { %v3802_v14 = vsub.f32 %v3795_v11, %v3800_v13 }
 0x424   :  { %3804 = vrot.lane.b32.xlu0 %v3802_v14, %s3956_s4 }
 0x496   :  { %v3805_v15 = vpop.permute.xlu0 %3804 }
 0x497   :  { %v3807_v17 = vmul.f32 %v3805_v15, %v3795_v11 }
 0x499   :  { %v3852_v18 = vclamps-f32 %v3807_v17, 30.0 }
 0x49b   :  { %v3811_v19 = vsub.f32 0.0, %v3852_v18 }
 0x49d   :  { %v3812_v20 = vmul.f32 1.442695, %v3811_v19 }
 0x49f   :  { %3926 = vpow2.f32 %v3812_v20 }
 0x4ac   :  { %v3927_v21 = vpop.eup %3926 }
 0x4ad   :  { %v3814_v22 = vadd.f32 1.0, %v3927_v21 }
 0x4af   :  { %3816 = vrot.lane.b32.xlu1 %v3814_v22, %s3955_s9 }
 0x521   :  { %v3817_v24 = vpop.permute.xlu1 %3816 }
 0x522   :  { %3928 = vrcp.f32 %v3817_v24 }
 0x52f   :  { %v3929_v26 = vpop.eup %3928 }
 0x530   :  { %v3820_v27 = vmul.f32 %v3929_v26, %v3810_v25 }
 0x532   :  { %v3821_v28 = vadd.f32 %v3820_v27, %v3795_v11 }
 0x534   :  { %3823 = vrot.lane.b32.xlu1 %v3821_v28, %s3957_s6 }
 0x5a6   :  { %v3824_v29 = vpop.permute.xlu1 %3823 }
 0x5a7   :  { %3827 = vst.msk [vmem:[#allocation2] sm:$0x3] %vm3826_vm6, %v3824_v29 }
 0x5a8   :  { %3941 = shalt.err (!%p3938_p4)
}
 0x5a9   :  { %3837 = dma.vmem_to_hbm [thread:$0]  %s3835_s11, 32, %s5107_s7, [#allocation3]  }
 0x5aa   :  { %3950 = dma.done.wait [#allocation3], 32  }
 0x5ab   :  { %3951 = vsyncadd [#allocation3], 4294967264 }
 0x5ac   :  { %3841 = vsyncpa [#allocation3], 1 }

</bundles_post_ra>
